<compile_context>
chip_gen: v6e
topology: v6e:2x2x1
jax: 0.10.0
libtpu: 0.0.40
codegen_flags: <defaults>
</compile_context>

<pallas_src>
import numpy as np
import jax
import jax.numpy as jnp
from jax import lax
from jax.experimental import pallas as pl
from jax.experimental.pallas import tpu as pltpu


CIN_PAD = 8  # pad conv1 input channels 3 -> 8 so K = 3*3*8 = 72 (8-aligned)


# ---------------------------------------------------------------------------
# Fused Pallas kernel: conv1..conv4 + heads, one grid step per batch image.
# ---------------------------------------------------------------------------
def _pcn1_kernel(p1_ref, s2_ref, s3_ref, s4_ref,
                 w1_ref, b1_ref, w2_ref, b2_ref, w3_ref, b3_ref,
                 w4_ref, b4_ref, wh_ref, bh_ref, o_ref):
    def conv_taps(y, s_ref, w_ref, b_ref):
        # "im2col + matmul" as per-tap (one-hot-select @ y) @ W_tap accumulation:
        # only MXU matmuls, no in-kernel gathers / reshapes.
        n_taps = s_ref.shape[0]
        n_out = s_ref.shape[1]
        cin = w_ref.shape[0] // n_taps
        cout = w_ref.shape[1]
        acc = jnp.zeros((n_out, cout), jnp.float32)
        for t in range(n_taps):
            lhs = jnp.dot(s_ref[t], y, preferred_element_type=jnp.float32)
            acc = acc + jnp.dot(lhs.astype(jnp.bfloat16),
                                w_ref[t * cin:(t + 1) * cin, :],
                                preferred_element_type=jnp.float32)
        return jnp.maximum(acc + b_ref[...], 0.0)

    # conv1: patches were im2col'd in the wrapper -> plain matmul + bias + ReLU.
    y = jnp.dot(p1_ref[...], w1_ref[...], preferred_element_type=jnp.float32)
    y = jnp.maximum(y + b1_ref[...], 0.0).astype(jnp.bfloat16)          # (P1, 16)

    y = conv_taps(y, s2_ref, w2_ref, b2_ref).astype(jnp.bfloat16)       # (P2, 32)
    y = conv_taps(y, s3_ref, w3_ref, b3_ref).astype(jnp.bfloat16)       # (P3, 64)
    h = conv_taps(y, s4_ref, w4_ref, b4_ref)                            # (P4, 128)

    # All heads in one dot: columns 0..7 = [cls0,cls1,rot0,rot1,bb0,bb1,bb2,0],
    # columns 8..15 = pair-swapped cls/rot logits -> softmax pair == sigmoid.
    logits = jnp.dot(h.astype(jnp.bfloat16), wh_ref[...],
                     preferred_element_type=jnp.float32) + bh_ref[...]
    l = logits[:, :8]
    ls = logits[:, 8:]
    sig = 1.0 / (1.0 + jnp.exp(-(l - ls)))
    col = lax.broadcasted_iota(jnp.int32, l.shape, 1)
    # columns 0..3: softmax probabilities; columns 4..6: linear bbox; 7: pad.
    o_ref[...] = jnp.where(col < 4, sig, l)


def pcn1_pallas(p1, s2, s3, s4, w1, b1, w2, b2, w3, b3, w4, b4, wh, bh):
    B, P1, K1 = p1.shape
    P4 = s4.shape[1]

    def const_spec(a):
        if a.ndim == 2:
            return pl.BlockSpec(a.shape, lambda b: (0, 0))
        return pl.BlockSpec(a.shape, lambda b: (0, 0, 0))

    consts = (s2, s3, s4, w1, b1, w2, b2, w3, b3, w4, b4, wh, bh)
    return pl.pallas_call(
        _pcn1_kernel,
        out_shape=jax.ShapeDtypeStruct((B, P4, 8), jnp.float32),
        grid=(B,),
        in_specs=[pl.BlockSpec((None, P1, K1), lambda b: (b, 0, 0))]
                 + [const_spec(a) for a in consts],
        out_specs=pl.BlockSpec((None, P4, 8), lambda b: (b, 0, 0)),
        compiler_params=pltpu.CompilerParams(dimension_semantics=("parallel",)),
    )(p1, *consts)


# ---------------------------------------------------------------------------
# Wrapper-side glue (plain JAX, data movement only)
# ---------------------------------------------------------------------------
def _im2col(x_nhwc, kh, kw, stride):
    B, H, W, C = x_nhwc.shape
    Ho = (H - kh) // stride + 1
    Wo = (W - kw) // stride + 1
    cols = []
    for i in range(kh):
        for j in range(kw):
            cols.append(lax.slice(
                x_nhwc,
                (0, i, j, 0),
                (B, i + (Ho - 1) * stride + 1, j + (Wo - 1) * stride + 1, C),
                (1, stride, stride, 1)))
    patches = jnp.stack(cols, axis=3)                       # (B, Ho, Wo, kh*kw, C)
    return patches.reshape(B, Ho * Wo, kh * kw * C), (Ho, Wo)


def _select_mat(h_in, w_in, k, stride):
    # One-hot tap-selection matrices: S[t] @ y gathers, for every output pixel,
    # the input row hit by kernel tap t (row-major (h, w) flattening).
    h_out = (h_in - k) // stride + 1
    w_out = (w_in - k) // stride + 1
    s = np.zeros((k * k, h_out * w_out, h_in * w_in), np.float32)
    for i in range(k):
        for j in range(k):
            for oh in range(h_out):
                for ow in range(w_out):
                    s[i * k + j, oh * w_out + ow,
                      (stride * oh + i) * w_in + (stride * ow + j)] = 1.0
    return jnp.asarray(s, jnp.bfloat16), (h_out, w_out)


# ---------------------------------------------------------------------------
# One-time parameter preparation (hoisted out of the forward pass)
# ---------------------------------------------------------------------------
def prepare_params(params):
    def conv_mat(name, pad_cin_to=None):
        w, b = params[name]
        w = jnp.transpose(w, (2, 3, 1, 0))                  # OIHW -> HWIO
        if pad_cin_to is not None:
            w = jnp.pad(w, ((0, 0), (0, 0), (0, pad_cin_to - w.shape[2]), (0, 0)))
        kh, kw, cin, cout = w.shape
        return (w.reshape(kh * kw * cin, cout).astype(jnp.bfloat16),
                b.reshape(1, cout).astype(jnp.float32))

    prep = {
        "conv1": conv_mat("conv1", pad_cin_to=CIN_PAD),
        "conv2": conv_mat("conv2"),
        "conv3": conv_mat("conv3"),
        "conv4": conv_mat("conv4"),
    }

    # 1x1-conv heads: (Cout, 128, 1, 1) -> (128, Cout)
    wc = params["cls_prob"][0][:, :, 0, 0].T
    wr = params["rotate"][0][:, :, 0, 0].T
    wb = params["bbox"][0][:, :, 0, 0].T
    bc = params["cls_prob"][1]
    br = params["rotate"][1]
    bb = params["bbox"][1]
    z1 = jnp.zeros((wc.shape[0], 1), wc.dtype)
    z4 = jnp.zeros((wc.shape[0], 4), wc.dtype)
    w_main = jnp.concatenate([wc, wr, wb, z1], axis=1)                 # (128, 8)
    w_swap = jnp.concatenate([wc[:, ::-1], wr[:, ::-1], z4], axis=1)   # (128, 8)
    b_main = jnp.concatenate([bc, br, bb, jnp.zeros((1,), bc.dtype)])
    b_swap = jnp.concatenate([bc[::-1], br[::-1], jnp.zeros((4,), bc.dtype)])
    prep["heads_w"] = jnp.concatenate([w_main, w_swap], axis=1).astype(jnp.bfloat16)
    prep["heads_b"] = jnp.concatenate([b_main, b_swap]).reshape(1, 16).astype(jnp.float32)
    return jax.tree_util.tree_map(jnp.asarray, prep)


# ---------------------------------------------------------------------------
# Full PCN1 forward (NCHW in / NCHW out, like the PyTorch module)
# ---------------------------------------------------------------------------
@jax.jit
def pcn1_forward(x_nchw, prep):
    x = jnp.transpose(x_nchw, (0, 2, 3, 1))                            # NCHW -> NHWC
    x = jnp.pad(x, ((0, 0), (0, 0), (0, 0), (0, CIN_PAD - x.shape[3])))
    x = x.astype(jnp.bfloat16)
    B = x.shape[0]

    p1, (H1, W1) = _im2col(x, 3, 3, 2)                                 # (B, P1, 72)
    s2, (H2, W2) = _select_mat(H1, W1, 3, 2)
    s3, (H3, W3) = _select_mat(H2, W2, 3, 2)
    s4, (H4, W4) = _select_mat(H3, W3, 2, 1)

    heads = pcn1_pallas(p1, s2, s3, s4,
                        *prep["conv1"], *prep["conv2"], *prep["conv3"],
                        *prep["conv4"], prep["heads_w"], prep["heads_b"])

    def to_nchw(cols):
        return jnp.transpose(cols.reshape(B, H4, W4, -1), (0, 3, 1, 2))

    return (to_nchw(heads[..., 0:2]),
            to_nchw(heads[..., 2:4]),
            to_nchw(heads[..., 4:7]))


# ---------------------------------------------------------------------------
# Pure-JAX reference (lax.conv, NCHW/OIHW, f32) for correctness check
# ---------------------------------------------------------------------------
def pcn1_reference(x, params):
    def conv(x, wb, stride):
        w, b = wb
        y = lax.conv_general_dilated(
            x, w, (stride, stride), "VALID",
            dimension_numbers=("NCHW", "OIHW", "NCHW"))
        return y + b[None, :, None, None]

    x = jax.nn.relu(conv(x, params["conv1"], 2))
    x = jax.nn.relu(conv(x, params["conv2"], 2))
    x = jax.nn.relu(conv(x, params["conv3"], 2))
    x = jax.nn.relu(conv(x, params["conv4"], 1))
    cls = jax.nn.softmax(conv(x, params["cls_prob"], 1), axis=1)
    rot = jax.nn.softmax(conv(x, params["rotate"], 1), axis=1)
    bbox = conv(x, params["bbox"], 1)
    return cls, rot, bbox


# ---------------------------------------------------------------------------
# Deterministic parameter init (PyTorch default Conv2d init shapes/scales)
# ---------------------------------------------------------------------------
def init_params(key):
    shapes = {
        "conv1": (16, 3, 3, 3),
        "conv2": (32, 16, 3, 3),
        "conv3": (64, 32, 3, 3),
        "conv4": (128, 64, 2, 2),
        "rotate": (2, 128, 1, 1),
        "cls_prob": (2, 128, 1, 1),
        "bbox": (3, 128, 1, 1),
    }
    params = {}
    for name, (cout, cin, kh, kw) in shapes.items():
        key, kw_key, kb_key = jax.random.split(key, 3)
        bound = (cin * kh * kw) ** -0.5
        w = jax.random.uniform(kw_key, (cout, cin, kh, kw), jnp.float32, -bound, bound)
        b = jax.random.uniform(kb_key, (cout,), jnp.float32, -bound, bound)
        params[name] = (w, b)
    return params


if __name__ == "__main__":
    key = jax.random.PRNGKey(0)
    k_x, k_p = jax.random.split(key)

    # Input: batch=2, 3 channels, 32x32 -> conv stack yields 2x2 spatial maps.
    x = jax.random.normal(k_x, (2, 3, 32, 32), dtype=jnp.float32)
    params = init_params(k_p)
    prep = prepare_params(params)

    cls_p, rot_p, bbox_p = jax.block_until_ready(pcn1_forward(x, prep))
    cls_r, rot_r, bbox_r = jax.block_until_ready(pcn1_reference(x, params))

    assert cls_p.shape == (2, 2, 2, 2) and rot_p.shape == (2, 2, 2, 2) and bbox_p.shape == (2, 3, 2, 2)
    # bf16 MXU path (f32 accumulation) -> compare against the f32 reference at 2e-2.
    for a, b in ((cls_p, cls_r), (rot_p, rot_r), (bbox_p, bbox_r)):
        assert jnp.allclose(a, b, atol=2e-2, rtol=2e-2), float(jnp.max(jnp.abs(a - b)))

    print("KERNEL_OK")
</pallas_src>

<mosaic_0001>
module attributes {stable_mosaic.version = 11 : i64} {
  func.func @_pcn1_kernel(%arg0: i32, %arg1: memref<1x225x72xbf16, #tpu.memory_space<vmem>>, %arg2: memref<9x49x225xbf16, #tpu.memory_space<vmem>>, %arg3: memref<9x9x49xbf16, #tpu.memory_space<vmem>>, %arg4: memref<4x4x9xbf16, #tpu.memory_space<vmem>>, %arg5: memref<72x16xbf16, #tpu.memory_space<vmem>>, %arg6: memref<1x16xf32, #tpu.memory_space<vmem>>, %arg7: memref<144x32xbf16, #tpu.memory_space<vmem>>, %arg8: memref<1x32xf32, #tpu.memory_space<vmem>>, %arg9: memref<288x64xbf16, #tpu.memory_space<vmem>>, %arg10: memref<1x64xf32, #tpu.memory_space<vmem>>, %arg11: memref<256x128xbf16, #tpu.memory_space<vmem>>, %arg12: memref<1x128xf32, #tpu.memory_space<vmem>>, %arg13: memref<128x16xbf16, #tpu.memory_space<vmem>>, %arg14: memref<1x16xf32, #tpu.memory_space<vmem>>, %arg15: memref<1x4x8xf32, #tpu.memory_space<vmem>>) attributes {dimension_semantics = [#tpu.dimension_semantics<parallel>], iteration_bounds = array<i64: 2>, scalar_prefetch = 0 : i64, scratch_operands = 0 : i64, tpu.core_type = #tpu.core_type<tc>, window_params = [{transform_indices = @transform_0, window_bounds = array<i64: 1, 225, 72>}, {pipeline_mode = #tpu.pipeline_mode<synchronous>, transform_indices = @transform_1, window_bounds = array<i64: 9, 49, 225>}, {pipeline_mode = #tpu.pipeline_mode<synchronous>, transform_indices = @transform_2, window_bounds = array<i64: 9, 9, 49>}, {pipeline_mode = #tpu.pipeline_mode<synchronous>, transform_indices = @transform_3, window_bounds = array<i64: 4, 4, 9>}, {pipeline_mode = #tpu.pipeline_mode<synchronous>, transform_indices = @transform_4, window_bounds = array<i64: 72, 16>}, {pipeline_mode = #tpu.pipeline_mode<synchronous>, transform_indices = @transform_5, window_bounds = array<i64: 1, 16>}, {pipeline_mode = #tpu.pipeline_mode<synchronous>, transform_indices = @transform_6, window_bounds = array<i64: 144, 32>}, {pipeline_mode = #tpu.pipeline_mode<synchronous>, transform_indices = @transform_7, window_bounds = array<i64: 1, 32>}, {pipeline_mode = #tpu.pipeline_mode<synchronous>, transform_indices = @transform_8, window_bounds = array<i64: 288, 64>}, {pipeline_mode = #tpu.pipeline_mode<synchronous>, transform_indices = @transform_9, window_bounds = array<i64: 1, 64>}, {pipeline_mode = #tpu.pipeline_mode<synchronous>, transform_indices = @transform_10, window_bounds = array<i64: 256, 128>}, {pipeline_mode = #tpu.pipeline_mode<synchronous>, transform_indices = @transform_11, window_bounds = array<i64: 1, 128>}, {pipeline_mode = #tpu.pipeline_mode<synchronous>, transform_indices = @transform_12, window_bounds = array<i64: 128, 16>}, {pipeline_mode = #tpu.pipeline_mode<synchronous>, transform_indices = @transform_13, window_bounds = array<i64: 1, 16>}, {transform_indices = @transform_14, window_bounds = array<i64: 1, 4, 8>}]} {
    %c0 = arith.constant 0 : index
    %c0_0 = arith.constant 0 : index
    %c0_1 = arith.constant 0 : index
    %0 = vector.load %arg1[%c0, %c0_0, %c0_1] : memref<1x225x72xbf16, #tpu.memory_space<vmem>>, vector<1x225x72xbf16>
    %1 = vector.shape_cast %0 : vector<1x225x72xbf16> to vector<225x72xbf16>
    %c0_2 = arith.constant 0 : index
    %c0_3 = arith.constant 0 : index
    %2 = vector.load %arg5[%c0_2, %c0_3] : memref<72x16xbf16, #tpu.memory_space<vmem>>, vector<72x16xbf16>
    %cst = arith.constant dense<0.000000e+00> : vector<225x16xf32>
    %3 = tpu.matmul %1, %2, %cst {dimension_numbers = #tpu.dot_dimension_numbers<[1], [0], [0], [1], [0, 0, 1, 1], [], []>} : vector<225x72xbf16>, vector<72x16xbf16>, vector<225x16xf32> -> vector<225x16xf32>
    %c0_4 = arith.constant 0 : index
    %c0_5 = arith.constant 0 : index
    %4 = vector.load %arg6[%c0_4, %c0_5] : memref<1x16xf32, #tpu.memory_space<vmem>>, vector<1x16xf32>
    %5 = vector.broadcast %4 : vector<1x16xf32> to vector<225x16xf32>
    %6 = arith.addf %3, %5 : vector<225x16xf32>
    %cst_6 = arith.constant 0.000000e+00 : f32
    %7 = vector.broadcast %cst_6 : f32 to vector<225x16xf32>
    %8 = arith.maximumf %6, %7 : vector<225x16xf32>
    %9 = arith.truncf %8 : vector<225x16xf32> to vector<225x16xbf16>
    %cst_7 = arith.constant 0.000000e+00 : f32
    %10 = vector.broadcast %cst_7 : f32 to vector<49x32xf32>
    %c0_8 = arith.constant 0 : index
    %c0_9 = arith.constant 0 : index
    %c0_10 = arith.constant 0 : index
    %11 = vector.load %arg2[%c0_8, %c0_9, %c0_10] : memref<9x49x225xbf16, #tpu.memory_space<vmem>>, vector<1x49x225xbf16>
    %12 = vector.shape_cast %11 : vector<1x49x225xbf16> to vector<49x225xbf16>
    %cst_11 = arith.constant dense<0.000000e+00> : vector<49x16xf32>
    %13 = tpu.matmul %12, %9, %cst_11 {dimension_numbers = #tpu.dot_dimension_numbers<[1], [0], [0], [1], [0, 0, 1, 1], [], []>} : vector<49x225xbf16>, vector<225x16xbf16>, vector<49x16xf32> -> vector<49x16xf32>
    %14 = arith.truncf %13 : vector<49x16xf32> to vector<49x16xbf16>
    %c0_12 = arith.constant 0 : index
    %c0_13 = arith.constant 0 : index
    %15 = vector.load %arg7[%c0_12, %c0_13] : memref<144x32xbf16, #tpu.memory_space<vmem>>, vector<16x32xbf16>
    %cst_14 = arith.constant dense<0.000000e+00> : vector<49x32xf32>
    %16 = tpu.matmul %14, %15, %cst_14 {dimension_numbers = #tpu.dot_dimension_numbers<[1], [0], [0], [1], [0, 0, 1, 1], [], []>} : vector<49x16xbf16>, vector<16x32xbf16>, vector<49x32xf32> -> vector<49x32xf32>
    %17 = arith.addf %10, %16 : vector<49x32xf32>
    %c1 = arith.constant 1 : index
    %c0_15 = arith.constant 0 : index
    %c0_16 = arith.constant 0 : index
    %18 = vector.load %arg2[%c1, %c0_15, %c0_16] : memref<9x49x225xbf16, #tpu.memory_space<vmem>>, vector<1x49x225xbf16>
    %19 = vector.shape_cast %18 : vector<1x49x225xbf16> to vector<49x225xbf16>
    %cst_17 = arith.constant dense<0.000000e+00> : vector<49x16xf32>
    %20 = tpu.matmul %19, %9, %cst_17 {dimension_numbers = #tpu.dot_dimension_numbers<[1], [0], [0], [1], [0, 0, 1, 1], [], []>} : vector<49x225xbf16>, vector<225x16xbf16>, vector<49x16xf32> -> vector<49x16xf32>
    %21 = arith.truncf %20 : vector<49x16xf32> to vector<49x16xbf16>
    %c16 = arith.constant 16 : index
    %c0_18 = arith.constant 0 : index
    %22 = vector.load %arg7[%c16, %c0_18] : memref<144x32xbf16, #tpu.memory_space<vmem>>, vector<16x32xbf16>
    %cst_19 = arith.constant dense<0.000000e+00> : vector<49x32xf32>
    %23 = tpu.matmul %21, %22, %cst_19 {dimension_numbers = #tpu.dot_dimension_numbers<[1], [0], [0], [1], [0, 0, 1, 1], [], []>} : vector<49x16xbf16>, vector<16x32xbf16>, vector<49x32xf32> -> vector<49x32xf32>
    %24 = arith.addf %17, %23 : vector<49x32xf32>
    %c2 = arith.constant 2 : index
    %c0_20 = arith.constant 0 : index
    %c0_21 = arith.constant 0 : index
    %25 = vector.load %arg2[%c2, %c0_20, %c0_21] : memref<9x49x225xbf16, #tpu.memory_space<vmem>>, vector<1x49x225xbf16>
    %26 = vector.shape_cast %25 : vector<1x49x225xbf16> to vector<49x225xbf16>
    %cst_22 = arith.constant dense<0.000000e+00> : vector<49x16xf32>
    %27 = tpu.matmul %26, %9, %cst_22 {dimension_numbers = #tpu.dot_dimension_numbers<[1], [0], [0], [1], [0, 0, 1, 1], [], []>} : vector<49x225xbf16>, vector<225x16xbf16>, vector<49x16xf32> -> vector<49x16xf32>
    %28 = arith.truncf %27 : vector<49x16xf32> to vector<49x16xbf16>
    %c32 = arith.constant 32 : index
    %c0_23 = arith.constant 0 : index
    %29 = vector.load %arg7[%c32, %c0_23] : memref<144x32xbf16, #tpu.memory_space<vmem>>, vector<16x32xbf16>
    %cst_24 = arith.constant dense<0.000000e+00> : vector<49x32xf32>
    %30 = tpu.matmul %28, %29, %cst_24 {dimension_numbers = #tpu.dot_dimension_numbers<[1], [0], [0], [1], [0, 0, 1, 1], [], []>} : vector<49x16xbf16>, vector<16x32xbf16>, vector<49x32xf32> -> vector<49x32xf32>
    %31 = arith.addf %24, %30 : vector<49x32xf32>
    %c3 = arith.constant 3 : index
    %c0_25 = arith.constant 0 : index
    %c0_26 = arith.constant 0 : index
    %32 = vector.load %arg2[%c3, %c0_25, %c0_26] : memref<9x49x225xbf16, #tpu.memory_space<vmem>>, vector<1x49x225xbf16>
    %33 = vector.shape_cast %32 : vector<1x49x225xbf16> to vector<49x225xbf16>
    %cst_27 = arith.constant dense<0.000000e+00> : vector<49x16xf32>
    %34 = tpu.matmul %33, %9, %cst_27 {dimension_numbers = #tpu.dot_dimension_numbers<[1], [0], [0], [1], [0, 0, 1, 1], [], []>} : vector<49x225xbf16>, vector<225x16xbf16>, vector<49x16xf32> -> vector<49x16xf32>
    %35 = arith.truncf %34 : vector<49x16xf32> to vector<49x16xbf16>
    %c48 = arith.constant 48 : index
    %c0_28 = arith.constant 0 : index
    %36 = vector.load %arg7[%c48, %c0_28] : memref<144x32xbf16, #tpu.memory_space<vmem>>, vector<16x32xbf16>
    %cst_29 = arith.constant dense<0.000000e+00> : vector<49x32xf32>
    %37 = tpu.matmul %35, %36, %cst_29 {dimension_numbers = #tpu.dot_dimension_numbers<[1], [0], [0], [1], [0, 0, 1, 1], [], []>} : vector<49x16xbf16>, vector<16x32xbf16>, vector<49x32xf32> -> vector<49x32xf32>
    %38 = arith.addf %31, %37 : vector<49x32xf32>
    %c4 = arith.constant 4 : index
    %c0_30 = arith.constant 0 : index
    %c0_31 = arith.constant 0 : index
    %39 = vector.load %arg2[%c4, %c0_30, %c0_31] : memref<9x49x225xbf16, #tpu.memory_space<vmem>>, vector<1x49x225xbf16>
    %40 = vector.shape_cast %39 : vector<1x49x225xbf16> to vector<49x225xbf16>
    %cst_32 = arith.constant dense<0.000000e+00> : vector<49x16xf32>
    %41 = tpu.matmul %40, %9, %cst_32 {dimension_numbers = #tpu.dot_dimension_numbers<[1], [0], [0], [1], [0, 0, 1, 1], [], []>} : vector<49x225xbf16>, vector<225x16xbf16>, vector<49x16xf32> -> vector<49x16xf32>
    %42 = arith.truncf %41 : vector<49x16xf32> to vector<49x16xbf16>
    %c64 = arith.constant 64 : index
    %c0_33 = arith.constant 0 : index
    %43 = vector.load %arg7[%c64, %c0_33] : memref<144x32xbf16, #tpu.memory_space<vmem>>, vector<16x32xbf16>
    %cst_34 = arith.constant dense<0.000000e+00> : vector<49x32xf32>
    %44 = tpu.matmul %42, %43, %cst_34 {dimension_numbers = #tpu.dot_dimension_numbers<[1], [0], [0], [1], [0, 0, 1, 1], [], []>} : vector<49x16xbf16>, vector<16x32xbf16>, vector<49x32xf32> -> vector<49x32xf32>
    %45 = arith.addf %38, %44 : vector<49x32xf32>
    %c5 = arith.constant 5 : index
    %c0_35 = arith.constant 0 : index
    %c0_36 = arith.constant 0 : index
    %46 = vector.load %arg2[%c5, %c0_35, %c0_36] : memref<9x49x225xbf16, #tpu.memory_space<vmem>>, vector<1x49x225xbf16>
    %47 = vector.shape_cast %46 : vector<1x49x225xbf16> to vector<49x225xbf16>
    %cst_37 = arith.constant dense<0.000000e+00> : vector<49x16xf32>
    %48 = tpu.matmul %47, %9, %cst_37 {dimension_numbers = #tpu.dot_dimension_numbers<[1], [0], [0], [1], [0, 0, 1, 1], [], []>} : vector<49x225xbf16>, vector<225x16xbf16>, vector<49x16xf32> -> vector<49x16xf32>
    %49 = arith.truncf %48 : vector<49x16xf32> to vector<49x16xbf16>
    %c80 = arith.constant 80 : index
    %c0_38 = arith.constant 0 : index
    %50 = vector.load %arg7[%c80, %c0_38] : memref<144x32xbf16, #tpu.memory_space<vmem>>, vector<16x32xbf16>
    %cst_39 = arith.constant dense<0.000000e+00> : vector<49x32xf32>
    %51 = tpu.matmul %49, %50, %cst_39 {dimension_numbers = #tpu.dot_dimension_numbers<[1], [0], [0], [1], [0, 0, 1, 1], [], []>} : vector<49x16xbf16>, vector<16x32xbf16>, vector<49x32xf32> -> vector<49x32xf32>
    %52 = arith.addf %45, %51 : vector<49x32xf32>
    %c6 = arith.constant 6 : index
    %c0_40 = arith.constant 0 : index
    %c0_41 = arith.constant 0 : index
    %53 = vector.load %arg2[%c6, %c0_40, %c0_41] : memref<9x49x225xbf16, #tpu.memory_space<vmem>>, vector<1x49x225xbf16>
    %54 = vector.shape_cast %53 : vector<1x49x225xbf16> to vector<49x225xbf16>
    %cst_42 = arith.constant dense<0.000000e+00> : vector<49x16xf32>
    %55 = tpu.matmul %54, %9, %cst_42 {dimension_numbers = #tpu.dot_dimension_numbers<[1], [0], [0], [1], [0, 0, 1, 1], [], []>} : vector<49x225xbf16>, vector<225x16xbf16>, vector<49x16xf32> -> vector<49x16xf32>
    %56 = arith.truncf %55 : vector<49x16xf32> to vector<49x16xbf16>
    %c96 = arith.constant 96 : index
    %c0_43 = arith.constant 0 : index
    %57 = vector.load %arg7[%c96, %c0_43] : memref<144x32xbf16, #tpu.memory_space<vmem>>, vector<16x32xbf16>
    %cst_44 = arith.constant dense<0.000000e+00> : vector<49x32xf32>
    %58 = tpu.matmul %56, %57, %cst_44 {dimension_numbers = #tpu.dot_dimension_numbers<[1], [0], [0], [1], [0, 0, 1, 1], [], []>} : vector<49x16xbf16>, vector<16x32xbf16>, vector<49x32xf32> -> vector<49x32xf32>
    %59 = arith.addf %52, %58 : vector<49x32xf32>
    %c7 = arith.constant 7 : index
    %c0_45 = arith.constant 0 : index
    %c0_46 = arith.constant 0 : index
    %60 = vector.load %arg2[%c7, %c0_45, %c0_46] : memref<9x49x225xbf16, #tpu.memory_space<vmem>>, vector<1x49x225xbf16>
    %61 = vector.shape_cast %60 : vector<1x49x225xbf16> to vector<49x225xbf16>
    %cst_47 = arith.constant dense<0.000000e+00> : vector<49x16xf32>
    %62 = tpu.matmul %61, %9, %cst_47 {dimension_numbers = #tpu.dot_dimension_numbers<[1], [0], [0], [1], [0, 0, 1, 1], [], []>} : vector<49x225xbf16>, vector<225x16xbf16>, vector<49x16xf32> -> vector<49x16xf32>
    %63 = arith.truncf %62 : vector<49x16xf32> to vector<49x16xbf16>
    %c112 = arith.constant 112 : index
    %c0_48 = arith.constant 0 : index
    %64 = vector.load %arg7[%c112, %c0_48] : memref<144x32xbf16, #tpu.memory_space<vmem>>, vector<16x32xbf16>
    %cst_49 = arith.constant dense<0.000000e+00> : vector<49x32xf32>
    %65 = tpu.matmul %63, %64, %cst_49 {dimension_numbers = #tpu.dot_dimension_numbers<[1], [0], [0], [1], [0, 0, 1, 1], [], []>} : vector<49x16xbf16>, vector<16x32xbf16>, vector<49x32xf32> -> vector<49x32xf32>
    %66 = arith.addf %59, %65 : vector<49x32xf32>
    %c8 = arith.constant 8 : index
    %c0_50 = arith.constant 0 : index
    %c0_51 = arith.constant 0 : index
    %67 = vector.load %arg2[%c8, %c0_50, %c0_51] : memref<9x49x225xbf16, #tpu.memory_space<vmem>>, vector<1x49x225xbf16>
    %68 = vector.shape_cast %67 : vector<1x49x225xbf16> to vector<49x225xbf16>
    %cst_52 = arith.constant dense<0.000000e+00> : vector<49x16xf32>
    %69 = tpu.matmul %68, %9, %cst_52 {dimension_numbers = #tpu.dot_dimension_numbers<[1], [0], [0], [1], [0, 0, 1, 1], [], []>} : vector<49x225xbf16>, vector<225x16xbf16>, vector<49x16xf32> -> vector<49x16xf32>
    %70 = arith.truncf %69 : vector<49x16xf32> to vector<49x16xbf16>
    %c128 = arith.constant 128 : index
    %c0_53 = arith.constant 0 : index
    %71 = vector.load %arg7[%c128, %c0_53] : memref<144x32xbf16, #tpu.memory_space<vmem>>, vector<16x32xbf16>
    %cst_54 = arith.constant dense<0.000000e+00> : vector<49x32xf32>
    %72 = tpu.matmul %70, %71, %cst_54 {dimension_numbers = #tpu.dot_dimension_numbers<[1], [0], [0], [1], [0, 0, 1, 1], [], []>} : vector<49x16xbf16>, vector<16x32xbf16>, vector<49x32xf32> -> vector<49x32xf32>
    %73 = arith.addf %66, %72 : vector<49x32xf32>
    %c0_55 = arith.constant 0 : index
    %c0_56 = arith.constant 0 : index
    %74 = vector.load %arg8[%c0_55, %c0_56] : memref<1x32xf32, #tpu.memory_space<vmem>>, vector<1x32xf32>
    %75 = vector.broadcast %74 : vector<1x32xf32> to vector<49x32xf32>
    %76 = arith.addf %73, %75 : vector<49x32xf32>
    %cst_57 = arith.constant 0.000000e+00 : f32
    %77 = vector.broadcast %cst_57 : f32 to vector<49x32xf32>
    %78 = arith.maximumf %76, %77 : vector<49x32xf32>
    %79 = arith.truncf %78 : vector<49x32xf32> to vector<49x32xbf16>
    %cst_58 = arith.constant 0.000000e+00 : f32
    %80 = vector.broadcast %cst_58 : f32 to vector<9x64xf32>
    %c0_59 = arith.constant 0 : index
    %c0_60 = arith.constant 0 : index
    %c0_61 = arith.constant 0 : index
    %81 = vector.load %arg3[%c0_59, %c0_60, %c0_61] : memref<9x9x49xbf16, #tpu.memory_space<vmem>>, vector<1x9x49xbf16>
    %82 = vector.shape_cast %81 : vector<1x9x49xbf16> to vector<9x49xbf16>
    %cst_62 = arith.constant dense<0.000000e+00> : vector<9x32xf32>
    %83 = tpu.matmul %82, %79, %cst_62 {dimension_numbers = #tpu.dot_dimension_numbers<[1], [0], [0], [1], [0, 0, 1, 1], [], []>} : vector<9x49xbf16>, vector<49x32xbf16>, vector<9x32xf32> -> vector<9x32xf32>
    %84 = arith.truncf %83 : vector<9x32xf32> to vector<9x32xbf16>
    %c0_63 = arith.constant 0 : index
    %c0_64 = arith.constant 0 : index
    %85 = vector.load %arg9[%c0_63, %c0_64] : memref<288x64xbf16, #tpu.memory_space<vmem>>, vector<32x64xbf16>
    %cst_65 = arith.constant dense<0.000000e+00> : vector<9x64xf32>
    %86 = tpu.matmul %84, %85, %cst_65 {dimension_numbers = #tpu.dot_dimension_numbers<[1], [0], [0], [1], [0, 0, 1, 1], [], []>} : vector<9x32xbf16>, vector<32x64xbf16>, vector<9x64xf32> -> vector<9x64xf32>
    %87 = arith.addf %80, %86 : vector<9x64xf32>
    %c1_66 = arith.constant 1 : index
    %c0_67 = arith.constant 0 : index
    %c0_68 = arith.constant 0 : index
    %88 = vector.load %arg3[%c1_66, %c0_67, %c0_68] : memref<9x9x49xbf16, #tpu.memory_space<vmem>>, vector<1x9x49xbf16>
    %89 = vector.shape_cast %88 : vector<1x9x49xbf16> to vector<9x49xbf16>
    %cst_69 = arith.constant dense<0.000000e+00> : vector<9x32xf32>
    %90 = tpu.matmul %89, %79, %cst_69 {dimension_numbers = #tpu.dot_dimension_numbers<[1], [0], [0], [1], [0, 0, 1, 1], [], []>} : vector<9x49xbf16>, vector<49x32xbf16>, vector<9x32xf32> -> vector<9x32xf32>
    %91 = arith.truncf %90 : vector<9x32xf32> to vector<9x32xbf16>
    %c32_70 = arith.constant 32 : index
    %c0_71 = arith.constant 0 : index
    %92 = vector.load %arg9[%c32_70, %c0_71] : memref<288x64xbf16, #tpu.memory_space<vmem>>, vector<32x64xbf16>
    %cst_72 = arith.constant dense<0.000000e+00> : vector<9x64xf32>
    %93 = tpu.matmul %91, %92, %cst_72 {dimension_numbers = #tpu.dot_dimension_numbers<[1], [0], [0], [1], [0, 0, 1, 1], [], []>} : vector<9x32xbf16>, vector<32x64xbf16>, vector<9x64xf32> -> vector<9x64xf32>
    %94 = arith.addf %87, %93 : vector<9x64xf32>
    %c2_73 = arith.constant 2 : index
    %c0_74 = arith.constant 0 : index
    %c0_75 = arith.constant 0 : index
    %95 = vector.load %arg3[%c2_73, %c0_74, %c0_75] : memref<9x9x49xbf16, #tpu.memory_space<vmem>>, vector<1x9x49xbf16>
    %96 = vector.shape_cast %95 : vector<1x9x49xbf16> to vector<9x49xbf16>
    %cst_76 = arith.constant dense<0.000000e+00> : vector<9x32xf32>
    %97 = tpu.matmul %96, %79, %cst_76 {dimension_numbers = #tpu.dot_dimension_numbers<[1], [0], [0], [1], [0, 0, 1, 1], [], []>} : vector<9x49xbf16>, vector<49x32xbf16>, vector<9x32xf32> -> vector<9x32xf32>
    %98 = arith.truncf %97 : vector<9x32xf32> to vector<9x32xbf16>
    %c64_77 = arith.constant 64 : index
    %c0_78 = arith.constant 0 : index
    %99 = vector.load %arg9[%c64_77, %c0_78] : memref<288x64xbf16, #tpu.memory_space<vmem>>, vector<32x64xbf16>
    %cst_79 = arith.constant dense<0.000000e+00> : vector<9x64xf32>
    %100 = tpu.matmul %98, %99, %cst_79 {dimension_numbers = #tpu.dot_dimension_numbers<[1], [0], [0], [1], [0, 0, 1, 1], [], []>} : vector<9x32xbf16>, vector<32x64xbf16>, vector<9x64xf32> -> vector<9x64xf32>
    %101 = arith.addf %94, %100 : vector<9x64xf32>
    %c3_80 = arith.constant 3 : index
    %c0_81 = arith.constant 0 : index
    %c0_82 = arith.constant 0 : index
    %102 = vector.load %arg3[%c3_80, %c0_81, %c0_82] : memref<9x9x49xbf16, #tpu.memory_space<vmem>>, vector<1x9x49xbf16>
    %103 = vector.shape_cast %102 : vector<1x9x49xbf16> to vector<9x49xbf16>
    %cst_83 = arith.constant dense<0.000000e+00> : vector<9x32xf32>
    %104 = tpu.matmul %103, %79, %cst_83 {dimension_numbers = #tpu.dot_dimension_numbers<[1], [0], [0], [1], [0, 0, 1, 1], [], []>} : vector<9x49xbf16>, vector<49x32xbf16>, vector<9x32xf32> -> vector<9x32xf32>
    %105 = arith.truncf %104 : vector<9x32xf32> to vector<9x32xbf16>
    %c96_84 = arith.constant 96 : index
    %c0_85 = arith.constant 0 : index
    %106 = vector.load %arg9[%c96_84, %c0_85] : memref<288x64xbf16, #tpu.memory_space<vmem>>, vector<32x64xbf16>
    %cst_86 = arith.constant dense<0.000000e+00> : vector<9x64xf32>
    %107 = tpu.matmul %105, %106, %cst_86 {dimension_numbers = #tpu.dot_dimension_numbers<[1], [0], [0], [1], [0, 0, 1, 1], [], []>} : vector<9x32xbf16>, vector<32x64xbf16>, vector<9x64xf32> -> vector<9x64xf32>
    %108 = arith.addf %101, %107 : vector<9x64xf32>
    %c4_87 = arith.constant 4 : index
    %c0_88 = arith.constant 0 : index
    %c0_89 = arith.constant 0 : index
    %109 = vector.load %arg3[%c4_87, %c0_88, %c0_89] : memref<9x9x49xbf16, #tpu.memory_space<vmem>>, vector<1x9x49xbf16>
    %110 = vector.shape_cast %109 : vector<1x9x49xbf16> to vector<9x49xbf16>
    %cst_90 = arith.constant dense<0.000000e+00> : vector<9x32xf32>
    %111 = tpu.matmul %110, %79, %cst_90 {dimension_numbers = #tpu.dot_dimension_numbers<[1], [0], [0], [1], [0, 0, 1, 1], [], []>} : vector<9x49xbf16>, vector<49x32xbf16>, vector<9x32xf32> -> vector<9x32xf32>
    %112 = arith.truncf %111 : vector<9x32xf32> to vector<9x32xbf16>
    %c128_91 = arith.constant 128 : index
    %c0_92 = arith.constant 0 : index
    %113 = vector.load %arg9[%c128_91, %c0_92] : memref<288x64xbf16, #tpu.memory_space<vmem>>, vector<32x64xbf16>
    %cst_93 = arith.constant dense<0.000000e+00> : vector<9x64xf32>
    %114 = tpu.matmul %112, %113, %cst_93 {dimension_numbers = #tpu.dot_dimension_numbers<[1], [0], [0], [1], [0, 0, 1, 1], [], []>} : vector<9x32xbf16>, vector<32x64xbf16>, vector<9x64xf32> -> vector<9x64xf32>
    %115 = arith.addf %108, %114 : vector<9x64xf32>
    %c5_94 = arith.constant 5 : index
    %c0_95 = arith.constant 0 : index
    %c0_96 = arith.constant 0 : index
    %116 = vector.load %arg3[%c5_94, %c0_95, %c0_96] : memref<9x9x49xbf16, #tpu.memory_space<vmem>>, vector<1x9x49xbf16>
    %117 = vector.shape_cast %116 : vector<1x9x49xbf16> to vector<9x49xbf16>
    %cst_97 = arith.constant dense<0.000000e+00> : vector<9x32xf32>
    %118 = tpu.matmul %117, %79, %cst_97 {dimension_numbers = #tpu.dot_dimension_numbers<[1], [0], [0], [1], [0, 0, 1, 1], [], []>} : vector<9x49xbf16>, vector<49x32xbf16>, vector<9x32xf32> -> vector<9x32xf32>
    %119 = arith.truncf %118 : vector<9x32xf32> to vector<9x32xbf16>
    %c160 = arith.constant 160 : index
    %c0_98 = arith.constant 0 : index
    %120 = vector.load %arg9[%c160, %c0_98] : memref<288x64xbf16, #tpu.memory_space<vmem>>, vector<32x64xbf16>
    %cst_99 = arith.constant dense<0.000000e+00> : vector<9x64xf32>
    %121 = tpu.matmul %119, %120, %cst_99 {dimension_numbers = #tpu.dot_dimension_numbers<[1], [0], [0], [1], [0, 0, 1, 1], [], []>} : vector<9x32xbf16>, vector<32x64xbf16>, vector<9x64xf32> -> vector<9x64xf32>
    %122 = arith.addf %115, %121 : vector<9x64xf32>
    %c6_100 = arith.constant 6 : index
    %c0_101 = arith.constant 0 : index
    %c0_102 = arith.constant 0 : index
    %123 = vector.load %arg3[%c6_100, %c0_101, %c0_102] : memref<9x9x49xbf16, #tpu.memory_space<vmem>>, vector<1x9x49xbf16>
    %124 = vector.shape_cast %123 : vector<1x9x49xbf16> to vector<9x49xbf16>
    %cst_103 = arith.constant dense<0.000000e+00> : vector<9x32xf32>
    %125 = tpu.matmul %124, %79, %cst_103 {dimension_numbers = #tpu.dot_dimension_numbers<[1], [0], [0], [1], [0, 0, 1, 1], [], []>} : vector<9x49xbf16>, vector<49x32xbf16>, vector<9x32xf32> -> vector<9x32xf32>
    %126 = arith.truncf %125 : vector<9x32xf32> to vector<9x32xbf16>
    %c192 = arith.constant 192 : index
    %c0_104 = arith.constant 0 : index
    %127 = vector.load %arg9[%c192, %c0_104] : memref<288x64xbf16, #tpu.memory_space<vmem>>, vector<32x64xbf16>
    %cst_105 = arith.constant dense<0.000000e+00> : vector<9x64xf32>
    %128 = tpu.matmul %126, %127, %cst_105 {dimension_numbers = #tpu.dot_dimension_numbers<[1], [0], [0], [1], [0, 0, 1, 1], [], []>} : vector<9x32xbf16>, vector<32x64xbf16>, vector<9x64xf32> -> vector<9x64xf32>
    %129 = arith.addf %122, %128 : vector<9x64xf32>
    %c7_106 = arith.constant 7 : index
    %c0_107 = arith.constant 0 : index
    %c0_108 = arith.constant 0 : index
    %130 = vector.load %arg3[%c7_106, %c0_107, %c0_108] : memref<9x9x49xbf16, #tpu.memory_space<vmem>>, vector<1x9x49xbf16>
    %131 = vector.shape_cast %130 : vector<1x9x49xbf16> to vector<9x49xbf16>
    %cst_109 = arith.constant dense<0.000000e+00> : vector<9x32xf32>
    %132 = tpu.matmul %131, %79, %cst_109 {dimension_numbers = #tpu.dot_dimension_numbers<[1], [0], [0], [1], [0, 0, 1, 1], [], []>} : vector<9x49xbf16>, vector<49x32xbf16>, vector<9x32xf32> -> vector<9x32xf32>
    %133 = arith.truncf %132 : vector<9x32xf32> to vector<9x32xbf16>
    %c224 = arith.constant 224 : index
    %c0_110 = arith.constant 0 : index
    %134 = vector.load %arg9[%c224, %c0_110] : memref<288x64xbf16, #tpu.memory_space<vmem>>, vector<32x64xbf16>
    %cst_111 = arith.constant dense<0.000000e+00> : vector<9x64xf32>
    %135 = tpu.matmul %133, %134, %cst_111 {dimension_numbers = #tpu.dot_dimension_numbers<[1], [0], [0], [1], [0, 0, 1, 1], [], []>} : vector<9x32xbf16>, vector<32x64xbf16>, vector<9x64xf32> -> vector<9x64xf32>
    %136 = arith.addf %129, %135 : vector<9x64xf32>
    %c8_112 = arith.constant 8 : index
    %c0_113 = arith.constant 0 : index
    %c0_114 = arith.constant 0 : index
    %137 = vector.load %arg3[%c8_112, %c0_113, %c0_114] : memref<9x9x49xbf16, #tpu.memory_space<vmem>>, vector<1x9x49xbf16>
    %138 = vector.shape_cast %137 : vector<1x9x49xbf16> to vector<9x49xbf16>
    %cst_115 = arith.constant dense<0.000000e+00> : vector<9x32xf32>
    %139 = tpu.matmul %138, %79, %cst_115 {dimension_numbers = #tpu.dot_dimension_numbers<[1], [0], [0], [1], [0, 0, 1, 1], [], []>} : vector<9x49xbf16>, vector<49x32xbf16>, vector<9x32xf32> -> vector<9x32xf32>
    %140 = arith.truncf %139 : vector<9x32xf32> to vector<9x32xbf16>
    %c256 = arith.constant 256 : index
    %c0_116 = arith.constant 0 : index
    %141 = vector.load %arg9[%c256, %c0_116] : memref<288x64xbf16, #tpu.memory_space<vmem>>, vector<32x64xbf16>
    %cst_117 = arith.constant dense<0.000000e+00> : vector<9x64xf32>
    %142 = tpu.matmul %140, %141, %cst_117 {dimension_numbers = #tpu.dot_dimension_numbers<[1], [0], [0], [1], [0, 0, 1, 1], [], []>} : vector<9x32xbf16>, vector<32x64xbf16>, vector<9x64xf32> -> vector<9x64xf32>
    %143 = arith.addf %136, %142 : vector<9x64xf32>
    %c0_118 = arith.constant 0 : index
    %c0_119 = arith.constant 0 : index
    %144 = vector.load %arg10[%c0_118, %c0_119] : memref<1x64xf32, #tpu.memory_space<vmem>>, vector<1x64xf32>
    %145 = vector.broadcast %144 : vector<1x64xf32> to vector<9x64xf32>
    %146 = arith.addf %143, %145 : vector<9x64xf32>
    %cst_120 = arith.constant 0.000000e+00 : f32
    %147 = vector.broadcast %cst_120 : f32 to vector<9x64xf32>
    %148 = arith.maximumf %146, %147 : vector<9x64xf32>
    %149 = arith.truncf %148 : vector<9x64xf32> to vector<9x64xbf16>
    %cst_121 = arith.constant 0.000000e+00 : f32
    %150 = vector.broadcast %cst_121 : f32 to vector<4x128xf32>
    %c0_122 = arith.constant 0 : index
    %c0_123 = arith.constant 0 : index
    %c0_124 = arith.constant 0 : index
    %151 = vector.load %arg4[%c0_122, %c0_123, %c0_124] : memref<4x4x9xbf16, #tpu.memory_space<vmem>>, vector<1x4x9xbf16>
    %152 = vector.shape_cast %151 : vector<1x4x9xbf16> to vector<4x9xbf16>
    %cst_125 = arith.constant dense<0.000000e+00> : vector<4x64xf32>
    %153 = tpu.matmul %152, %149, %cst_125 {dimension_numbers = #tpu.dot_dimension_numbers<[1], [0], [0], [1], [0, 0, 1, 1], [], []>} : vector<4x9xbf16>, vector<9x64xbf16>, vector<4x64xf32> -> vector<4x64xf32>
    %154 = arith.truncf %153 : vector<4x64xf32> to vector<4x64xbf16>
    %c0_126 = arith.constant 0 : index
    %c0_127 = arith.constant 0 : index
    %155 = vector.load %arg11[%c0_126, %c0_127] : memref<256x128xbf16, #tpu.memory_space<vmem>>, vector<64x128xbf16>
    %cst_128 = arith.constant dense<0.000000e+00> : vector<4x128xf32>
    %156 = tpu.matmul %154, %155, %cst_128 {dimension_numbers = #tpu.dot_dimension_numbers<[1], [0], [0], [1], [0, 0, 1, 1], [], []>} : vector<4x64xbf16>, vector<64x128xbf16>, vector<4x128xf32> -> vector<4x128xf32>
    %157 = arith.addf %150, %156 : vector<4x128xf32>
    %c1_129 = arith.constant 1 : index
    %c0_130 = arith.constant 0 : index
    %c0_131 = arith.constant 0 : index
    %158 = vector.load %arg4[%c1_129, %c0_130, %c0_131] : memref<4x4x9xbf16, #tpu.memory_space<vmem>>, vector<1x4x9xbf16>
    %159 = vector.shape_cast %158 : vector<1x4x9xbf16> to vector<4x9xbf16>
    %cst_132 = arith.constant dense<0.000000e+00> : vector<4x64xf32>
    %160 = tpu.matmul %159, %149, %cst_132 {dimension_numbers = #tpu.dot_dimension_numbers<[1], [0], [0], [1], [0, 0, 1, 1], [], []>} : vector<4x9xbf16>, vector<9x64xbf16>, vector<4x64xf32> -> vector<4x64xf32>
    %161 = arith.truncf %160 : vector<4x64xf32> to vector<4x64xbf16>
    %c64_133 = arith.constant 64 : index
    %c0_134 = arith.constant 0 : index
    %162 = vector.load %arg11[%c64_133, %c0_134] : memref<256x128xbf16, #tpu.memory_space<vmem>>, vector<64x128xbf16>
    %cst_135 = arith.constant dense<0.000000e+00> : vector<4x128xf32>
    %163 = tpu.matmul %161, %162, %cst_135 {dimension_numbers = #tpu.dot_dimension_numbers<[1], [0], [0], [1], [0, 0, 1, 1], [], []>} : vector<4x64xbf16>, vector<64x128xbf16>, vector<4x128xf32> -> vector<4x128xf32>
    %164 = arith.addf %157, %163 : vector<4x128xf32>
    %c2_136 = arith.constant 2 : index
    %c0_137 = arith.constant 0 : index
    %c0_138 = arith.constant 0 : index
    %165 = vector.load %arg4[%c2_136, %c0_137, %c0_138] : memref<4x4x9xbf16, #tpu.memory_space<vmem>>, vector<1x4x9xbf16>
    %166 = vector.shape_cast %165 : vector<1x4x9xbf16> to vector<4x9xbf16>
    %cst_139 = arith.constant dense<0.000000e+00> : vector<4x64xf32>
    %167 = tpu.matmul %166, %149, %cst_139 {dimension_numbers = #tpu.dot_dimension_numbers<[1], [0], [0], [1], [0, 0, 1, 1], [], []>} : vector<4x9xbf16>, vector<9x64xbf16>, vector<4x64xf32> -> vector<4x64xf32>
    %168 = arith.truncf %167 : vector<4x64xf32> to vector<4x64xbf16>
    %c128_140 = arith.constant 128 : index
    %c0_141 = arith.constant 0 : index
    %169 = vector.load %arg11[%c128_140, %c0_141] : memref<256x128xbf16, #tpu.memory_space<vmem>>, vector<64x128xbf16>
    %cst_142 = arith.constant dense<0.000000e+00> : vector<4x128xf32>
    %170 = tpu.matmul %168, %169, %cst_142 {dimension_numbers = #tpu.dot_dimension_numbers<[1], [0], [0], [1], [0, 0, 1, 1], [], []>} : vector<4x64xbf16>, vector<64x128xbf16>, vector<4x128xf32> -> vector<4x128xf32>
    %171 = arith.addf %164, %170 : vector<4x128xf32>
    %c3_143 = arith.constant 3 : index
    %c0_144 = arith.constant 0 : index
    %c0_145 = arith.constant 0 : index
    %172 = vector.load %arg4[%c3_143, %c0_144, %c0_145] : memref<4x4x9xbf16, #tpu.memory_space<vmem>>, vector<1x4x9xbf16>
    %173 = vector.shape_cast %172 : vector<1x4x9xbf16> to vector<4x9xbf16>
    %cst_146 = arith.constant dense<0.000000e+00> : vector<4x64xf32>
    %174 = tpu.matmul %173, %149, %cst_146 {dimension_numbers = #tpu.dot_dimension_numbers<[1], [0], [0], [1], [0, 0, 1, 1], [], []>} : vector<4x9xbf16>, vector<9x64xbf16>, vector<4x64xf32> -> vector<4x64xf32>
    %175 = arith.truncf %174 : vector<4x64xf32> to vector<4x64xbf16>
    %c192_147 = arith.constant 192 : index
    %c0_148 = arith.constant 0 : index
    %176 = vector.load %arg11[%c192_147, %c0_148] : memref<256x128xbf16, #tpu.memory_space<vmem>>, vector<64x128xbf16>
    %cst_149 = arith.constant dense<0.000000e+00> : vector<4x128xf32>
    %177 = tpu.matmul %175, %176, %cst_149 {dimension_numbers = #tpu.dot_dimension_numbers<[1], [0], [0], [1], [0, 0, 1, 1], [], []>} : vector<4x64xbf16>, vector<64x128xbf16>, vector<4x128xf32> -> vector<4x128xf32>
    %178 = arith.addf %171, %177 : vector<4x128xf32>
    %c0_150 = arith.constant 0 : index
    %c0_151 = arith.constant 0 : index
    %179 = vector.load %arg12[%c0_150, %c0_151] : memref<1x128xf32, #tpu.memory_space<vmem>>, vector<1x128xf32>
    %180 = vector.broadcast %179 : vector<1x128xf32> to vector<4x128xf32>
    %181 = arith.addf %178, %180 : vector<4x128xf32>
    %cst_152 = arith.constant 0.000000e+00 : f32
    %182 = vector.broadcast %cst_152 : f32 to vector<4x128xf32>
    %183 = arith.maximumf %181, %182 : vector<4x128xf32>
    %184 = arith.truncf %183 : vector<4x128xf32> to vector<4x128xbf16>
    %c0_153 = arith.constant 0 : index
    %c0_154 = arith.constant 0 : index
    %185 = vector.load %arg13[%c0_153, %c0_154] : memref<128x16xbf16, #tpu.memory_space<vmem>>, vector<128x16xbf16>
    %cst_155 = arith.constant dense<0.000000e+00> : vector<4x16xf32>
    %186 = tpu.matmul %184, %185, %cst_155 {dimension_numbers = #tpu.dot_dimension_numbers<[1], [0], [0], [1], [0, 0, 1, 1], [], []>} : vector<4x128xbf16>, vector<128x16xbf16>, vector<4x16xf32> -> vector<4x16xf32>
    %c0_156 = arith.constant 0 : index
    %c0_157 = arith.constant 0 : index
    %187 = vector.load %arg14[%c0_156, %c0_157] : memref<1x16xf32, #tpu.memory_space<vmem>>, vector<1x16xf32>
    %188 = vector.broadcast %187 : vector<1x16xf32> to vector<4x16xf32>
    %189 = arith.addf %186, %188 : vector<4x16xf32>
    %190 = vector.extract_strided_slice %189 {offsets = [0, 0], sizes = [4, 8], strides = [1, 1]} : vector<4x16xf32> to vector<4x8xf32>
    %191 = vector.extract_strided_slice %189 {offsets = [0, 8], sizes = [4, 8], strides = [1, 1]} : vector<4x16xf32> to vector<4x8xf32>
    %192 = arith.subf %190, %191 : vector<4x8xf32>
    %cst_158 = arith.constant 0.000000e+00 : f32
    %193 = vector.broadcast %cst_158 : f32 to vector<4x8xf32>
    %194 = arith.subf %193, %192 : vector<4x8xf32>
    %195 = math.exp %194 : vector<4x8xf32>
    %cst_159 = arith.constant 1.000000e+00 : f32
    %196 = vector.broadcast %cst_159 : f32 to vector<4x8xf32>
    %197 = arith.addf %196, %195 : vector<4x8xf32>
    %cst_160 = arith.constant 1.000000e+00 : f32
    %198 = vector.broadcast %cst_160 : f32 to vector<4x8xf32>
    %199 = arith.divf %198, %197 : vector<4x8xf32>
    %200 = tpu.iota {dimensions = array<i32: 1>} : vector<4x8xi32>
    %c4_i32 = arith.constant 4 : i32
    %201 = vector.broadcast %c4_i32 : i32 to vector<4x8xi32>
    %202 = arith.cmpi slt, %200, %201 : vector<4x8xi32>
    %203 = arith.select %202, %199, %190 : vector<4x8xi1>, vector<4x8xf32>
    %c0_161 = arith.constant 0 : index
    %c0_162 = arith.constant 0 : index
    %c0_163 = arith.constant 0 : index
    %204 = vector.load %arg15[%c0_161, %c0_162, %c0_163] : memref<1x4x8xf32, #tpu.memory_space<vmem>>, vector<1x4x8xf32>
    %205 = vector.shape_cast %204 : vector<1x4x8xf32> to vector<4x8xf32>
    %206 = vector.shape_cast %203 : vector<4x8xf32> to vector<1x4x8xf32>
    tpu.vector_store %arg15[%c0_161, %c0_162, %c0_163], %206 {strides = array<i32>} : memref<1x4x8xf32, #tpu.memory_space<vmem>>, vector<1x4x8xf32>,
    return
  }
  func.func @transform_0(%arg0: i32) -> (i32, i32, i32) {
    %c0_i32 = arith.constant 0 : i32
    %c0_i32_0 = arith.constant 0 : i32
    %c0_i32_1 = arith.constant 0 : i32
    return %arg0, %c0_i32, %c0_i32_0 : i32, i32, i32
  }
  func.func @transform_1(%arg0: i32) -> (i32, i32, i32) {
    %c0_i32 = arith.constant 0 : i32
    %c0_i32_0 = arith.constant 0 : i32
    %c0_i32_1 = arith.constant 0 : i32
    %c0_i32_2 = arith.constant 0 : i32
    return %c0_i32, %c0_i32_0, %c0_i32_1 : i32, i32, i32
  }
  func.func @transform_2(%arg0: i32) -> (i32, i32, i32) {
    %c0_i32 = arith.constant 0 : i32
    %c0_i32_0 = arith.constant 0 : i32
    %c0_i32_1 = arith.constant 0 : i32
    %c0_i32_2 = arith.constant 0 : i32
    return %c0_i32, %c0_i32_0, %c0_i32_1 : i32, i32, i32
  }
  func.func @transform_3(%arg0: i32) -> (i32, i32, i32) {
    %c0_i32 = arith.constant 0 : i32
    %c0_i32_0 = arith.constant 0 : i32
    %c0_i32_1 = arith.constant 0 : i32
    %c0_i32_2 = arith.constant 0 : i32
    return %c0_i32, %c0_i32_0, %c0_i32_1 : i32, i32, i32
  }
  func.func @transform_4(%arg0: i32) -> (i32, i32) {
    %c0_i32 = arith.constant 0 : i32
    %c0_i32_0 = arith.constant 0 : i32
    %c0_i32_1 = arith.constant 0 : i32
    return %c0_i32, %c0_i32_0 : i32, i32
  }
  func.func @transform_5(%arg0: i32) -> (i32, i32) {
    %c0_i32 = arith.constant 0 : i32
    %c0_i32_0 = arith.constant 0 : i32
    %c0_i32_1 = arith.constant 0 : i32
    return %c0_i32, %c0_i32_0 : i32, i32
  }
  func.func @transform_6(%arg0: i32) -> (i32, i32) {
    %c0_i32 = arith.constant 0 : i32
    %c0_i32_0 = arith.constant 0 : i32
    %c0_i32_1 = arith.constant 0 : i32
    return %c0_i32, %c0_i32_0 : i32, i32
  }
  func.func @transform_7(%arg0: i32) -> (i32, i32) {
    %c0_i32 = arith.constant 0 : i32
    %c0_i32_0 = arith.constant 0 : i32
    %c0_i32_1 = arith.constant 0 : i32
    return %c0_i32, %c0_i32_0 : i32, i32
  }
  func.func @transform_8(%arg0: i32) -> (i32, i32) {
    %c0_i32 = arith.constant 0 : i32
    %c0_i32_0 = arith.constant 0 : i32
    %c0_i32_1 = arith.constant 0 : i32
    return %c0_i32, %c0_i32_0 : i32, i32
  }
  func.func @transform_9(%arg0: i32) -> (i32, i32) {
    %c0_i32 = arith.constant 0 : i32
    %c0_i32_0 = arith.constant 0 : i32
    %c0_i32_1 = arith.constant 0 : i32
    return %c0_i32, %c0_i32_0 : i32, i32
  }
  func.func @transform_10(%arg0: i32) -> (i32, i32) {
    %c0_i32 = arith.constant 0 : i32
    %c0_i32_0 = arith.constant 0 : i32
    %c0_i32_1 = arith.constant 0 : i32
    return %c0_i32, %c0_i32_0 : i32, i32
  }
  func.func @transform_11(%arg0: i32) -> (i32, i32) {
    %c0_i32 = arith.constant 0 : i32
    %c0_i32_0 = arith.constant 0 : i32
    %c0_i32_1 = arith.constant 0 : i32
    return %c0_i32, %c0_i32_0 : i32, i32
  }
  func.func @transform_12(%arg0: i32) -> (i32, i32) {
    %c0_i32 = arith.constant 0 : i32
    %c0_i32_0 = arith.constant 0 : i32
    %c0_i32_1 = arith.constant 0 : i32
    return %c0_i32, %c0_i32_0 : i32, i32
  }
  func.func @transform_13(%arg0: i32) -> (i32, i32) {
    %c0_i32 = arith.constant 0 : i32
    %c0_i32_0 = arith.constant 0 : i32
    %c0_i32_1 = arith.constant 0 : i32
    return %c0_i32, %c0_i32_0 : i32, i32
  }
  func.func @transform_14(%arg0: i32) -> (i32, i32, i32) {
    %c0_i32 = arith.constant 0 : i32
    %c0_i32_0 = arith.constant 0 : i32
    %c0_i32_1 = arith.constant 0 : i32
    return %arg0, %c0_i32, %c0_i32_0 : i32, i32, i32
  }
}

</mosaic_0001>

<bundles_post_ra>
// kernel: pcn1_forward.1
= control target key start
LH: loop header
LB: loop body
LE: loop exit
PB: predicated region body
PF: predicated region fallthrough
CT: control target
= control target key end

     0   :  { %s5790_s29 = smov 0   ;;  %s7046_s0 = inlined_call_operand.vmem [shape: bf16[2,225,72], index: 0, kind: input, shape index: {}]   ;;  %s7047_s1 = inlined_call_operand.vmem [shape: bf16[9,49,225], index: 1, kind: input, shape index: {}]   ;;  %s7048_s2 = inlined_call_operand.vmem [shape: bf16[9,9,49], index: 2, kind: input, shape index: {}]   ;;  %s7049_s3 = inlined_call_operand.vmem [shape: bf16[4,4,9], index: 3, kind: input, shape index: {}]   ;;  %s7050_s4 = inlined_call_operand.vmem [shape: bf16[72,16], index: 4, kind: input, shape index: {}]   ;;  %s7051_s5 = inlined_call_operand.vmem [shape: f32[1,16], index: 5, kind: input, shape index: {}]   ;;  %s7052_s6 = inlined_call_operand.vmem [shape: bf16[144,32], index: 6, kind: input, shape index: {}]   ;;  %s7053_s7 = inlined_call_operand.vmem [shape: f32[1,32], index: 7, kind: input, shape index: {}]   ;;  %s7054_s8 = inlined_call_operand.vmem [shape: bf16[288,64], index: 8, kind: input, shape index: {}]   ;;  %s7055_s9 = inlined_call_operand.vmem [shape: f32[1,64], index: 9, kind: input, shape index: {}]   ;;  %s7056_s10 = inlined_call_operand.vmem [shape: bf16[256,128], index: 10, kind: input, shape index: {}]   ;;  %s7057_s11 = inlined_call_operand.vmem [shape: f32[1,128], index: 11, kind: input, shape index: {}]   ;;  %s7058_s12 = inlined_call_operand.vmem [shape: bf16[128,16], index: 12, kind: input, shape index: {}]   ;;  %s7059_s13 = inlined_call_operand.vmem [shape: f32[1,16], index: 13, kind: input, shape index: {}]   ;;  %s7060_s14 = inlined_call_operand.vmem [shape: f32[2,4,8], index: 14, kind: output, shape index: {}]  }
   0x1 LB: > { %s4515_s30 = sadd.s32 4294967295, %s5708_s29   ;;  %p4519_p0 = scmp.ge.s32.totalorder %s5708_s29, 1  ;;  %s5708_s29 = sphi %s5790_s29, %s24_s29  }
   0x2   : > { %p412_p1 = scmp.lt.s32.totalorder %s5708_s29, 3 }
   0x4   : > { %p413_p2 = pnand %p4519_p0, %p412_p1 }
   0x5   : > { %p457_p3 = scmp.lt.s32.totalorder (!%p413_p2), %s4515_s30, 1  ;;  %s5714_s27 = smov (!%p413_p2), 120  }
   0x6   : > { %416 = sbr.rel (%p413_p2) target bundleno = 4588 (0x11ec), region = 76 }
   0xb   : > { %v5519_v0 = vld [vmem:[%s7050_s4 + $0x20] ss:$0 sps:$4 sm:$0xff]   ;;  %vm658_vm0 = vcmask 1043456   ;;  %v5710_v1 = vmov 0.0   ;;  %v5520_v3 = vld [vmem:[%s7050_s4 + $0x18] sm:$0xff]   ;;  %v5521_v4 = vld [vmem:[%s7050_s4 + $0x10] sm:$0xff]  }
   0xc   : > { %5043 = vmatprep.subr.bf16.mxu0 %v5710_v1  ;;  %v660_v2 = vsel %vm658_vm0, %v5519_v0, 0  ;;  %vm5711_vm1 = vmmov 0   ;;  %s7062_s30 = smov (!%p457_p3, %s4515_s30), 1  ;;  %v5522_v5 = vld [vmem:[%s7050_s4 + $0x8] sm:$0xff]   ;;  %v5523_v6 = vld [vmem:[%s7050_s4] sm:$0xff]   ;;  %vm612_vm2 = vcmask 588800  }
   0xd   : > { %5044 = vmatpush3.bf16.msra.mxu0 %v660_v2  ;;  %5053 = vmatprep.mubr.msk.bf16.mxu0 %vm5711_vm1, %v5710_v1  ;;  %s5505_s23 = smul.u32 116, %s7062_s30  ;;  %v5712_v22 = vmov 0   ;;  %v5892_v23 = vld [vmem:[%s7051_s5] ss:$0 sm:$0xff]  ;;  %v5541_v43 = vld [vmem:[%s7047_s1 + $0x4] ss:$8 sps:$4 sm:$0xff]  }
   0xe   : > { %5045 = vmatprep.subr.bf16.mxu0 %v5710_v1  ;;  %917 = vmatprep.subr.bf16.mxu1 %v5712_v22  ;;  %vm898_vm3 = vcmask 793600   ;;  %vm911_vm4 = vcmask 1040384   ;;  %vm1116_vm5 = vcmask 130048   ;;  %vm2791_vm6 = vcmask 400384   ;;  %s4521_s28 = sshll.u32 %s7062_s30, 2 }
   0xf   : > { %s5822_s26 = scalar_lea.vmem %s7046_s0, %s5505_s23  ;;  %4566 = vmatprep.mubr.msk.bf16.mxu1 %vm898_vm3, %v5541_v43  ;;  %vm2913_vm7 = vcmask 261120   ;;  %vm3836_vm8 = vcmask 1044480   ;;  %vm3832_vm9 = vcmask 72704   ;;  %vm3969_vm10 = vcmask 523264   ;;  %s465_s17 = scalar_lea.vmem %s7060_s14, %s4521_s28 }
  0x10   : > { %v5524_v7 = vld [vmem:[%s5822_s26] sm:$0xff]   ;;  %v5525_v8 = vld [vmem:[%s5822_s26 + $0x8] sm:$0xff]   ;;  %v5526_v9 = vld [vmem:[%s5822_s26 + $0x10] sm:$0xff]   ;;  %vm4460_vm12 = vcmask 60416  }
  0x11   : > { %5046 = vmatpush3.bf16.msra.mxu0 %v5520_v3  ;;  %v5527_v10 = vld [vmem:[%s5822_s26 + $0x18] sm:$0xff]   ;;  %v5528_v11 = vld [vmem:[%s5822_s26 + $0x20] sm:$0xff]   ;;  %v5529_v12 = vld [vmem:[%s5822_s26 + $0x28] sm:$0xff]  }
  0x12   : > { %5047 = vmatprep.subr.bf16.mxu0 %v5710_v1  ;;  %v5530_v13 = vld [vmem:[%s5822_s26 + $0x30] sm:$0xff]   ;;  %v5531_v14 = vld [vmem:[%s5822_s26 + $0x38] sm:$0xff]   ;;  %v5532_v15 = vld [vmem:[%s5822_s26 + $0x40] sm:$0xff]  }
  0x13   : > { %v5533_v16 = vld [vmem:[%s5822_s26 + $0x48] sm:$0xff]   ;;  %v5534_v17 = vld [vmem:[%s5822_s26 + $0x50] sm:$0xff]   ;;  %v5535_v18 = vld [vmem:[%s5822_s26 + $0x58] sm:$0xff]  }
  0x14   : > { %v5536_v19 = vld [vmem:[%s5822_s26 + $0x60] sm:$0xff]   ;;  %v5537_v20 = vld [vmem:[%s5822_s26 + $0x68] sm:$0xff]   ;;  %v5538_v21 = vld [vmem:[%s5822_s26 + $0x70] ss:$0 sps:$4 sm:$0x11]  }
  0x15   : > { %5048 = vmatpush3.bf16.msra.mxu0 %v5521_v4 }
  0x16   : > { %5049 = vmatprep.subr.bf16.mxu0 %v5710_v1 }
  0x19   : > { %5050 = vmatpush3.bf16.msra.mxu0 %v5522_v5 }
  0x1a   : > { %5051 = vmatprep.subr.bf16.mxu0 %v5710_v1 }
  0x1d   : > { %5052 = vmatpush3.bf16.msra.mxu0 %v5523_v6 }
  0x1e   : > { %1040 = vmatprep.subr.bf16.mxu0 %v5712_v22 }
  0x20   : > { %5054 = vmatmul.mubr.msk.bf16.vlgmr.msra.gmra.mxu0 %vm612_vm2, %v5524_v7 }
  0x21   : > { %5057 = vmatprep.mubr.msk.bf16.mxu0 %vm5711_vm1, %v5710_v1 }
  0x28   : > { %5058 = vmatmul.mubr.msk.bf16.gmra.mxu0 %vm612_vm2, %v5525_v8 }
  0x29   : > { %5061 = vmatprep.mubr.msk.bf16.mxu0 %vm5711_vm1, %v5710_v1 }
  0x30   : > { %5062 = vmatmul.mubr.msk.bf16.gmra.mxu0 %vm612_vm2, %v5526_v9 }
  0x31   : > { %5065 = vmatprep.mubr.msk.bf16.mxu0 %vm5711_vm1, %v5710_v1 }
  0x38   : > { %5066 = vmatmul.mubr.msk.bf16.gmra.mxu0 %vm612_vm2, %v5527_v10 }
  0x39   : > { %5069 = vmatprep.mubr.msk.bf16.mxu0 %vm5711_vm1, %v5710_v1 }
  0x40   : > { %5070 = vmatmul.mubr.msk.bf16.gmra.mxu0 %vm612_vm2, %v5528_v11 }
  0x41   : > { %5073 = vmatprep.mubr.msk.bf16.mxu0 %vm5711_vm1, %v5710_v1 }
  0x48   : > { %5074 = vmatmul.mubr.msk.bf16.gmra.mxu0 %vm612_vm2, %v5529_v12 }
  0x49   : > { %5077 = vmatprep.mubr.msk.bf16.mxu0 %vm5711_vm1, %v5710_v1 }
  0x50   : > { %5078 = vmatmul.mubr.msk.bf16.gmra.mxu0 %vm612_vm2, %v5530_v13 }
  0x51   : > { %5081 = vmatprep.mubr.msk.bf16.mxu0 %vm5711_vm1, %v5710_v1 }
  0x58   : > { %5082 = vmatmul.mubr.msk.bf16.gmra.mxu0 %vm612_vm2, %v5531_v14 }
  0x59   : > { %5085 = vmatprep.mubr.msk.bf16.mxu0 %vm5711_vm1, %v5710_v1 }
  0x60   : > { %5086 = vmatmul.mubr.msk.bf16.gmra.mxu0 %vm612_vm2, %v5532_v15 }
  0x61   : > { %5089 = vmatprep.mubr.msk.bf16.mxu0 %vm5711_vm1, %v5710_v1 }
  0x68   : > { %5090 = vmatmul.mubr.msk.bf16.gmra.mxu0 %vm612_vm2, %v5533_v16 }
  0x69   : > { %5093 = vmatprep.mubr.msk.bf16.mxu0 %vm5711_vm1, %v5710_v1 }
  0x70   : > { %5094 = vmatmul.mubr.msk.bf16.gmra.mxu0 %vm612_vm2, %v5534_v17 }
  0x71   : > { %5097 = vmatprep.mubr.msk.bf16.mxu0 %vm5711_vm1, %v5710_v1 }
  0x78   : > { %5098 = vmatmul.mubr.msk.bf16.gmra.mxu0 %vm612_vm2, %v5535_v18 }
  0x79   : > { %5101 = vmatprep.mubr.msk.bf16.mxu0 %vm5711_vm1, %v5710_v1 }
  0x80   : > { %5102 = vmatmul.mubr.msk.bf16.gmra.mxu0 %vm612_vm2, %v5536_v19 }
  0x81   : > { %5105 = vmatprep.mubr.msk.bf16.mxu0 %vm5711_vm1, %v5710_v1 }
  0x88   : > { %5106 = vmatmul.mubr.msk.bf16.gmra.mxu0 %vm612_vm2, %v5537_v20 }
  0x89   : > { %5109 = vmatprep.mubr.msk.bf16.mxu0 %vm5711_vm1, %v5710_v1 }
  0x90   : > { %5110 = vmatmul.mubr.msk.bf16.gmra.mxu0 %vm612_vm2, %v5538_v21 }
  0xe0   : > { %v696_v24 = vpop.f32.mrf.mxu0 }
  0xe1   : > { %v697_v26 = vadd.f32 %v5892_v23, %v696_v24 }
  0xe2   : > { %v5055_v25 = vpop.f32.mrf.mxu0 }
  0xe3   : > { %v814_v30 = vmax.f32 %v697_v26, 0.0  ;;  %v5552_v26 = vld [vmem:[%s7047_s1 + $0x3c] ss:$8 sps:$4 sm:$0xff]  }
  0xe4   : > { %v699_v27 = vpop.f32.mrf.mxu0  ;;  %4585 = vmatprep.mubr.msk.bf16.mxu0 %vm898_vm3, %v5552_v26 }
  0xe5   : > { %v700_v28 = vadd.f32 %v5892_v23, %v699_v27 }
  0xe6   : > { %v5056_v29 = vpop.f32.mrf.mxu0 }
  0xe7   : > { %v815_v31 = vmax.f32 %v700_v28, 0.0 }
  0xe8   : > { %v704_v32 = vpop.f32.mrf.mxu0 }
  0xe9   : > { %v5896_v33 = vpack.c.bf16 %v815_v31, %v814_v30  ;;  %v705_v35 = vadd.f32 %v5892_v23, %v704_v32 }
  0xea   : > { %v5059_v34 = vpop.f32.mrf.mxu0 }
  0xeb   : > { %v816_v39 = vmax.f32 %v705_v35, 0.0 }
  0xec   : > { %v707_v36 = vpop.f32.mrf.mxu0 }
  0xed   : > { %v708_v37 = vadd.f32 %v5892_v23, %v707_v36 }
  0xee   : > { %v5060_v38 = vpop.f32.mrf.mxu0 }
  0xef   : > { %v817_v40 = vmax.f32 %v708_v37, 0.0 }
  0xf0   : > { %v5900_v41 = vpop.f32.mrf.mxu0 }
  0xf1   : > { %v5902_v42 = vpack.c.bf16 %v817_v40, %v816_v39 }
  0xf2   : > { %v5063_v44 = vpop.f32.mrf.mxu0 }
  0xf4   : > { %v5908_v45 = vpop.f32.mrf.mxu0 }
  0xf5   : > { %v716_v43 = vadd.f32 %v5892_v23, %v5908_v45 }
  0xf6   : > { %v5064_v46 = vpop.f32.mrf.mxu0 }
  0xf8   : > { %v720_v47 = vpop.f32.mrf.mxu0 }
  0xf9   : > { %v721_v38 = vadd.f32 %v5892_v23, %v720_v47  ;;  %v713_v47 = vadd.f32 %v5892_v23, %v5900_v41 }
  0xfa   : > { %v5067_v48 = vpop.f32.mrf.mxu0 }
  0xfc   : > { %v723_v49 = vpop.f32.mrf.mxu0 }
  0xfd   : > { %v724_v32 = vadd.f32 %v5892_v23, %v723_v49  ;;  %v820_v49 = vmax.f32 %v721_v38, 0.0 }
  0xfe   : > { %v5068_v50 = vpop.f32.mrf.mxu0 }
  0xff   : > { %v821_v44 = vmax.f32 %v724_v32, 0.0 }
 0x100   : > { %v728_v51 = vpop.f32.mrf.mxu0 }
 0x101   : > { %v729_v27 = vadd.f32 %v5892_v23, %v728_v51  ;;  %v819_v51 = vmax.f32 %v716_v43, 0.0  ;;  %v5962_v45 = vpack.c.bf16 %v821_v44, %v820_v49 }
 0x102   : > { %v5071_v52 = vpop.f32.mrf.mxu0 }
 0x103   : > { %v822_v39 = vmax.f32 %v729_v27, 0.0 }
 0x104   : > { %v731_v53 = vpop.f32.mrf.mxu0 }
 0x105   : > { %v732_v19 = vadd.f32 %v5892_v23, %v731_v53  ;;  %v818_v53 = vmax.f32 %v713_v47, 0.0 }
 0x106   : > { %v5072_v54 = vpop.f32.mrf.mxu0 }
 0x107   : > { %v823_v34 = vmax.f32 %v732_v19, 0.0  ;;  %v5968_v54 = vpack.c.bf16 %v819_v51, %v818_v53  ;;  %v5542_v51 = vld [vmem:[%s7047_s1 + $0x14] ss:$8 sps:$4 sm:$0xff]   ;;  %v5545_v53 = vld [vmem:[%s7047_s1 + $0x24] ss:$8 sps:$4 sm:$0xff]  }
 0x108   : > { %v736_v55 = vpop.f32.mrf.mxu0 }
 0x109   : > { %v737_v15 = vadd.f32 %v5892_v23, %v736_v55  ;;  %v5952_v46 = vpack.c.bf16 %v823_v34, %v822_v39 }
 0x10a   : > { %v5075_v56 = vpop.f32.mrf.mxu0 }
 0x10b   : > { %v824_v28 = vmax.f32 %v737_v15, 0.0 }
 0x10c   : > { %v739_v57 = vpop.f32.mrf.mxu0 }
 0x10d   : > { %v740_v11 = vadd.f32 %v5892_v23, %v739_v57 }
 0x10e   : > { %v5076_v58 = vpop.f32.mrf.mxu0 }
 0x10f   : > { %v825_v20 = vmax.f32 %v740_v11, 0.0 }
 0x110   : > { %v744_v59 = vpop.f32.mrf.mxu0 }
 0x111   : > { %v745_v7 = vadd.f32 %v5892_v23, %v744_v59  ;;  %v5938_v35 = vpack.c.bf16 %v825_v20, %v824_v28 }
 0x112   : > { %v5079_v60 = vpop.f32.mrf.mxu0 }
 0x113   : > { %v826_v16 = vmax.f32 %v745_v7, 0.0 }
 0x114   : > { %v747_v61 = vpop.f32.mrf.mxu0 }
 0x115   : > { %v748_v4 = vadd.f32 %v5892_v23, %v747_v61 }
 0x116   : > { %v5080_v62 = vpop.f32.mrf.mxu0 }
 0x117   : > { %v827_v12 = vmax.f32 %v748_v4, 0.0 }
 0x118   : > { %v752_v63 = vpop.f32.mrf.mxu0 }
 0x119   : > { %v753_v2 = vadd.f32 %v5892_v23, %v752_v63  ;;  %v5924_v21 = vpack.c.bf16 %v827_v12, %v826_v16 }
 0x11a   : > { %v5083_v0 = vpop.f32.mrf.mxu0 }
 0x11b   : > { %v828_v8 = vmax.f32 %v753_v2, 0.0 }
 0x11c   : > { %v755_v3 = vpop.f32.mrf.mxu0 }
 0x11d   : > { %v756_v5 = vadd.f32 %v5892_v23, %v755_v3 }
 0x11e   : > { %v5084_v6 = vpop.f32.mrf.mxu0 }
 0x11f   : > { %v829_v9 = vmax.f32 %v756_v5, 0.0 }
 0x120   : > { %v760_v10 = vpop.f32.mrf.mxu0 }
 0x121   : > { %v5915_v13 = vpack.c.bf16 %v829_v9, %v828_v8  ;;  %v761_v17 = vadd.f32 %v5892_v23, %v760_v10  ;;  %v5985_v10 = vsel %vm911_vm4, 65535, %v5712_v22 }
 0x122   : > { %v5087_v14 = vpop.f32.mrf.mxu0 }
 0x123   : > { %918 = vmatpush1.bf16.msra.mxu1 %v5915_v13  ;;  %1041 = vmatpush1.bf16.msra.mxu0 %v5915_v13  ;;  %v830_v29 = vmax.f32 %v761_v17, 0.0 }
 0x124   : > { %v763_v18 = vpop.f32.mrf.mxu0  ;;  %919 = vmatprep.subr.bf16.mxu1 %v5712_v22  ;;  %1042 = vmatprep.subr.bf16.mxu0 %v5712_v22 }
 0x125   : > { %v764_v24 = vadd.f32 %v5892_v23, %v763_v18 }
 0x126   : > { %v5088_v25 = vpop.f32.mrf.mxu0 }
 0x127   : > { %v831_v30 = vmax.f32 %v764_v24, 0.0  ;;  %920 = vmatpush1.bf16.msra.mxu1 %v5924_v21  ;;  %1043 = vmatpush1.bf16.msra.mxu0 %v5924_v21 }
 0x128   : > { %v5933_v31 = vpop.f32.mrf.mxu0  ;;  %921 = vmatprep.subr.bf16.mxu1 %v5712_v22  ;;  %1044 = vmatprep.subr.bf16.mxu0 %v5712_v22 }
 0x129   : > { %v5940_v36 = vpack.c.bf16 %v831_v30, %v830_v29  ;;  %v769_v44 = vadd.f32 %v5892_v23, %v5933_v31  ;;  %v5539_v31 = vld [vmem:[%s7047_s1] ss:$8 sps:$4 sm:$0xff]  }
 0x12a   : > { %v5091_v37 = vpop.f32.mrf.mxu0 }
 0x12b   : > { %922 = vmatpush1.bf16.msra.mxu1 %v5938_v35  ;;  %1045 = vmatpush1.bf16.msra.mxu0 %v5938_v35 }
 0x12c   : > { %v5946_v40 = vpop.f32.mrf.mxu0  ;;  %923 = vmatprep.subr.bf16.mxu1 %v5712_v22  ;;  %1046 = vmatprep.subr.bf16.mxu0 %v5712_v22 }
 0x12d   : > { %v772_v38 = vadd.f32 %v5892_v23, %v5946_v40  ;;  %v5550_v40 = vld [vmem:[%s7047_s1 + $0x38] ss:$8 sps:$4 sm:$0xff]  }
 0x12e   : > { %v5092_v48 = vpop.f32.mrf.mxu0 }
 0x12f   : > { %924 = vmatpush1.bf16.msra.mxu1 %v5952_v46  ;;  %1047 = vmatpush1.bf16.msra.mxu0 %v5952_v46  ;;  %v833_v47 = vmax.f32 %v772_v38, 0.0 }
 0x130   : > { %v5958_v50 = vpop.f32.mrf.mxu0  ;;  %925 = vmatprep.subr.bf16.mxu1 %v5712_v22  ;;  %1048 = vmatprep.subr.bf16.mxu0 %v5712_v22 }
 0x131   : > { %v777_v34 = vadd.f32 %v5892_v23, %v5958_v50  ;;  %v832_v50 = vmax.f32 %v769_v44, 0.0 }
 0x132   : > { %v5095_v52 = vpop.f32.mrf.mxu0 }
 0x133   : > { %926 = vmatpush1.bf16.msra.mxu1 %v5962_v45  ;;  %1049 = vmatpush1.bf16.msra.mxu0 %v5962_v45  ;;  %v834_v48 = vmax.f32 %v777_v34, 0.0  ;;  %v5544_v52 = vld [vmem:[%s7047_s1 + $0x10] ss:$8 sps:$4 sm:$0xff]  }
 0x134   : > { %v779_v41 = vpop.f32.mrf.mxu0  ;;  %927 = vmatprep.subr.bf16.mxu1 %v5712_v22  ;;  %1050 = vmatprep.subr.bf16.mxu0 %v5712_v22 }
 0x135   : > { %v780_v29 = vadd.f32 %v5892_v23, %v779_v41  ;;  %v864_v41 = vld [vmem:[%s7047_s1 + $0x30] sm:$0x11] }
 0x136   : > { %v5096_v55 = vpop.f32.mrf.mxu0 }
 0x137   : > { %928 = vmatpush1.bf16.msra.mxu1 %v5968_v54  ;;  %1051 = vmatpush1.bf16.msra.mxu0 %v5968_v54  ;;  %v835_v39 = vmax.f32 %v780_v29, 0.0  ;;  %v5547_v55 = vld [vmem:[%s7047_s1 + $0x20] ss:$8 sps:$4 sm:$0xff]  }
 0x138   : > { %v784_v56 = vpop.f32.mrf.mxu0  ;;  %929 = vmatprep.subr.bf16.mxu1 %v5712_v22  ;;  %1052 = vmatprep.subr.bf16.mxu0 %v5712_v22 }
 0x139   : > { %v785_v27 = vadd.f32 %v5892_v23, %v784_v56  ;;  %v6024_v49 = vpack.c.bf16 %v835_v39, %v834_v48  ;;  %v4565_v56 = vcombine.high %v864_v41, %v864_v41 }
 0x13a   : > { %v5099_v57 = vpop.f32.mrf.mxu0 }
 0x13b   : > { %930 = vmatpush1.bf16.msra.mxu1 %v5902_v42  ;;  %1053 = vmatpush1.bf16.msra.mxu0 %v5902_v42  ;;  %v836_v37 = vmax.f32 %v785_v27, 0.0  ;;  %v4564_v57 = vcombine.low %v864_v41, %v864_v41 }
 0x13c   : > { %v787_v58 = vpop.f32.mrf.mxu0  ;;  %931 = vmatprep.subr.bf16.mxu1 %v5712_v22  ;;  %1054 = vmatprep.subr.bf16.mxu0 %v5712_v22 }
 0x13d   : > { %v788_v24 = vadd.f32 %v5892_v23, %v787_v58  ;;  %v5555_v58 = vld [vmem:[%s7047_s1 + $0x4c] ss:$8 sps:$4 sm:$0xff]  }
 0x13e   : > { %v5100_v59 = vpop.f32.mrf.mxu0 }
 0x13f   : > { %932 = vmatpush1.bf16.msra.mxu1 %v5896_v33  ;;  %1055 = vmatpush1.bf16.msra.mxu0 %v5896_v33  ;;  %v837_v30 = vmax.f32 %v788_v24, 0.0  ;;  %v5553_v59 = vld [vmem:[%s7047_s1 + $0x48] ss:$8 sps:$4 sm:$0xff]  }
 0x140   : > { %v792_v60 = vpop.f32.mrf.mxu0  ;;  %935 = vmatprep.subr.bf16.mxu1 %v5712_v22  ;;  %1058 = vmatprep.subr.bf16.mxu0 %v5712_v22 }
 0x141   : > { %v793_v19 = vadd.f32 %v5892_v23, %v792_v60  ;;  %v6016_v43 = vpack.c.bf16 %v837_v30, %v836_v37  ;;  %v5556_v60 = vld [vmem:[%s7047_s1 + $0x5c] ss:$8 sps:$4 sm:$0xff]  }
 0x142   : > { %v5103_v61 = vpop.f32.mrf.mxu0 }
 0x143   : > { %v838_v28 = vmax.f32 %v793_v19, 0.0  ;;  %v4576_v61 = vld [vmem:[%s7047_s1 + $0x68] sm:$0x11] }
 0x144   : > { %v795_v62 = vpop.f32.mrf.mxu0 }
 0x145   : > { %v796_v16 = vadd.f32 %v5892_v23, %v795_v62  ;;  %v5558_v62 = vld [vmem:[%s7047_s1 + $0x58] ss:$8 sps:$4 sm:$0xff]  }
 0x146   : > { %v5104_v63 = vpop.f32.mrf.mxu0 }
 0x147   : > { %v839_v25 = vmax.f32 %v796_v16, 0.0  ;;  %v4584_v63 = vcombine.high %v4576_v61, %v4576_v61 }
 0x148   : > { %v800_v0 = vpop.f32.mrf.mxu0 }
 0x149   : > { %v801_v12 = vadd.f32 %v5892_v23, %v800_v0  ;;  %v6006_v32 = vpack.c.bf16 %v839_v25, %v838_v28  ;;  %v4583_v0 = vcombine.low %v4576_v61, %v4576_v61 }
 0x14a   : > { %v5107_v2 = vpop.f32.mrf.mxu0 }
 0x14b   : > { %v840_v20 = vmax.f32 %v801_v12, 0.0  ;;  %v5561_v2 = vld [vmem:[%s7052_s6] sm:$0xff]  }
 0x14c   : > { %v803_v3 = vpop.f32.mrf.mxu0 }
 0x14d   : > { %v804_v8 = vadd.f32 %v5892_v23, %v803_v3  ;;  %v5562_v3 = vld [vmem:[%s7052_s6 + $0x8] sm:$0xff]  }
 0x14e   : > { %v5108_v4 = vpop.f32.mrf.mxu0 }
 0x14f   : > { %v841_v17 = vmax.f32 %v804_v8, 0.0 }
 0x150   : > { %v808_v5 = vpop.f32.mrf.mxu0 }
 0x151   : > { %v809_v6 = vadd.f32 %v5892_v23, %v808_v5  ;;  %v5998_v26 = vpack.c.bf16 %v841_v17, %v840_v20  ;;  %v6030_v23 = vpack.c.bf16 %v833_v47, %v832_v50 }
 0x152   : > { %v5111_v7 = vpop.f32.mrf.mxu0 }
 0x153   : > { %v842_v9 = vmax.f32 %v809_v6, 0.0 }
 0x154   : > { %v811_v11 = vpop.f32.mrf.mxu0 }
 0x155   : > { %v857_v14 = vpack.c.bf16 %v842_v9, %v842_v9 }
 0x156   : > { %v5112_v15 = vpop.f32.mrf.mxu0 }
 0x157   : > { %v5990_v18 = vand.u32 %v5985_v10, %v857_v14 }
 0x159   : > { %936 = vmatpush2.bf16.msra.mxu1 %v5990_v18  ;;  %1059 = vmatpush2.bf16.msra.mxu0 %v5990_v18 }
 0x15a   : > { %937 = vmatprep.subr.bf16.mxu1 %v5712_v22  ;;  %1060 = vmatprep.subr.bf16.mxu0 %v5712_v22 }
 0x15d   : > { %938 = vmatpush2.bf16.msra.mxu1 %v5998_v26  ;;  %1061 = vmatpush2.bf16.msra.mxu0 %v5998_v26 }
 0x15e   : > { %939 = vmatprep.subr.bf16.mxu1 %v5712_v22  ;;  %1062 = vmatprep.subr.bf16.mxu0 %v5712_v22 }
 0x161   : > { %940 = vmatpush2.bf16.msra.mxu1 %v6006_v32  ;;  %1063 = vmatpush2.bf16.msra.mxu0 %v6006_v32 }
 0x162   : > { %941 = vmatprep.subr.bf16.mxu1 %v5712_v22  ;;  %1064 = vmatprep.subr.bf16.mxu0 %v5712_v22 }
 0x165   : > { %942 = vmatpush2.bf16.msra.mxu1 %v6016_v43  ;;  %1065 = vmatpush2.bf16.msra.mxu0 %v6016_v43 }
 0x166   : > { %943 = vmatprep.subr.bf16.mxu1 %v5712_v22  ;;  %1066 = vmatprep.subr.bf16.mxu0 %v5712_v22 }
 0x169   : > { %944 = vmatpush2.bf16.msra.mxu1 %v6024_v49  ;;  %1067 = vmatpush2.bf16.msra.mxu0 %v6024_v49 }
 0x16a   : > { %945 = vmatprep.subr.bf16.mxu1 %v5712_v22  ;;  %1068 = vmatprep.subr.bf16.mxu0 %v5712_v22 }
 0x16d   : > { %946 = vmatpush2.bf16.msra.mxu1 %v6030_v23  ;;  %1069 = vmatpush2.bf16.msra.mxu0 %v6030_v23 }
 0x16e   : > { %947 = vmatprep.subr.bf16.mxu1 %v5712_v22  ;;  %1070 = vmatprep.subr.bf16.mxu0 %v5712_v22 }
 0x171   : > { %948 = vmatpush2.bf16.msra.mxu1 %v5940_v36  ;;  %1071 = vmatpush2.bf16.msra.mxu0 %v5940_v36 }
 0x172   : > { %5475 = vmatprep.subr.bf16.mxu1 %v5712_v22  ;;  %5113 = vmatprep.subr.bf16.mxu0 %v5562_v3 }
 0x174   : > { %950 = vmatmul.mubr.bf16.vlgmr.msra.gmra.mxu1 %v5539_v31  ;;  %1073 = vmatmul.mubr.bf16.vlgmr.msra.gmra.mxu0 %v5550_v40 }
 0x175   : > { %5490 = vmatpush1.bf16.msra.mxu1 %v5915_v13  ;;  %4567 = vmatprep.mubr.msk.bf16.mxu1 %vm898_vm3, %v5542_v51 }
 0x176   : > { %5476 = vmatprep.subr.bf16.mxu1 %v5712_v22  ;;  %5114 = vmatpush3.bf16.msra.mxu0 %v5562_v3  ;;  %v4605_v3 = vld [vmem:[%s7047_s1 + $0xa0] sm:$0x11] }
 0x177   : > { %1328 = vmatprep.subr.bf16.mxu0 %v5712_v22 }
 0x179   : > { %5491 = vmatpush1.bf16.msra.mxu1 %v5924_v21 }
 0x17a   : > { %5477 = vmatprep.subr.bf16.mxu1 %v5712_v22 }
 0x17c   : > { %958 = vmatmul.mubr.bf16.gmra.mxu1 %v5544_v52 }
 0x17d   : > { %5492 = vmatpush1.bf16.msra.mxu1 %v5938_v35  ;;  %4568 = vmatprep.mubr.msk.bf16.mxu1 %vm898_vm3, %v5545_v53 }
 0x17e   : > { %5478 = vmatprep.subr.bf16.mxu1 %v5712_v22 }
 0x181   : > { %5493 = vmatpush1.bf16.msra.mxu1 %v5952_v46 }
 0x182   : > { %5479 = vmatprep.subr.bf16.mxu1 %v5712_v22 }
 0x184   : > { %966 = vmatmul.mubr.bf16.gmra.mxu1 %v5547_v55 }
 0x185   : > { %5494 = vmatpush1.bf16.msra.mxu1 %v5962_v45  ;;  %4569 = vmatprep.mubr.msk.bf16.mxu1 %vm898_vm3, %v4565_v56 }
 0x186   : > { %5480 = vmatprep.subr.bf16.mxu1 %v5712_v22 }
 0x189   : > { %5495 = vmatpush1.bf16.msra.mxu1 %v5968_v54 }
 0x18a   : > { %5481 = vmatprep.subr.bf16.mxu1 %v5712_v22 }
 0x18c   : > { %974 = vmatmul.mubr.bf16.gmra.mxu1 %v4564_v57  ;;  %v5565_v57 = vld [vmem:[%s7047_s1 + $0x74] ss:$8 sps:$4 sm:$0xff]  }
 0x18d   : > { %5496 = vmatpush1.bf16.msra.mxu1 %v5902_v42  ;;  %4586 = vmatprep.mubr.msk.bf16.mxu1 %vm898_vm3, %v5555_v58 }
 0x18e   : > { %5482 = vmatprep.subr.bf16.mxu1 %v5712_v22 }
 0x191   : > { %5497 = vmatpush1.bf16.msra.mxu1 %v5896_v33 }
 0x192   : > { %5483 = vmatprep.subr.bf16.mxu1 %v5712_v22 }
 0x195   : > { %5498 = vmatpush2.bf16.msra.mxu1 %v5990_v18 }
 0x196   : > { %5484 = vmatprep.subr.bf16.mxu1 %v5712_v22 }
 0x199   : > { %5499 = vmatpush2.bf16.msra.mxu1 %v5998_v26 }
 0x19a   : > { %5485 = vmatprep.subr.bf16.mxu1 %v5712_v22 }
 0x19d   : > { %5500 = vmatpush2.bf16.msra.mxu1 %v6006_v32 }
 0x19e   : > { %5486 = vmatprep.subr.bf16.mxu1 %v5712_v22 }
 0x1a1   : > { %5501 = vmatpush2.bf16.msra.mxu1 %v6016_v43 }
 0x1a2   : > { %5487 = vmatprep.subr.bf16.mxu1 %v5712_v22 }
 0x1a5   : > { %5502 = vmatpush2.bf16.msra.mxu1 %v6024_v49 }
 0x1a6   : > { %5488 = vmatprep.subr.bf16.mxu1 %v5712_v22 }
 0x1a9   : > { %5503 = vmatpush2.bf16.msra.mxu1 %v6030_v23 }
 0x1aa   : > { %5489 = vmatprep.subr.bf16.mxu1 %v5712_v22 }
 0x1ad   : > { %5504 = vmatpush2.bf16.msra.mxu1 %v5940_v36 }
 0x1ae   : > { %5123 = vmatprep.subr.bf16.mxu1 %v5561_v2 }
 0x1b0   : > { %1081 = vmatmul.mubr.bf16.vlgmr.msra.gmra.mxu1 %v5553_v59 }
 0x1b1   : > { %4587 = vmatprep.mubr.msk.bf16.mxu1 %vm898_vm3, %v5556_v60  ;;  %5124 = vmatpush3.bf16.msra.mxu1 %v5561_v2  ;;  %v5569_v2 = vld [vmem:[%s7047_s1 + $0x94] ss:$8 sps:$4 sm:$0xff]  }
 0x1b8   : > { %1089 = vmatmul.mubr.bf16.gmra.mxu1 %v5558_v62  ;;  %v5563_v62 = vld [vmem:[%s7047_s1 + $0x70] ss:$8 sps:$4 sm:$0xff]  }
 0x1b9   : > { %4588 = vmatprep.mubr.msk.bf16.mxu1 %vm898_vm3, %v4584_v63  ;;  %v5566_v63 = vld [vmem:[%s7047_s1 + $0x84] ss:$8 sps:$4 sm:$0xff]  }
 0x1c0   : > { %1097 = vmatmul.mubr.bf16.gmra.mxu1 %v4583_v0  ;;  %v5568_v0 = vld [vmem:[%s7047_s1 + $0x80] ss:$8 sps:$4 sm:$0xff]  }
 0x234   : > { %v951_v4 = vpop.f32.mrf.mxu1  ;;  %v1074_v5 = vpop.f32.mrf.mxu0 }
 0x236   : > { %v953_v6 = vpop.f32.mrf.mxu1  ;;  %v1076_v7 = vpop.f32.mrf.mxu0 }
 0x237   : > { %v4612_v6 = vcombine.low %v4605_v3, %v4605_v3  ;;  %v5574_v7 = vld [vmem:[%s7052_s6 + $0x10] sm:$0xff]  }
 0x238   : > { %v954_v8 = vpop.f32.mrf.mxu1  ;;  %v1077_v9 = vpop.f32.mrf.mxu0  ;;  %5133 = vmatprep.subr.bf16.mxu1 %v5574_v7 }
 0x239   : > { %v981_v11 = vpack.c.bf16 %v954_v8, %v951_v4  ;;  %v1104_v12 = vpack.c.bf16 %v1077_v9, %v1074_v5  ;;  %v5571_v4 = vld [vmem:[%s7047_s1 + $0x90] ss:$8 sps:$4 sm:$0xff]   ;;  %v4613_v5 = vcombine.high %v4605_v3, %v4605_v3 }
 0x23a   : > { %v956_v14 = vpop.f32.mrf.mxu1  ;;  %v1079_v15 = vpop.f32.mrf.mxu0  ;;  %v5575_v3 = vld [vmem:[%s7047_s1 + $0xa8] ss:$8 sps:$4 sm:$0xff]  }
 0x23b   : > { %5125 = vmatprep.mubr.msk.bf16.mxu1 %vm1116_vm5, %v981_v11  ;;  %5115 = vmatprep.mubr.msk.bf16.mxu0 %vm1116_vm5, %v1104_v12 }
 0x23c   : > { %v959_v16 = vpop.f32.mrf.mxu1 }
 0x23e   : > { %v961_v17 = vpop.f32.mrf.mxu1 }
 0x240   : > { %v962_v19 = vpop.f32.mrf.mxu1 }
 0x241   : > { %v982_v20 = vpack.c.bf16 %v962_v19, %v959_v16 }
 0x242   : > { %v964_v24 = vpop.f32.mrf.mxu1 }
 0x243   : > { %5126 = vmatmul.mubr.msk.bf16.vlgmr.msra.gmra.mxu1 %vm1116_vm5, %v982_v20 }
 0x244   : > { %v967_v25 = vpop.f32.mrf.mxu1  ;;  %5134 = vmatpush3.bf16.msra.mxu1 %v5574_v7  ;;  %v4629_v7 = vld [vmem:[%s7047_s1 + $0xd8] sm:$0x11] }
 0x245   : > { %1540 = vmatprep.subr.bf16.mxu1 %v5712_v22 }
 0x246   : > { %v969_v27 = vpop.f32.mrf.mxu1 }
 0x248   : > { %v970_v28 = vpop.f32.mrf.mxu1 }
 0x249   : > { %v983_v29 = vpack.c.bf16 %v970_v28, %v967_v25 }
 0x24a   : > { %v972_v30 = vpop.f32.mrf.mxu1 }
 0x24b   : > { %5129 = vmatprep.mubr.msk.bf16.mxu1 %vm1116_vm5, %v983_v29 }
 0x24c   : > { %v975_v34 = vpop.f32.mrf.mxu1 }
 0x24d   : > { %v984_v37 = vpack.c.bf16 %v975_v34, %v975_v34 }
 0x24e   : > { %v977_v38 = vpop.f32.mrf.mxu1 }
 0x24f   : > { %5130 = vmatmul.mubr.msk.bf16.gmra.mxu1 %vm1116_vm5, %v984_v37 }
 0x250   : > { %v978_v39 = vpop.f32.mrf.mxu1 }
 0x252   : > { %v979_v44 = vpop.f32.mrf.mxu1 }
 0x270   : > { %v1082_v48 = vpop.f32.mrf.mxu1 }
 0x272   : > { %v1084_v47 = vpop.f32.mrf.mxu1 }
 0x274   : > { %v1085_v50 = vpop.f32.mrf.mxu1 }
 0x275   : > { %v1105_v31 = vpack.c.bf16 %v1085_v50, %v1082_v48 }
 0x276   : > { %v1087_v40 = vpop.f32.mrf.mxu1 }
 0x277   : > { %5116 = vmatmul.mubr.msk.bf16.vlgmr.msra.gmra.mxu0 %vm1116_vm5, %v1105_v31 }
 0x278   : > { %1329 = vmatpush1.bf16.msra.mxu0 %v5915_v13  ;;  %v1090_v51 = vpop.f32.mrf.mxu1 }
 0x279   : > { %1330 = vmatprep.subr.bf16.mxu0 %v5712_v22 }
 0x27a   : > { %v1092_v52 = vpop.f32.mrf.mxu1 }
 0x27c   : > { %1331 = vmatpush1.bf16.msra.mxu0 %v5924_v21  ;;  %v1093_v53 = vpop.f32.mrf.mxu1 }
 0x27d   : > { %v1106_v41 = vpack.c.bf16 %v1093_v53, %v1090_v51  ;;  %1332 = vmatprep.subr.bf16.mxu0 %v5712_v22 }
 0x27e   : > { %v1095_v55 = vpop.f32.mrf.mxu1 }
 0x27f   : > { %5119 = vmatprep.mubr.msk.bf16.mxu0 %vm1116_vm5, %v1106_v41 }
 0x280   : > { %1333 = vmatpush1.bf16.msra.mxu0 %v5938_v35  ;;  %v1098_v56 = vpop.f32.mrf.mxu1 }
 0x281   : > { %v1107_v58 = vpack.c.bf16 %v1098_v56, %v1098_v56  ;;  %1334 = vmatprep.subr.bf16.mxu0 %v5712_v22 }
 0x282   : > { %v1100_v59 = vpop.f32.mrf.mxu1 }
 0x283   : > { %5120 = vmatmul.mubr.msk.bf16.gmra.mxu0 %vm1116_vm5, %v1107_v58 }
 0x284   : > { %1335 = vmatpush1.bf16.msra.mxu0 %v5952_v46  ;;  %v1101_v60 = vpop.f32.mrf.mxu1  ;;  %4614 = vmatprep.mubr.msk.bf16.mxu0 %vm898_vm3, %v5565_v57 }
 0x285   : > { %1336 = vmatprep.subr.bf16.mxu0 %v5712_v22 }
 0x286   : > { %v1102_v61 = vpop.f32.mrf.mxu1 }
 0x287   : > { %v5577_v61 = vld [vmem:[%s7047_s1 + $0xac] ss:$8 sps:$4 sm:$0xff]  }
 0x288   : > { %1337 = vmatpush1.bf16.msra.mxu0 %v5962_v45 }
 0x289   : > { %1338 = vmatprep.subr.bf16.mxu0 %v5712_v22 }
 0x28c   : > { %1339 = vmatpush1.bf16.msra.mxu0 %v5968_v54 }
 0x28d   : > { %1340 = vmatprep.subr.bf16.mxu0 %v5712_v22 }
 0x290   : > { %1341 = vmatpush1.bf16.msra.mxu0 %v5902_v42 }
 0x291   : > { %1342 = vmatprep.subr.bf16.mxu0 %v5712_v22 }
 0x294   : > { %1343 = vmatpush1.bf16.msra.mxu0 %v5896_v33 }
 0x295   : > { %1346 = vmatprep.subr.bf16.mxu0 %v5712_v22 }
 0x298   : > { %1347 = vmatpush2.bf16.msra.mxu0 %v5990_v18 }
 0x299   : > { %1348 = vmatprep.subr.bf16.mxu0 %v5712_v22 }
 0x29c   : > { %1349 = vmatpush2.bf16.msra.mxu0 %v5998_v26 }
 0x29d   : > { %1350 = vmatprep.subr.bf16.mxu0 %v5712_v22 }
 0x2a0   : > { %1351 = vmatpush2.bf16.msra.mxu0 %v6006_v32 }
 0x2a1   : > { %1352 = vmatprep.subr.bf16.mxu0 %v5712_v22 }
 0x2a4   : > { %1353 = vmatpush2.bf16.msra.mxu0 %v6016_v43 }
 0x2a5   : > { %1354 = vmatprep.subr.bf16.mxu0 %v5712_v22 }
 0x2a8   : > { %1355 = vmatpush2.bf16.msra.mxu0 %v6024_v49 }
 0x2a9   : > { %1356 = vmatprep.subr.bf16.mxu0 %v5712_v22 }
 0x2ac   : > { %1357 = vmatpush2.bf16.msra.mxu0 %v6030_v23 }
 0x2ad   : > { %1358 = vmatprep.subr.bf16.mxu0 %v5712_v22 }
 0x2b0   : > { %1359 = vmatpush2.bf16.msra.mxu0 %v5940_v36 }
 0x2b3   : > { %1361 = vmatmul.mubr.bf16.vlgmr.msra.gmra.mxu0 %v5563_v62 }
 0x2b4   : > { %4615 = vmatprep.mubr.msk.bf16.mxu0 %vm898_vm3, %v5566_v63 }
 0x2bb   : > { %1369 = vmatmul.mubr.bf16.gmra.mxu0 %v5568_v0 }
 0x2bc   : > { %4616 = vmatprep.mubr.msk.bf16.mxu0 %vm898_vm3, %v5569_v2 }
 0x2c3   : > { %1377 = vmatmul.mubr.bf16.gmra.mxu0 %v5571_v4  ;;  %v5578_v4 = vld [vmem:[%s7047_s1 + $0xbc] ss:$8 sps:$4 sm:$0xff]  }
 0x2c4   : > { %4617 = vmatprep.mubr.msk.bf16.mxu0 %vm898_vm3, %v4613_v5  ;;  %v5580_v5 = vld [vmem:[%s7047_s1 + $0xb8] ss:$8 sps:$4 sm:$0xff]  }
 0x2cb   : > { %1385 = vmatmul.mubr.bf16.gmra.mxu0 %v4612_v6  ;;  %v5581_v6 = vld [vmem:[%s7047_s1 + $0xcc] ss:$8 sps:$4 sm:$0xff]  }
 0x303   : > { %v5127_v8 = vpop.f32.mrf.mxu1 }
 0x305   : > { %v1245_v9 = vpop.f32.mrf.mxu1 }
 0x307   : > { %v5128_v11 = vpop.f32.mrf.mxu1 }
 0x309   : > { %v6183_v12 = vpop.f32.mrf.mxu1 }
 0x30f   : > { %v5131_v14 = vpop.f32.mrf.mxu1 }
 0x311   : > { %v1261_v15 = vpop.f32.mrf.mxu1 }
 0x313   : > { %v5132_v16 = vpop.f32.mrf.mxu1 }
 0x314   : > { %v5589_v16 = vld [vmem:[%s7047_s1 + $0xf4] ss:$8 sps:$4 sm:$0xff]  }
 0x337   : > { %v5117_v17 = vpop.f32.mrf.mxu0 }
 0x338   : > { %v6185_v19 = vadd.f32 %v5127_v8, %v5117_v17  ;;  %v5583_v8 = vld [vmem:[%s7047_s1 + $0xc8] ss:$8 sps:$4 sm:$0xff]  }
 0x339   : > { %v1163_v20 = vpop.f32.mrf.mxu0  ;;  %v5591_v17 = vld [vmem:[%s7047_s1 + $0xf0] ss:$8 sps:$4 sm:$0xff]  }
 0x33a   : > { %v6187_v24 = vadd.f32 %v1245_v9, %v1163_v20  ;;  %v4637_v9 = vcombine.high %v4629_v7, %v4629_v7  ;;  %v5592_v20 = vld [vmem:[%s7047_s1 + $0x104] ss:$8 sps:$4 sm:$0xff]  }
 0x33b   : > { %v5118_v25 = vpop.f32.mrf.mxu0 }
 0x33c   : > { %v6189_v27 = vadd.f32 %v5128_v11, %v5118_v25  ;;  %v4636_v11 = vcombine.low %v4629_v7, %v4629_v7  ;;  %v4653_v25 = vld [vmem:[%s7047_s1 + $0x110] sm:$0x11] }
 0x33d   : > { %v6191_v28 = vpop.f32.mrf.mxu0 }
 0x343   : > { %v5121_v29 = vpop.f32.mrf.mxu0 }
 0x344   : > { %v6193_v30 = vadd.f32 %v5131_v14, %v5121_v29  ;;  %v5588_v14 = vld [vmem:[%s7047_s1 + $0xe4] ss:$8 sps:$4 sm:$0xff]   ;;  %v5594_v29 = vld [vmem:[%s7047_s1 + $0x100] ss:$8 sps:$4 sm:$0xff]  }
 0x345   : > { %v1179_v34 = vpop.f32.mrf.mxu0 }
 0x346   : > { %v6195_v37 = vadd.f32 %v1261_v15, %v1179_v34  ;;  %v5586_v15 = vld [vmem:[%s7047_s1 + $0xe0] ss:$8 sps:$4 sm:$0xff]   ;;  %v4661_v34 = vcombine.high %v4653_v25, %v4653_v25 }
 0x347   : > { %v5122_v38 = vpop.f32.mrf.mxu0 }
 0x348   : > { %v5597_v38 = vld [vmem:[%s7052_s6 + $0x18] sm:$0xff]  }
 0x349   : > { %v6197_v39 = vpop.f32.mrf.mxu0  ;;  %5143 = vmatprep.subr.bf16.mxu0 %v5597_v38 }
 0x34a   : > { %5144 = vmatpush3.bf16.msra.mxu0 %v5597_v38 }
 0x373   : > { %v1362_v44 = vpop.f32.mrf.mxu0 }
 0x375   : > { %v1364_v48 = vpop.f32.mrf.mxu0 }
 0x376   : > { %v5598_v48 = vld [vmem:[%s7052_s6 + $0x20] sm:$0xff]  }
 0x377   : > { %v1365_v47 = vpop.f32.mrf.mxu0  ;;  %5153 = vmatprep.subr.bf16.mxu0 %v5598_v48 }
 0x378   : > { %v1392_v50 = vpack.c.bf16 %v1365_v47, %v1362_v44  ;;  %v4660_v44 = vcombine.low %v4653_v25, %v4653_v25  ;;  %v6318_v47 = vpop.f32.mrf.mxu1 }
 0x379   : > { %v1367_v31 = vpop.f32.mrf.mxu0 }
 0x37a   : > { %5135 = vmatprep.mubr.msk.bf16.mxu1 %vm1116_vm5, %v1392_v50 }
 0x37b   : > { %v1370_v40 = vpop.f32.mrf.mxu0 }
 0x37d   : > { %v1372_v51 = vpop.f32.mrf.mxu0 }
 0x37f   : > { %v1373_v52 = vpop.f32.mrf.mxu0 }
 0x380   : > { %v1393_v53 = vpack.c.bf16 %v1373_v52, %v1370_v40 }
 0x381   : > { %v1375_v41 = vpop.f32.mrf.mxu0 }
 0x382   : > { %5136 = vmatmul.mubr.msk.bf16.vlgmr.msra.gmra.mxu1 %vm1116_vm5, %v1393_v53 }
 0x383   : > { %1541 = vmatpush1.bf16.msra.mxu1 %v5915_v13  ;;  %v1378_v55 = vpop.f32.mrf.mxu0 }
 0x384   : > { %1542 = vmatprep.subr.bf16.mxu1 %v5712_v22 }
 0x385   : > { %v1380_v56 = vpop.f32.mrf.mxu0 }
 0x387   : > { %1543 = vmatpush1.bf16.msra.mxu1 %v5924_v21  ;;  %v1381_v57 = vpop.f32.mrf.mxu0 }
 0x388   : > { %v1394_v58 = vpack.c.bf16 %v1381_v57, %v1378_v55  ;;  %1544 = vmatprep.subr.bf16.mxu1 %v5712_v22 }
 0x389   : > { %v1383_v59 = vpop.f32.mrf.mxu0 }
 0x38a   : > { %5139 = vmatprep.mubr.msk.bf16.mxu1 %vm1116_vm5, %v1394_v58 }
 0x38b   : > { %1545 = vmatpush1.bf16.msra.mxu1 %v5938_v35  ;;  %v1386_v60 = vpop.f32.mrf.mxu0 }
 0x38c   : > { %v1395_v62 = vpack.c.bf16 %v1386_v60, %v1386_v60  ;;  %1546 = vmatprep.subr.bf16.mxu1 %v5712_v22 }
 0x38d   : > { %v1388_v63 = vpop.f32.mrf.mxu0 }
 0x38e   : > { %5140 = vmatmul.mubr.msk.bf16.gmra.mxu1 %vm1116_vm5, %v1395_v62 }
 0x38f   : > { %1547 = vmatpush1.bf16.msra.mxu1 %v5952_v46  ;;  %v1389_v0 = vpop.f32.mrf.mxu0  ;;  %4638 = vmatprep.mubr.msk.bf16.mxu1 %vm898_vm3, %v5577_v61 }
 0x390   : > { %1548 = vmatprep.subr.bf16.mxu1 %v5712_v22 }
 0x391   : > { %v1390_v2 = vpop.f32.mrf.mxu0 }
 0x393   : > { %1549 = vmatpush1.bf16.msra.mxu1 %v5962_v45 }
 0x394   : > { %1550 = vmatprep.subr.bf16.mxu1 %v5712_v22 }
 0x397   : > { %1551 = vmatpush1.bf16.msra.mxu1 %v5968_v54 }
 0x398   : > { %1552 = vmatprep.subr.bf16.mxu1 %v5712_v22 }
 0x39b   : > { %1553 = vmatpush1.bf16.msra.mxu1 %v5902_v42 }
 0x39c   : > { %1554 = vmatprep.subr.bf16.mxu1 %v5712_v22 }
 0x39f   : > { %1555 = vmatpush1.bf16.msra.mxu1 %v5896_v33 }
 0x3a0   : > { %1558 = vmatprep.subr.bf16.mxu1 %v5712_v22 }
 0x3a3   : > { %1559 = vmatpush2.bf16.msra.mxu1 %v5990_v18 }
 0x3a4   : > { %1560 = vmatprep.subr.bf16.mxu1 %v5712_v22 }
 0x3a7   : > { %1561 = vmatpush2.bf16.msra.mxu1 %v5998_v26 }
 0x3a8   : > { %1562 = vmatprep.subr.bf16.mxu1 %v5712_v22 }
 0x3ab   : > { %1563 = vmatpush2.bf16.msra.mxu1 %v6006_v32 }
 0x3ac   : > { %1564 = vmatprep.subr.bf16.mxu1 %v5712_v22 }
 0x3af   : > { %1565 = vmatpush2.bf16.msra.mxu1 %v6016_v43 }
 0x3b0   : > { %1566 = vmatprep.subr.bf16.mxu1 %v5712_v22 }
 0x3b3   : > { %1567 = vmatpush2.bf16.msra.mxu1 %v6024_v49 }
 0x3b4   : > { %1568 = vmatprep.subr.bf16.mxu1 %v5712_v22 }
 0x3b7   : > { %1569 = vmatpush2.bf16.msra.mxu1 %v6030_v23 }
 0x3b8   : > { %1570 = vmatprep.subr.bf16.mxu1 %v5712_v22 }
 0x3bb   : > { %1571 = vmatpush2.bf16.msra.mxu1 %v5940_v36 }
 0x3bc   : > { %1752 = vmatprep.subr.bf16.mxu1 %v5712_v22 }
 0x3be   : > { %1573 = vmatmul.mubr.bf16.vlgmr.msra.gmra.mxu1 %v5575_v3 }
 0x3bf   : > { %1753 = vmatpush1.bf16.msra.mxu1 %v5915_v13  ;;  %4639 = vmatprep.mubr.msk.bf16.mxu1 %vm898_vm3, %v5578_v4 }
 0x3c0   : > { %1754 = vmatprep.subr.bf16.mxu1 %v5712_v22 }
 0x3c3   : > { %1755 = vmatpush1.bf16.msra.mxu1 %v5924_v21 }
 0x3c4   : > { %1756 = vmatprep.subr.bf16.mxu1 %v5712_v22 }
 0x3c6   : > { %1581 = vmatmul.mubr.bf16.gmra.mxu1 %v5580_v5 }
 0x3c7   : > { %1757 = vmatpush1.bf16.msra.mxu1 %v5938_v35  ;;  %4640 = vmatprep.mubr.msk.bf16.mxu1 %vm898_vm3, %v5581_v6 }
 0x3c8   : > { %1758 = vmatprep.subr.bf16.mxu1 %v5712_v22 }
 0x3cb   : > { %1759 = vmatpush1.bf16.msra.mxu1 %v5952_v46 }
 0x3cc   : > { %1760 = vmatprep.subr.bf16.mxu1 %v5712_v22 }
 0x3ce   : > { %1589 = vmatmul.mubr.bf16.gmra.mxu1 %v5583_v8 }
 0x3cf   : > { %1761 = vmatpush1.bf16.msra.mxu1 %v5962_v45  ;;  %4641 = vmatprep.mubr.msk.bf16.mxu1 %vm898_vm3, %v4637_v9 }
 0x3d0   : > { %1762 = vmatprep.subr.bf16.mxu1 %v5712_v22 }
 0x3d3   : > { %1763 = vmatpush1.bf16.msra.mxu1 %v5968_v54 }
 0x3d4   : > { %1764 = vmatprep.subr.bf16.mxu1 %v5712_v22 }
 0x3d6   : > { %1597 = vmatmul.mubr.bf16.gmra.mxu1 %v4636_v11 }
 0x3d7   : > { %1765 = vmatpush1.bf16.msra.mxu1 %v5902_v42  ;;  %4662 = vmatprep.mubr.msk.bf16.mxu1 %vm898_vm3, %v5588_v14 }
 0x3d8   : > { %1766 = vmatprep.subr.bf16.mxu1 %v5712_v22 }
 0x3db   : > { %1767 = vmatpush1.bf16.msra.mxu1 %v5896_v33 }
 0x3dc   : > { %1770 = vmatprep.subr.bf16.mxu1 %v5712_v22 }
 0x3df   : > { %1771 = vmatpush2.bf16.msra.mxu1 %v5990_v18 }
 0x3e0   : > { %1772 = vmatprep.subr.bf16.mxu1 %v5712_v22 }
 0x3e3   : > { %1773 = vmatpush2.bf16.msra.mxu1 %v5998_v26 }
 0x3e4   : > { %1774 = vmatprep.subr.bf16.mxu1 %v5712_v22 }
 0x3e7   : > { %1775 = vmatpush2.bf16.msra.mxu1 %v6006_v32 }
 0x3e8   : > { %1776 = vmatprep.subr.bf16.mxu1 %v5712_v22 }
 0x3eb   : > { %1777 = vmatpush2.bf16.msra.mxu1 %v6016_v43 }
 0x3ec   : > { %1778 = vmatprep.subr.bf16.mxu1 %v5712_v22 }
 0x3ef   : > { %1779 = vmatpush2.bf16.msra.mxu1 %v6024_v49 }
 0x3f0   : > { %1780 = vmatprep.subr.bf16.mxu1 %v5712_v22 }
 0x3f3   : > { %1781 = vmatpush2.bf16.msra.mxu1 %v6030_v23 }
 0x3f4   : > { %1782 = vmatprep.subr.bf16.mxu1 %v5712_v22 }
 0x3f7   : > { %1783 = vmatpush2.bf16.msra.mxu1 %v5940_v36 }
 0x3fa   : > { %1785 = vmatmul.mubr.bf16.vlgmr.msra.gmra.mxu1 %v5586_v15 }
 0x3fb   : > { %4663 = vmatprep.mubr.msk.bf16.mxu1 %vm898_vm3, %v5589_v16 }
 0x402   : > { %1793 = vmatmul.mubr.bf16.gmra.mxu1 %v5591_v17 }
 0x403   : > { %4664 = vmatprep.mubr.msk.bf16.mxu1 %vm898_vm3, %v5592_v20 }
 0x40a   : > { %1801 = vmatmul.mubr.bf16.gmra.mxu1 %v5594_v29 }
 0x40b   : > { %4665 = vmatprep.mubr.msk.bf16.mxu1 %vm898_vm3, %v4661_v34 }
 0x412   : > { %1809 = vmatmul.mubr.bf16.gmra.mxu1 %v4660_v44 }
 0x442   : > { %v5137_v50 = vpop.f32.mrf.mxu1 }
 0x443   : > { %v6321_v31 = vadd.f32 %v5137_v50, %v6185_v19 }
 0x444   : > { %v1450_v40 = vpop.f32.mrf.mxu1 }
 0x445   : > { %v6324_v51 = vadd.f32 %v1450_v40, %v6187_v24 }
 0x446   : > { %v5138_v52 = vpop.f32.mrf.mxu1 }
 0x447   : > { %v6327_v53 = vadd.f32 %v5138_v52, %v6189_v27 }
 0x448   : > { %v6329_v41 = vpop.f32.mrf.mxu1 }
 0x44e   : > { %v5141_v55 = vpop.f32.mrf.mxu1 }
 0x44f   : > { %v6332_v56 = vadd.f32 %v5141_v55, %v6193_v30 }
 0x450   : > { %v1466_v57 = vpop.f32.mrf.mxu1 }
 0x451   : > { %v6335_v58 = vadd.f32 %v1466_v57, %v6195_v37 }
 0x452   : > { %v5142_v19 = vpop.f32.mrf.mxu1 }
 0x454   : > { %v6337_v59 = vpop.f32.mrf.mxu1 }
 0x47e   : > { %v1574_v60 = vpop.f32.mrf.mxu1 }
 0x480   : > { %v1576_v24 = vpop.f32.mrf.mxu1 }
 0x481   : > { %v5601_v24 = vld [vmem:[%s7047_s1 + $0x11c] ss:$8 sps:$4 sm:$0xff]  }
 0x482   : > { %v1577_v61 = vpop.f32.mrf.mxu1 }
 0x483   : > { %v1604_v62 = vpack.c.bf16 %v1577_v61, %v1574_v60 }
 0x484   : > { %v1579_v63 = vpop.f32.mrf.mxu1 }
 0x485   : > { %5145 = vmatprep.mubr.msk.bf16.mxu0 %vm1116_vm5, %v1604_v62 }
 0x486   : > { %v1582_v27 = vpop.f32.mrf.mxu1 }
 0x488   : > { %v1584_v0 = vpop.f32.mrf.mxu1 }
 0x489   : > { %v5599_v0 = vld [vmem:[%s7047_s1 + $0x118] ss:$8 sps:$4 sm:$0xff]  }
 0x48a   : > { %v1585_v2 = vpop.f32.mrf.mxu1 }
 0x48b   : > { %v1605_v3 = vpack.c.bf16 %v1585_v2, %v1582_v27  ;;  %v5602_v2 = vld [vmem:[%s7047_s1 + $0x12c] ss:$8 sps:$4 sm:$0xff]  }
 0x48c   : > { %v1587_v30 = vpop.f32.mrf.mxu1 }
 0x48d   : > { %5146 = vmatmul.mubr.msk.bf16.vlgmr.msra.gmra.mxu0 %vm1116_vm5, %v1605_v3  ;;  %v5604_v3 = vld [vmem:[%s7047_s1 + $0x128] ss:$8 sps:$4 sm:$0xff]   ;;  %v5605_v30 = vld [vmem:[%s7047_s1 + $0x13c] ss:$8 sps:$4 sm:$0xff]  }
 0x48e   : > { %v1590_v4 = vpop.f32.mrf.mxu1  ;;  %5154 = vmatpush3.bf16.msra.mxu0 %v5598_v48 }
 0x48f   : > { %1964 = vmatprep.subr.bf16.mxu0 %v5712_v22 }
 0x490   : > { %v1592_v37 = vpop.f32.mrf.mxu1 }
 0x491   : > { %v5607_v37 = vld [vmem:[%s7047_s1 + $0x138] ss:$8 sps:$4 sm:$0xff]  }
 0x492   : > { %v1593_v5 = vpop.f32.mrf.mxu1 }
 0x493   : > { %v1606_v6 = vpack.c.bf16 %v1593_v5, %v1590_v4  ;;  %v4677_v4 = vld [vmem:[%s7047_s1 + $0x148] sm:$0x11] }
 0x494   : > { %v1595_v7 = vpop.f32.mrf.mxu1  ;;  %v4685_v5 = vcombine.high %v4677_v4, %v4677_v4 }
 0x495   : > { %5149 = vmatprep.mubr.msk.bf16.mxu0 %vm1116_vm5, %v1606_v6  ;;  %v4684_v6 = vcombine.low %v4677_v4, %v4677_v4  ;;  %v5612_v7 = vld [vmem:[%s7047_s1 + $0x154] ss:$8 sps:$4 sm:$0xff]  }
 0x496   : > { %v1598_v8 = vpop.f32.mrf.mxu1 }
 0x497   : > { %v1607_v9 = vpack.c.bf16 %v1598_v8, %v1598_v8  ;;  %v5610_v8 = vld [vmem:[%s7047_s1 + $0x150] ss:$8 sps:$4 sm:$0xff]  }
 0x498   : > { %v1600_v11 = vpop.f32.mrf.mxu1 }
 0x499   : > { %5150 = vmatmul.mubr.msk.bf16.gmra.mxu0 %vm1116_vm5, %v1607_v9  ;;  %v5613_v9 = vld [vmem:[%s7047_s1 + $0x164] ss:$8 sps:$4 sm:$0xff]   ;;  %v5615_v11 = vld [vmem:[%s7047_s1 + $0x160] ss:$8 sps:$4 sm:$0xff]  }
 0x49a   : > { %v1601_v14 = vpop.f32.mrf.mxu1 }
 0x49b   : > { %v5616_v14 = vld [vmem:[%s7047_s1 + $0x174] ss:$8 sps:$4 sm:$0xff]  }
 0x49c   : > { %v1602_v15 = vpop.f32.mrf.mxu1 }
 0x49d   : > { %v4701_v15 = vld [vmem:[%s7047_s1 + $0x180] sm:$0x11] }
 0x4ba   : > { %v1786_v16 = vpop.f32.mrf.mxu1 }
 0x4bc   : > { %v1788_v17 = vpop.f32.mrf.mxu1 }
 0x4bd   : > { %v5618_v17 = vld [vmem:[%s7047_s1 + $0x170] ss:$8 sps:$4 sm:$0xff]  }
 0x4be   : > { %v1789_v20 = vpop.f32.mrf.mxu1 }
 0x4bf   : > { %v1816_v25 = vpack.c.bf16 %v1789_v20, %v1786_v16 }
 0x4c0   : > { %v1791_v29 = vpop.f32.mrf.mxu1 }
 0x4c1   : > { %5155 = vmatprep.mubr.msk.bf16.mxu0 %vm1116_vm5, %v1816_v25  ;;  %v4709_v25 = vcombine.high %v4701_v15, %v4701_v15  ;;  %v5621_v29 = vld [vmem:[%s7052_s6 + $0x28] sm:$0xff]  }
 0x4c2   : > { %v1794_v34 = vpop.f32.mrf.mxu1  ;;  %5163 = vmatprep.subr.bf16.mxu1 %v5621_v29 }
 0x4c3   : > { %5164 = vmatpush3.bf16.msra.mxu1 %v5621_v29 }
 0x4c4   : > { %v1796_v38 = vpop.f32.mrf.mxu1 }
 0x4c6   : > { %v1797_v44 = vpop.f32.mrf.mxu1 }
 0x4c7   : > { %v1817_v48 = vpack.c.bf16 %v1797_v44, %v1794_v34 }
 0x4c8   : > { %v1799_v50 = vpop.f32.mrf.mxu1 }
 0x4c9   : > { %5156 = vmatmul.mubr.msk.bf16.vlgmr.msra.gmra.mxu0 %vm1116_vm5, %v1817_v48  ;;  %v4708_v50 = vcombine.low %v4701_v15, %v4701_v15 }
 0x4ca   : > { %1965 = vmatpush1.bf16.msra.mxu0 %v5915_v13  ;;  %v1802_v40 = vpop.f32.mrf.mxu1 }
 0x4cb   : > { %1966 = vmatprep.subr.bf16.mxu0 %v5712_v22 }
 0x4cc   : > { %v1804_v52 = vpop.f32.mrf.mxu1 }
 0x4ce   : > { %1967 = vmatpush1.bf16.msra.mxu0 %v5924_v21  ;;  %v1805_v55 = vpop.f32.mrf.mxu1 }
 0x4cf   : > { %v1818_v57 = vpack.c.bf16 %v1805_v55, %v1802_v40  ;;  %1968 = vmatprep.subr.bf16.mxu0 %v5712_v22 }
 0x4d0   : > { %v1807_v19 = vpop.f32.mrf.mxu1 }
 0x4d1   : > { %5159 = vmatprep.mubr.msk.bf16.mxu0 %vm1116_vm5, %v1818_v57 }
 0x4d2   : > { %1969 = vmatpush1.bf16.msra.mxu0 %v5938_v35  ;;  %v1810_v60 = vpop.f32.mrf.mxu1 }
 0x4d3   : > { %v1819_v61 = vpack.c.bf16 %v1810_v60, %v1810_v60  ;;  %1970 = vmatprep.subr.bf16.mxu0 %v5712_v22 }
 0x4d4   : > { %v1812_v62 = vpop.f32.mrf.mxu1 }
 0x4d5   : > { %5160 = vmatmul.mubr.msk.bf16.gmra.mxu0 %vm1116_vm5, %v1819_v61 }
 0x4d6   : > { %1971 = vmatpush1.bf16.msra.mxu0 %v5952_v46  ;;  %v1813_v63 = vpop.f32.mrf.mxu1  ;;  %4686 = vmatprep.mubr.msk.bf16.mxu0 %vm898_vm3, %v5601_v24 }
 0x4d7   : > { %1972 = vmatprep.subr.bf16.mxu0 %v5712_v22 }
 0x4d8   : > { %v1814_v27 = vpop.f32.mrf.mxu1 }
 0x4da   : > { %1973 = vmatpush1.bf16.msra.mxu0 %v5962_v45 }
 0x4db   : > { %1974 = vmatprep.subr.bf16.mxu0 %v5712_v22 }
 0x4de   : > { %1975 = vmatpush1.bf16.msra.mxu0 %v5968_v54 }
 0x4df   : > { %1976 = vmatprep.subr.bf16.mxu0 %v5712_v22 }
 0x4e2   : > { %1977 = vmatpush1.bf16.msra.mxu0 %v5902_v42 }
 0x4e3   : > { %1978 = vmatprep.subr.bf16.mxu0 %v5712_v22 }
 0x4e6   : > { %1979 = vmatpush1.bf16.msra.mxu0 %v5896_v33 }
 0x4e7   : > { %1982 = vmatprep.subr.bf16.mxu0 %v5712_v22 }
 0x4ea   : > { %1983 = vmatpush2.bf16.msra.mxu0 %v5990_v18 }
 0x4eb   : > { %1984 = vmatprep.subr.bf16.mxu0 %v5712_v22 }
 0x4ee   : > { %1985 = vmatpush2.bf16.msra.mxu0 %v5998_v26 }
 0x4ef   : > { %1986 = vmatprep.subr.bf16.mxu0 %v5712_v22 }
 0x4f2   : > { %1987 = vmatpush2.bf16.msra.mxu0 %v6006_v32 }
 0x4f3   : > { %1988 = vmatprep.subr.bf16.mxu0 %v5712_v22 }
 0x4f6   : > { %1989 = vmatpush2.bf16.msra.mxu0 %v6016_v43 }
 0x4f7   : > { %1990 = vmatprep.subr.bf16.mxu0 %v5712_v22 }
 0x4fa   : > { %1991 = vmatpush2.bf16.msra.mxu0 %v6024_v49 }
 0x4fb   : > { %1992 = vmatprep.subr.bf16.mxu0 %v5712_v22 }
 0x4fe   : > { %1993 = vmatpush2.bf16.msra.mxu0 %v6030_v23 }
 0x4ff   : > { %1994 = vmatprep.subr.bf16.mxu0 %v5712_v22 }
 0x502   : > { %1995 = vmatpush2.bf16.msra.mxu0 %v5940_v36 }
 0x503   : > { %2176 = vmatprep.subr.bf16.mxu0 %v5712_v22 }
 0x505   : > { %1997 = vmatmul.mubr.bf16.vlgmr.msra.gmra.mxu0 %v5599_v0 }
 0x506   : > { %2177 = vmatpush1.bf16.msra.mxu0 %v5915_v13  ;;  %4687 = vmatprep.mubr.msk.bf16.mxu0 %vm898_vm3, %v5602_v2 }
 0x507   : > { %2178 = vmatprep.subr.bf16.mxu0 %v5712_v22 }
 0x50a   : > { %2179 = vmatpush1.bf16.msra.mxu0 %v5924_v21 }
 0x50b   : > { %2180 = vmatprep.subr.bf16.mxu0 %v5712_v22 }
 0x50d   : > { %2005 = vmatmul.mubr.bf16.gmra.mxu0 %v5604_v3 }
 0x50e   : > { %2181 = vmatpush1.bf16.msra.mxu0 %v5938_v35  ;;  %4688 = vmatprep.mubr.msk.bf16.mxu0 %vm898_vm3, %v5605_v30 }
 0x50f   : > { %2182 = vmatprep.subr.bf16.mxu0 %v5712_v22 }
 0x512   : > { %2183 = vmatpush1.bf16.msra.mxu0 %v5952_v46 }
 0x513   : > { %2184 = vmatprep.subr.bf16.mxu0 %v5712_v22 }
 0x515   : > { %2013 = vmatmul.mubr.bf16.gmra.mxu0 %v5607_v37 }
 0x516   : > { %2185 = vmatpush1.bf16.msra.mxu0 %v5962_v45  ;;  %4689 = vmatprep.mubr.msk.bf16.mxu0 %vm898_vm3, %v4685_v5 }
 0x517   : > { %2186 = vmatprep.subr.bf16.mxu0 %v5712_v22 }
 0x51a   : > { %2187 = vmatpush1.bf16.msra.mxu0 %v5968_v54 }
 0x51b   : > { %2188 = vmatprep.subr.bf16.mxu0 %v5712_v22 }
 0x51d   : > { %2021 = vmatmul.mubr.bf16.gmra.mxu0 %v4684_v6 }
 0x51e   : > { %2189 = vmatpush1.bf16.msra.mxu0 %v5902_v42  ;;  %4710 = vmatprep.mubr.msk.bf16.mxu0 %vm898_vm3, %v5612_v7 }
 0x51f   : > { %2190 = vmatprep.subr.bf16.mxu0 %v5712_v22 }
 0x522   : > { %2191 = vmatpush1.bf16.msra.mxu0 %v5896_v33 }
 0x523   : > { %2194 = vmatprep.subr.bf16.mxu0 %v5712_v22 }
 0x526   : > { %2195 = vmatpush2.bf16.msra.mxu0 %v5990_v18 }
 0x527   : > { %2196 = vmatprep.subr.bf16.mxu0 %v5712_v22 }
 0x52a   : > { %2197 = vmatpush2.bf16.msra.mxu0 %v5998_v26 }
 0x52b   : > { %2198 = vmatprep.subr.bf16.mxu0 %v5712_v22 }
 0x52e   : > { %2199 = vmatpush2.bf16.msra.mxu0 %v6006_v32 }
 0x52f   : > { %2200 = vmatprep.subr.bf16.mxu0 %v5712_v22 }
 0x532   : > { %2201 = vmatpush2.bf16.msra.mxu0 %v6016_v43 }
 0x533   : > { %2202 = vmatprep.subr.bf16.mxu0 %v5712_v22 }
 0x536   : > { %2203 = vmatpush2.bf16.msra.mxu0 %v6024_v49 }
 0x537   : > { %2204 = vmatprep.subr.bf16.mxu0 %v5712_v22 }
 0x53a   : > { %2205 = vmatpush2.bf16.msra.mxu0 %v6030_v23 }
 0x53b   : > { %2206 = vmatprep.subr.bf16.mxu0 %v5712_v22 }
 0x53e   : > { %2207 = vmatpush2.bf16.msra.mxu0 %v5940_v36 }
 0x541   : > { %2209 = vmatmul.mubr.bf16.vlgmr.msra.gmra.mxu0 %v5610_v8 }
 0x542   : > { %4711 = vmatprep.mubr.msk.bf16.mxu0 %vm898_vm3, %v5613_v9 }
 0x549   : > { %2217 = vmatmul.mubr.bf16.gmra.mxu0 %v5615_v11 }
 0x54a   : > { %4712 = vmatprep.mubr.msk.bf16.mxu0 %vm898_vm3, %v5616_v14 }
 0x54d   : > { %v5147_v16 = vpop.f32.mrf.mxu0 }
 0x54e   : > { %v1694_v20 = vadd.f32 %v5147_v16, %v6321_v31 }
 0x54f   : > { %v1662_v34 = vpop.f32.mrf.mxu0 }
 0x550   : > { %v1692_v38 = vadd.f32 %v1662_v34, %v6324_v51  ;;  %v5622_v51 = vld [vmem:[%s7052_s6 + $0x30] sm:$0xff]  }
 0x551   : > { %2225 = vmatmul.mubr.bf16.gmra.mxu0 %v5618_v17  ;;  %v5148_v44 = vpop.f32.mrf.mxu0  ;;  %5173 = vmatprep.subr.bf16.mxu1 %v5622_v51 }
 0x552   : > { %v1695_v48 = vadd.f32 %v5148_v44, %v6327_v53  ;;  %4713 = vmatprep.mubr.msk.bf16.mxu0 %vm898_vm3, %v4709_v25 }
 0x553   : > { %v6463_v40 = vpop.f32.mrf.mxu0 }
 0x559   : > { %2233 = vmatmul.mubr.bf16.gmra.mxu0 %v4708_v50  ;;  %v5151_v31 = vpop.f32.mrf.mxu0 }
 0x55a   : > { %v1698_v52 = vadd.f32 %v5151_v31, %v6332_v56 }
 0x55b   : > { %v1678_v55 = vpop.f32.mrf.mxu0 }
 0x55c   : > { %v1696_v57 = vadd.f32 %v1678_v55, %v6335_v58 }
 0x55d   : > { %v5152_v19 = vpop.f32.mrf.mxu0 }
 0x55f   : > { %v6470_v60 = vpop.f32.mrf.mxu0 }
 0x589   : > { %v5157_v53 = vpop.f32.mrf.mxu0 }
 0x58a   : > { %v6472_v24 = vadd.f32 %v5157_v53, %v1694_v20 }
 0x58b   : > { %v1874_v61 = vpop.f32.mrf.mxu0 }
 0x58c   : > { %v6474_v62 = vadd.f32 %v1874_v61, %v1692_v38 }
 0x58d   : > { %v5158_v63 = vpop.f32.mrf.mxu0 }
 0x58e   : > { %v6476_v27 = vadd.f32 %v5158_v63, %v1695_v48 }
 0x58f   : > { %v6478_v56 = vpop.f32.mrf.mxu0 }
 0x595   : > { %v5161_v58 = vpop.f32.mrf.mxu0 }
 0x596   : > { %v6480_v0 = vadd.f32 %v5161_v58, %v1698_v52 }
 0x597   : > { %v1890_v2 = vpop.f32.mrf.mxu0 }
 0x598   : > { %v6482_v3 = vadd.f32 %v1890_v2, %v1696_v57 }
 0x599   : > { %v5162_v30 = vpop.f32.mrf.mxu0 }
 0x59b   : > { %v6484_v4 = vpop.f32.mrf.mxu0 }
 0x5c5   : > { %v1998_v37 = vpop.f32.mrf.mxu0 }
 0x5c7   : > { %v2000_v5 = vpop.f32.mrf.mxu0 }
 0x5c9   : > { %v2001_v6 = vpop.f32.mrf.mxu0 }
 0x5ca   : > { %v2028_v7 = vpack.c.bf16 %v2001_v6, %v1998_v37 }
 0x5cb   : > { %v2003_v8 = vpop.f32.mrf.mxu0 }
 0x5cc   : > { %5165 = vmatprep.mubr.msk.bf16.mxu1 %vm1116_vm5, %v2028_v7 }
 0x5cd   : > { %v2006_v9 = vpop.f32.mrf.mxu0 }
 0x5cf   : > { %v2008_v11 = vpop.f32.mrf.mxu0 }
 0x5d1   : > { %v2009_v14 = vpop.f32.mrf.mxu0 }
 0x5d2   : > { %v2029_v15 = vpack.c.bf16 %v2009_v14, %v2006_v9  ;;  %v5625_v9 = vld [vmem:[%s7047_s1 + $0x18c] ss:$8 sps:$4 sm:$0xff]  }
 0x5d3   : > { %v2011_v16 = vpop.f32.mrf.mxu0 }
 0x5d4   : > { %5166 = vmatmul.mubr.msk.bf16.vlgmr.msra.gmra.mxu1 %vm1116_vm5, %v2029_v15 }
 0x5d5   : > { %v2014_v17 = vpop.f32.mrf.mxu0  ;;  %5174 = vmatpush3.bf16.msra.mxu1 %v5622_v51 }
 0x5d6   : > { %2388 = vmatprep.subr.bf16.mxu1 %v5712_v22 }
 0x5d7   : > { %v2016_v20 = vpop.f32.mrf.mxu0 }
 0x5d8   : > { %v5626_v20 = vld [vmem:[%s7047_s1 + $0x19c] ss:$8 sps:$4 sm:$0xff]  }
 0x5d9   : > { %v2017_v25 = vpop.f32.mrf.mxu0 }
 0x5da   : > { %v2030_v29 = vpack.c.bf16 %v2017_v25, %v2014_v17  ;;  %v5623_v17 = vld [vmem:[%s7047_s1 + $0x188] ss:$8 sps:$4 sm:$0xff]   ;;  %v5628_v25 = vld [vmem:[%s7047_s1 + $0x198] ss:$8 sps:$4 sm:$0xff]  }
 0x5db   : > { %v2019_v34 = vpop.f32.mrf.mxu0 }
 0x5dc   : > { %5169 = vmatprep.mubr.msk.bf16.mxu1 %vm1116_vm5, %v2030_v29  ;;  %v5629_v29 = vld [vmem:[%s7047_s1 + $0x1ac] ss:$8 sps:$4 sm:$0xff]  }
 0x5dd   : > { %v2022_v38 = vpop.f32.mrf.mxu0 }
 0x5de   : > { %v2031_v44 = vpack.c.bf16 %v2022_v38, %v2022_v38  ;;  %v5636_v38 = vld [vmem:[%s7047_s1 + $0x1c4] ss:$8 sps:$4 sm:$0xff]  }
 0x5df   : > { %v2024_v48 = vpop.f32.mrf.mxu0 }
 0x5e0   : > { %5170 = vmatmul.mubr.msk.bf16.gmra.mxu1 %vm1116_vm5, %v2031_v44 }
 0x5e1   : > { %v2025_v50 = vpop.f32.mrf.mxu0 }
 0x5e3   : > { %v2026_v31 = vpop.f32.mrf.mxu0 }
 0x601   : > { %v2210_v52 = vpop.f32.mrf.mxu0 }
 0x603   : > { %v2212_v55 = vpop.f32.mrf.mxu0 }
 0x605   : > { %v2213_v57 = vpop.f32.mrf.mxu0 }
 0x606   : > { %v2240_v19 = vpack.c.bf16 %v2213_v57, %v2210_v52  ;;  %v1249_v57 = vadd.f32 %v6183_v12, %v6191_v28 }
 0x607   : > { %v2215_v51 = vpop.f32.mrf.mxu0 }
 0x608   : > { %5175 = vmatprep.mubr.msk.bf16.mxu1 %vm1116_vm5, %v2240_v19  ;;  %v1481_v51 = vadd.f32 %v6329_v41, %v1249_v57  ;;  %v1265_v41 = vadd.f32 %v6318_v47, %v6197_v39 }
 0x609   : > { %v2218_v53 = vpop.f32.mrf.mxu0 }
 0x60b   : > { %v2220_v61 = vpop.f32.mrf.mxu0 }
 0x60d   : > { %v2221_v63 = vpop.f32.mrf.mxu0 }
 0x60e   : > { %v2241_v58 = vpack.c.bf16 %v2221_v63, %v2218_v53 }
 0x60f   : > { %v2223_v2 = vpop.f32.mrf.mxu0 }
 0x610   : > { %5176 = vmatmul.mubr.msk.bf16.vlgmr.msra.gmra.mxu1 %vm1116_vm5, %v2241_v58 }
 0x611   : > { %2389 = vmatpush1.bf16.msra.mxu1 %v5915_v13  ;;  %v2226_v30 = vpop.f32.mrf.mxu0 }
 0x612   : > { %2390 = vmatprep.subr.bf16.mxu1 %v5712_v22 }
 0x613   : > { %v2228_v37 = vpop.f32.mrf.mxu0 }
 0x615   : > { %2391 = vmatpush1.bf16.msra.mxu1 %v5924_v21  ;;  %v2229_v5 = vpop.f32.mrf.mxu0 }
 0x616   : > { %v2242_v6 = vpack.c.bf16 %v2229_v5, %v2226_v30  ;;  %2392 = vmatprep.subr.bf16.mxu1 %v5712_v22  ;;  %v1485_v5 = vadd.f32 %v6337_v59, %v1265_v41 }
 0x617   : > { %v2231_v7 = vpop.f32.mrf.mxu0 }
 0x618   : > { %5179 = vmatprep.mubr.msk.bf16.mxu1 %vm1116_vm5, %v2242_v6  ;;  %v1697_v6 = vadd.f32 %v6470_v60, %v1485_v5 }
 0x619   : > { %2393 = vmatpush1.bf16.msra.mxu1 %v5938_v35  ;;  %v2234_v8 = vpop.f32.mrf.mxu0 }
 0x61a   : > { %v2243_v11 = vpack.c.bf16 %v2234_v8, %v2234_v8  ;;  %2394 = vmatprep.subr.bf16.mxu1 %v5712_v22  ;;  %v1909_v8 = vadd.f32 %v6484_v4, %v1697_v6 }
 0x61b   : > { %v2236_v14 = vpop.f32.mrf.mxu0 }
 0x61c   : > { %5180 = vmatmul.mubr.msk.bf16.gmra.mxu1 %vm1116_vm5, %v2243_v11 }
 0x61d   : > { %2395 = vmatpush1.bf16.msra.mxu1 %v5952_v46  ;;  %v2237_v15 = vpop.f32.mrf.mxu0  ;;  %4734 = vmatprep.mubr.msk.bf16.mxu1 %vm898_vm3, %v5625_v9 }
 0x61e   : > { %2396 = vmatprep.subr.bf16.mxu1 %v5712_v22 }
 0x61f   : > { %v2238_v16 = vpop.f32.mrf.mxu0 }
 0x621   : > { %2397 = vmatpush1.bf16.msra.mxu1 %v5962_v45 }
 0x622   : > { %2398 = vmatprep.subr.bf16.mxu1 %v5712_v22 }
 0x625   : > { %2399 = vmatpush1.bf16.msra.mxu1 %v5968_v54 }
 0x626   : > { %2400 = vmatprep.subr.bf16.mxu1 %v5712_v22 }
 0x629   : > { %2401 = vmatpush1.bf16.msra.mxu1 %v5902_v42 }
 0x62a   : > { %2402 = vmatprep.subr.bf16.mxu1 %v5712_v22 }
 0x62d   : > { %2403 = vmatpush1.bf16.msra.mxu1 %v5896_v33 }
 0x62e   : > { %2406 = vmatprep.subr.bf16.mxu1 %v5712_v22 }
 0x631   : > { %2407 = vmatpush2.bf16.msra.mxu1 %v5990_v18 }
 0x632   : > { %2408 = vmatprep.subr.bf16.mxu1 %v5712_v22 }
 0x635   : > { %2409 = vmatpush2.bf16.msra.mxu1 %v5998_v26 }
 0x636   : > { %2410 = vmatprep.subr.bf16.mxu1 %v5712_v22 }
 0x639   : > { %2411 = vmatpush2.bf16.msra.mxu1 %v6006_v32 }
 0x63a   : > { %2412 = vmatprep.subr.bf16.mxu1 %v5712_v22 }
 0x63d   : > { %2413 = vmatpush2.bf16.msra.mxu1 %v6016_v43 }
 0x63e   : > { %2414 = vmatprep.subr.bf16.mxu1 %v5712_v22 }
 0x641   : > { %2415 = vmatpush2.bf16.msra.mxu1 %v6024_v49 }
 0x642   : > { %2416 = vmatprep.subr.bf16.mxu1 %v5712_v22 }
 0x645   : > { %2417 = vmatpush2.bf16.msra.mxu1 %v6030_v23 }
 0x646   : > { %2418 = vmatprep.subr.bf16.mxu1 %v5712_v22 }
 0x649   : > { %2419 = vmatpush2.bf16.msra.mxu1 %v5940_v36 }
 0x64a   : > { %2600 = vmatprep.subr.bf16.mxu1 %v5712_v22 }
 0x64c   : > { %2421 = vmatmul.mubr.bf16.vlgmr.msra.gmra.mxu1 %v5623_v17 }
 0x64d   : > { %2601 = vmatpush1.bf16.msra.mxu1 %v5915_v13  ;;  %4735 = vmatprep.mubr.msk.bf16.mxu1 %vm898_vm3, %v5626_v20  ;;  %v4725_v13 = vld [vmem:[%s7047_s1 + $0x1b8] sm:$0x11] }
 0x64e   : > { %2602 = vmatprep.subr.bf16.mxu1 %v5712_v22  ;;  %v4733_v34 = vcombine.high %v4725_v13, %v4725_v13 }
 0x651   : > { %2603 = vmatpush1.bf16.msra.mxu1 %v5924_v21  ;;  %v5631_v21 = vld [vmem:[%s7047_s1 + $0x1a8] ss:$8 sps:$4 sm:$0xff]  }
 0x652   : > { %2604 = vmatprep.subr.bf16.mxu1 %v5712_v22 }
 0x654   : > { %2429 = vmatmul.mubr.bf16.gmra.mxu1 %v5628_v25 }
 0x655   : > { %2605 = vmatpush1.bf16.msra.mxu1 %v5938_v35  ;;  %4736 = vmatprep.mubr.msk.bf16.mxu1 %vm898_vm3, %v5629_v29  ;;  %v4732_v35 = vcombine.low %v4725_v13, %v4725_v13 }
 0x656   : > { %2606 = vmatprep.subr.bf16.mxu1 %v5712_v22 }
 0x659   : > { %2607 = vmatpush1.bf16.msra.mxu1 %v5952_v46  ;;  %v5639_v46 = vld [vmem:[%s7047_s1 + $0x1d0] ss:$8 sps:$4 sm:$0xff]  }
 0x65a   : > { %2608 = vmatprep.subr.bf16.mxu1 %v5712_v22 }
 0x65c   : > { %2437 = vmatmul.mubr.bf16.gmra.mxu1 %v5631_v21 }
 0x65d   : > { %2609 = vmatpush1.bf16.msra.mxu1 %v5962_v45  ;;  %4737 = vmatprep.mubr.msk.bf16.mxu1 %vm898_vm3, %v4733_v34 }
 0x65e   : > { %2610 = vmatprep.subr.bf16.mxu1 %v5712_v22 }
 0x661   : > { %2611 = vmatpush1.bf16.msra.mxu1 %v5968_v54  ;;  %v5642_v54 = vld [vmem:[%s7047_s1 + $0x1e0] ss:$8 sps:$4 sm:$0xff]  }
 0x662   : > { %2612 = vmatprep.subr.bf16.mxu1 %v5712_v22 }
 0x664   : > { %2445 = vmatmul.mubr.bf16.gmra.mxu1 %v4732_v35 }
 0x665   : > { %2613 = vmatpush1.bf16.msra.mxu1 %v5902_v42  ;;  %4758 = vmatprep.mubr.msk.bf16.mxu1 %vm898_vm3, %v5636_v38  ;;  %v5637_v42 = vld [vmem:[%s7047_s1 + $0x1d4] ss:$8 sps:$4 sm:$0xff]  }
 0x666   : > { %2614 = vmatprep.subr.bf16.mxu1 %v5712_v22 }
 0x669   : > { %2615 = vmatpush1.bf16.msra.mxu1 %v5896_v33  ;;  %v5634_v33 = vld [vmem:[%s7047_s1 + $0x1c0] ss:$8 sps:$4 sm:$0xff]  }
 0x66a   : > { %2618 = vmatprep.subr.bf16.mxu1 %v5712_v22 }
 0x66d   : > { %2619 = vmatpush2.bf16.msra.mxu1 %v5990_v18 }
 0x66e   : > { %2620 = vmatprep.subr.bf16.mxu1 %v5712_v22 }
 0x671   : > { %2621 = vmatpush2.bf16.msra.mxu1 %v5998_v26 }
 0x672   : > { %2622 = vmatprep.subr.bf16.mxu1 %v5712_v22 }
 0x675   : > { %2623 = vmatpush2.bf16.msra.mxu1 %v6006_v32  ;;  %v5645_v32 = vld [vmem:[%s7052_s6 + $0x38] sm:$0xff]  }
 0x676   : > { %2624 = vmatprep.subr.bf16.mxu1 %v5712_v22  ;;  %5183 = vmatprep.subr.bf16.mxu0 %v5645_v32 }
 0x677   : > { %5184 = vmatpush3.bf16.msra.mxu0 %v5645_v32 }
 0x679   : > { %2625 = vmatpush2.bf16.msra.mxu1 %v6016_v43 }
 0x67a   : > { %2626 = vmatprep.subr.bf16.mxu1 %v5712_v22 }
 0x67d   : > { %2627 = vmatpush2.bf16.msra.mxu1 %v6024_v49 }
 0x67e   : > { %2628 = vmatprep.subr.bf16.mxu1 %v5712_v22 }
 0x681   : > { %2629 = vmatpush2.bf16.msra.mxu1 %v6030_v23 }
 0x682   : > { %2630 = vmatprep.subr.bf16.mxu1 %v5712_v22  ;;  %v5640_v22 = vld [vmem:[%s7047_s1 + $0x1e4] ss:$8 sps:$4 sm:$0xff]  }
 0x685   : > { %2631 = vmatpush2.bf16.msra.mxu1 %v5940_v36  ;;  %v4749_v36 = vld [vmem:[%s7047_s1 + $0x1f0] sm:$0x11] }
 0x686   : > { %5263 = vmatprep.subr.bf16.mxu1 %v5710_v1  ;;  %v4757_v26 = vcombine.high %v4749_v36, %v4749_v36  ;;  %v4756_v48 = vcombine.low %v4749_v36, %v4749_v36 }
 0x688   : > { %2633 = vmatmul.mubr.bf16.vlgmr.msra.gmra.mxu1 %v5634_v33 }
 0x689   : > { %4759 = vmatprep.mubr.msk.bf16.mxu1 %vm898_vm3, %v5637_v42 }
 0x690   : > { %2641 = vmatmul.mubr.bf16.gmra.mxu1 %v5639_v46 }
 0x691   : > { %4760 = vmatprep.mubr.msk.bf16.mxu1 %vm898_vm3, %v5640_v22 }
 0x694   : > { %v5167_v45 = vpop.f32.mrf.mxu1 }
 0x695   : > { %v2118_v18 = vadd.f32 %v5167_v45, %v6472_v24 }
 0x696   : > { %v2086_v43 = vpop.f32.mrf.mxu1 }
 0x697   : > { %v2116_v49 = vadd.f32 %v2086_v43, %v6474_v62 }
 0x698   : > { %2649 = vmatmul.mubr.bf16.gmra.mxu1 %v5642_v54  ;;  %v5168_v23 = vpop.f32.mrf.mxu1 }
 0x699   : > { %v2119_v44 = vadd.f32 %v5168_v23, %v6476_v27  ;;  %4761 = vmatprep.mubr.msk.bf16.mxu1 %vm898_vm3, %v4757_v26  ;;  %v5646_v27 = vld [vmem:[%s7052_s6 + $0x40] sm:$0xff]  }
 0x69a   : > { %v2089_v50 = vpop.f32.mrf.mxu1  ;;  %5193 = vmatprep.subr.bf16.mxu0 %v5646_v27 }
 0x6a0   : > { %2657 = vmatmul.mubr.bf16.gmra.mxu1 %v4756_v48  ;;  %v5171_v24 = vpop.f32.mrf.mxu1 }
 0x6a1   : > { %v2122_v31 = vadd.f32 %v5171_v24, %v6480_v0  ;;  %5271 = vmatprep.mubr.msk.bf16.mxu1 %vm5711_vm1, %v5710_v1  ;;  %v1693_v0 = vadd.f32 %v6463_v40, %v1481_v51 }
 0x6a2   : > { %v2102_v52 = vpop.f32.mrf.mxu1 }
 0x6a3   : > { %v2120_v62 = vadd.f32 %v2102_v52, %v6482_v3  ;;  %v1905_v3 = vadd.f32 %v6478_v56, %v1693_v0 }
 0x6a4   : > { %v5172_v55 = vpop.f32.mrf.mxu1 }
 0x6a5   : > { %v2117_v12 = vadd.f32 %v2089_v50, %v1905_v3 }
 0x6a6   : > { %v2105_v19 = vpop.f32.mrf.mxu1 }
 0x6a7   : > { %v2121_v14 = vadd.f32 %v2105_v19, %v1909_v8 }
 0x6d0   : > { %v5177_v53 = vpop.f32.mrf.mxu1 }
 0x6d1   : > { %v6622_v61 = vadd.f32 %v5177_v53, %v2118_v18 }
 0x6d2   : > { %v2298_v63 = vpop.f32.mrf.mxu1 }
 0x6d3   : > { %v6625_v58 = vadd.f32 %v2298_v63, %v2116_v49 }
 0x6d4   : > { %v5178_v2 = vpop.f32.mrf.mxu1 }
 0x6d5   : > { %v6627_v28 = vadd.f32 %v5178_v2, %v2119_v44 }
 0x6d6   : > { %v2301_v30 = vpop.f32.mrf.mxu1 }
 0x6d7   : > { %v6629_v37 = vadd.f32 %v2301_v30, %v2117_v12 }
 0x6dc   : > { %v5181_v40 = vpop.f32.mrf.mxu1 }
 0x6dd   : > { %v6635_v7 = vadd.f32 %v5181_v40, %v2122_v31 }
 0x6de   : > { %v2314_v56 = vpop.f32.mrf.mxu1 }
 0x6df   : > { %v6638_v9 = vadd.f32 %v2314_v56, %v2120_v62 }
 0x6e0   : > { %v5182_v11 = vpop.f32.mrf.mxu1 }
 0x6e2   : > { %v2317_v15 = vpop.f32.mrf.mxu1 }
 0x6e3   : > { %v6640_v16 = vadd.f32 %v2317_v15, %v2121_v14  ;;  %v4767_v15 = vld [vmem:[%s7053_s7] ss:$0 sm:$0xff] }
 0x70c   : > { %v2422_v17 = vpop.f32.mrf.mxu1 }
 0x70e   : > { %v2424_v20 = vpop.f32.mrf.mxu1 }
 0x710   : > { %v2425_v39 = vpop.f32.mrf.mxu1 }
 0x711   : > { %v2452_v47 = vpack.c.bf16 %v2425_v39, %v2422_v17 }
 0x712   : > { %v2427_v59 = vpop.f32.mrf.mxu1 }
 0x713   : > { %5185 = vmatprep.mubr.msk.bf16.mxu0 %vm1116_vm5, %v2452_v47 }
 0x714   : > { %v2430_v60 = vpop.f32.mrf.mxu1 }
 0x716   : > { %v2432_v25 = vpop.f32.mrf.mxu1 }
 0x718   : > { %v2433_v29 = vpop.f32.mrf.mxu1 }
 0x719   : > { %v2453_v13 = vpack.c.bf16 %v2433_v29, %v2430_v60 }
 0x71a   : > { %v2435_v21 = vpop.f32.mrf.mxu1 }
 0x71b   : > { %5186 = vmatmul.mubr.msk.bf16.vlgmr.msra.gmra.mxu0 %vm1116_vm5, %v2453_v13 }
 0x71c   : > { %v2438_v4 = vpop.f32.mrf.mxu1  ;;  %5194 = vmatpush3.bf16.msra.mxu0 %v5646_v27 }
 0x71d   : > { %5203 = vmatprep.subr.bf16.mxu0 %v5710_v1 }
 0x71e   : > { %v2440_v34 = vpop.f32.mrf.mxu1 }
 0x720   : > { %v2441_v35 = vpop.f32.mrf.mxu1 }
 0x721   : > { %v2454_v38 = vpack.c.bf16 %v2441_v35, %v2438_v4 }
 0x722   : > { %v2443_v33 = vpop.f32.mrf.mxu1 }
 0x723   : > { %5189 = vmatprep.mubr.msk.bf16.mxu0 %vm1116_vm5, %v2454_v38 }
 0x724   : > { %v2446_v42 = vpop.f32.mrf.mxu1 }
 0x725   : > { %v2455_v46 = vpack.c.bf16 %v2446_v42, %v2446_v42 }
 0x726   : > { %v2448_v22 = vpop.f32.mrf.mxu1 }
 0x727   : > { %5190 = vmatmul.mubr.msk.bf16.gmra.mxu0 %vm1116_vm5, %v2455_v46 }
 0x728   : > { %v2449_v36 = vpop.f32.mrf.mxu1 }
 0x72a   : > { %v2450_v45 = vpop.f32.mrf.mxu1 }
 0x748   : > { %v2634_v54 = vpop.f32.mrf.mxu1 }
 0x74a   : > { %v2636_v18 = vpop.f32.mrf.mxu1 }
 0x74c   : > { %v2637_v26 = vpop.f32.mrf.mxu1 }
 0x74d   : > { %v2664_v32 = vpack.c.bf16 %v2637_v26, %v2634_v54 }
 0x74e   : > { %v2639_v43 = vpop.f32.mrf.mxu1 }
 0x74f   : > { %5195 = vmatprep.mubr.msk.bf16.mxu0 %vm1116_vm5, %v2664_v32 }
 0x750   : > { %v2642_v49 = vpop.f32.mrf.mxu1 }
 0x752   : > { %v2644_v23 = vpop.f32.mrf.mxu1 }
 0x754   : > { %v2645_v44 = vpop.f32.mrf.mxu1 }
 0x755   : > { %v2665_v48 = vpack.c.bf16 %v2645_v44, %v2642_v49 }
 0x756   : > { %v2647_v50 = vpop.f32.mrf.mxu1 }
 0x757   : > { %5196 = vmatmul.mubr.msk.bf16.vlgmr.msra.gmra.mxu0 %vm1116_vm5, %v2665_v48  ;;  %v5648_v48 = vld [vmem:[%s7048_s2 + $0x18] sm:$0x1f]   ;;  %v5649_v50 = vld [vmem:[%s7048_s2 + $0x8] sm:$0x1f]  }
 0x758   : > { %v2650_v24 = vpop.f32.mrf.mxu1 }
 0x75a   : > { %v2652_v31 = vpop.f32.mrf.mxu1 }
 0x75b   : > { %v5651_v31 = vld [vmem:[%s7054_s8 + $0x10] sm:$0xff]  }
 0x75c   : > { %v2653_v52 = vpop.f32.mrf.mxu1 }
 0x75d   : > { %v2666_v62 = vpack.c.bf16 %v2653_v52, %v2650_v24  ;;  %v5650_v24 = vld [vmem:[%s7054_s8 + $0x18] sm:$0xff]   ;;  %v5655_v52 = vld [vmem:[%s7048_s2 + $0x20] sm:$0x1f]  }
 0x75e   : > { %v2655_v55 = vpop.f32.mrf.mxu1 }
 0x75f   : > { %5199 = vmatprep.mubr.msk.bf16.mxu0 %vm1116_vm5, %v2666_v62 }
 0x760   : > { %v2658_v57 = vpop.f32.mrf.mxu1 }
 0x761   : > { %v2667_v19 = vpack.c.bf16 %v2658_v57, %v2658_v57 }
 0x762   : > { %v2660_v27 = vpop.f32.mrf.mxu1 }
 0x763   : > { %5200 = vmatmul.mubr.msk.bf16.gmra.mxu0 %vm1116_vm5, %v2667_v19 }
 0x764   : > { %v2661_v51 = vpop.f32.mrf.mxu1  ;;  %5211 = vmatprep.mubr.msk.bf16.mxu0 %vm5711_vm1, %v5710_v1 }
 0x766   : > { %v2662_v53 = vpop.f32.mrf.mxu1 }
 0x7db   : > { %v5187_v0 = vpop.f32.mrf.mxu0 }
 0x7dc   : > { %v2542_v63 = vadd.f32 %v5187_v0, %v6622_v61  ;;  %v5652_v0 = vld [vmem:[%s7054_s8 + $0x8] sm:$0xff]  }
 0x7dd   : > { %v2510_v3 = vpop.f32.mrf.mxu0 }
 0x7de   : > { %v2540_v2 = vadd.f32 %v2510_v3, %v6625_v58 }
 0x7df   : > { %v5188_v12 = vpop.f32.mrf.mxu0 }
 0x7e0   : > { %v2543_v30 = vadd.f32 %v5188_v12, %v6627_v28 }
 0x7e1   : > { %v2513_v41 = vpop.f32.mrf.mxu0 }
 0x7e2   : > { %v2541_v5 = vadd.f32 %v2513_v41, %v6629_v37 }
 0x7e7   : > { %v5191_v40 = vpop.f32.mrf.mxu0 }
 0x7e8   : > { %v2546_v13 = vadd.f32 %v5191_v40, %v6635_v7 }
 0x7e9   : > { %v2526_v6 = vpop.f32.mrf.mxu0 }
 0x7ea   : > { %v2544_v38 = vadd.f32 %v2526_v6, %v6638_v9 }
 0x7eb   : > { %v5192_v56 = vpop.f32.mrf.mxu0 }
 0x7ed   : > { %v2529_v8 = vpop.f32.mrf.mxu0 }
 0x7ee   : > { %v2545_v54 = vadd.f32 %v2529_v8, %v6640_v16 }
 0x817   : > { %v5197_v11 = vpop.f32.mrf.mxu0 }
 0x818   : > { %v2754_v14 = vadd.f32 %v5197_v11, %v2542_v63  ;;  %v5657_v11 = vld [vmem:[%s7054_s8 + $0x20] sm:$0xff]  }
 0x819   : > { %v2722_v61 = vpop.f32.mrf.mxu0 }
 0x81a   : > { %v2752_v17 = vadd.f32 %v2722_v61, %v2540_v2  ;;  %v2768_v58 = vadd.f32 %v4767_v15, %v2754_v14  ;;  %v5653_v2 = vld [vmem:[%s7054_s8] sm:$0xff]  }
 0x81b   : > { %v5198_v20 = vpop.f32.mrf.mxu0 }
 0x81c   : > { %v2755_v39 = vadd.f32 %v5198_v20, %v2543_v30  ;;  %v2766_v28 = vadd.f32 %v4767_v15, %v2752_v17  ;;  %v2775_v37 = vmax.f32 %v2768_v58, 0.0  ;;  %v5654_v30 = vld [vmem:[%s7048_s2 + $0x10] sm:$0x1f]  }
 0x81d   : > { %v2725_v47 = vpop.f32.mrf.mxu0 }
 0x81e   : > { %v2769_v59 = vadd.f32 %v4767_v15, %v2755_v39  ;;  %v2753_v60 = vadd.f32 %v2725_v47, %v2541_v5  ;;  %v2773_v21 = vmax.f32 %v2766_v28, 0.0  ;;  %v5656_v5 = vld [vmem:[%s7054_s8 + $0x28] sm:$0xff]  }
 0x820   : > { %v2776_v25 = vmax.f32 %v2769_v59, 0.0  ;;  %v2767_v29 = vadd.f32 %v4767_v15, %v2753_v60 }
 0x822   : > { %v6661_v4 = vpack.c.bf16 %v2776_v25, %v2775_v37  ;;  %v2774_v34 = vmax.f32 %v2767_v29, 0.0 }
 0x823   : > { %v5201_v35 = vpop.f32.mrf.mxu0 }
 0x824   : > { %v6664_v33 = vpack.c.bf16 %v2774_v34, %v2773_v21  ;;  %v2758_v42 = vadd.f32 %v5201_v35, %v2546_v13 }
 0x825   : > { %v2738_v46 = vpop.f32.mrf.mxu0 }
 0x826   : > { %v2772_v22 = vadd.f32 %v4767_v15, %v2758_v42  ;;  %v2756_v36 = vadd.f32 %v2738_v46, %v2544_v38  ;;  %v5658_v38 = vld [vmem:[%s7054_s8 + $0x38] sm:$0xff]  }
 0x827   : > { %v5202_v45 = vpop.f32.mrf.mxu0 }
 0x828   : > { %v2779_v18 = vmax.f32 %v2772_v22, 0.0  ;;  %v2770_v7 = vadd.f32 %v4767_v15, %v2756_v36  ;;  %v5659_v22 = vld [vmem:[%s7054_s8 + $0x30] sm:$0xff]   ;;  %v5660_v36 = vld [vmem:[%s7054_s8 + $0x48] sm:$0xff]   ;;  %v5661_v45 = vld [vmem:[%s7054_s8 + $0x40] sm:$0xff]  }
 0x829   : > { %v2741_v26 = vpop.f32.mrf.mxu0 }
 0x82a   : > { %v2783_v32 = vpack.c.bf16 %v2779_v18, %v2779_v18  ;;  %v2757_v43 = vadd.f32 %v2741_v26, %v2545_v54  ;;  %v2777_v44 = vmax.f32 %v2770_v7, 0.0  ;;  %v5662_v54 = vld [vmem:[%s7048_s2 + $0x28] sm:$0x1f]   ;;  %v5663_v18 = vld [vmem:[%s7054_s8 + $0x58] sm:$0xff]   ;;  %v5664_v26 = vld [vmem:[%s7054_s8 + $0x50] sm:$0xff]  }
 0x82c   : > { %v6668_v49 = vand.u32 %v2783_v32, %v5985_v10  ;;  %v2771_v23 = vadd.f32 %v4767_v15, %v2757_v43  ;;  %v5647_v10 = vld [vmem:[%s7048_s2] sm:$0x1f]  }
 0x82e   : > { %v2778_v9 = vmax.f32 %v2771_v23, 0.0  ;;  %5204 = vmatpush3.bf16.msra.mxu0 %v6668_v49  ;;  %5264 = vmatpush3.bf16.msra.mxu1 %v6668_v49 }
 0x82f   : > { %5205 = vmatprep.subr.bf16.mxu0 %v5710_v1  ;;  %5265 = vmatprep.subr.bf16.mxu1 %v5710_v1 }
 0x830   : > { %v6674_v16 = vpack.c.bf16 %v2778_v9, %v2777_v44 }
 0x832   : > { %5206 = vmatpush3.bf16.msra.mxu0 %v6674_v16  ;;  %5266 = vmatpush3.bf16.msra.mxu1 %v6674_v16 }
 0x833   : > { %5207 = vmatprep.subr.bf16.mxu0 %v5710_v1  ;;  %5267 = vmatprep.subr.bf16.mxu1 %v5710_v1 }
 0x836   : > { %5208 = vmatpush3.bf16.msra.mxu0 %v6661_v4  ;;  %5268 = vmatpush3.bf16.msra.mxu1 %v6661_v4 }
 0x837   : > { %5209 = vmatprep.subr.bf16.mxu0 %v5710_v1  ;;  %5269 = vmatprep.subr.bf16.mxu1 %v5710_v1 }
 0x83a   : > { %5210 = vmatpush3.bf16.msra.mxu0 %v6664_v33  ;;  %5270 = vmatpush3.bf16.msra.mxu1 %v6664_v33 }
 0x83b   : > { %5215 = vmatprep.subr.bf16.mxu0 %v5710_v1  ;;  %5283 = vmatprep.subr.bf16.mxu1 %v5710_v1 }
 0x83d   : > { %5212 = vmatmul.mubr.msk.bf16.vlgmr.msra.gmra.mxu0 %vm2791_vm6, %v5647_v10  ;;  %5272 = vmatmul.mubr.msk.bf16.vlgmr.msra.gmra.mxu1 %vm2791_vm6, %v5648_v48 }
 0x83e   : > { %5216 = vmatpush3.bf16.msra.mxu0 %v6668_v49  ;;  %5284 = vmatpush3.bf16.msra.mxu1 %v6668_v49 }
 0x83f   : > { %5217 = vmatprep.subr.bf16.mxu0 %v5710_v1  ;;  %5285 = vmatprep.subr.bf16.mxu1 %v5710_v1 }
 0x840   : > { %5223 = vmatprep.mubr.msk.bf16.mxu0 %vm5711_vm1, %v5710_v1  ;;  %5291 = vmatprep.mubr.msk.bf16.mxu1 %vm5711_vm1, %v5710_v1 }
 0x842   : > { %5218 = vmatpush3.bf16.msra.mxu0 %v6674_v16  ;;  %5286 = vmatpush3.bf16.msra.mxu1 %v6674_v16 }
 0x843   : > { %5219 = vmatprep.subr.bf16.mxu0 %v5710_v1  ;;  %5287 = vmatprep.subr.bf16.mxu1 %v5710_v1 }
 0x846   : > { %5220 = vmatpush3.bf16.msra.mxu0 %v6661_v4  ;;  %5288 = vmatpush3.bf16.msra.mxu1 %v6661_v4 }
 0x847   : > { %5221 = vmatprep.subr.bf16.mxu0 %v5710_v1  ;;  %5289 = vmatprep.subr.bf16.mxu1 %v5710_v1 }
 0x84a   : > { %5222 = vmatpush3.bf16.msra.mxu0 %v6664_v33  ;;  %5290 = vmatpush3.bf16.msra.mxu1 %v6664_v33 }
 0x84b   : > { %5227 = vmatprep.subr.bf16.mxu0 %v5710_v1  ;;  %5315 = vmatprep.subr.bf16.mxu1 %v5710_v1 }
 0x84d   : > { %5224 = vmatmul.mubr.msk.bf16.vlgmr.msra.gmra.mxu0 %vm2791_vm6, %v5649_v50  ;;  %5292 = vmatmul.mubr.msk.bf16.vlgmr.msra.gmra.mxu1 %vm2791_vm6, %v5655_v52 }
 0x84e   : > { %5231 = vmatprep.mubr.msk.bf16.mxu0 %vm5711_vm1, %v5710_v1  ;;  %5228 = vmatpush3.bf16.msra.mxu0 %v5650_v24 }
 0x84f   : > { %5229 = vmatprep.subr.bf16.mxu0 %v5710_v1  ;;  %5319 = vmatprep.mubr.msk.bf16.mxu1 %vm5711_vm1, %v5710_v1 }
 0x850   : > { %5316 = vmatpush3.bf16.msra.mxu1 %v5663_v18 }
 0x851   : > { %5317 = vmatprep.subr.bf16.mxu1 %v5710_v1 }
 0x852   : > { %5230 = vmatpush3.bf16.msra.mxu0 %v5651_v31 }
 0x853   : > { %5235 = vmatprep.subr.bf16.mxu0 %v5710_v1 }
 0x854   : > { %5318 = vmatpush3.bf16.msra.mxu1 %v5664_v26 }
 0x855   : > { %5323 = vmatprep.subr.bf16.mxu1 %v5710_v1 }
 0x8fd   : > { %v2832_v62 = vpop.f32.mrf.mxu0  ;;  %v3174_v41 = vpop.f32.mrf.mxu1 }
 0x8ff   : > { %v5213_v55 = vpop.f32.mrf.mxu0  ;;  %v5273_v40 = vpop.f32.mrf.mxu1 }
 0x901   : > { %v2835_v57 = vpop.f32.mrf.mxu0  ;;  %v3177_v6 = vpop.f32.mrf.mxu1 }
 0x902   : > { %v2839_v12 = vpack.c.bf16 %v2835_v57, %v2832_v62  ;;  %v3181_v56 = vpack.c.bf16 %v3177_v6, %v3174_v41  ;;  %v5667_v41 = vld [vmem:[%s7054_s8 + $0x60] sm:$0xff]  }
 0x903   : > { %v5214_v19 = vpop.f32.mrf.mxu0  ;;  %v5274_v8 = vpop.f32.mrf.mxu1 }
 0x90d   : > { %v2889_v27 = vpop.f32.mrf.mxu0  ;;  %v3289_v14 = vpop.f32.mrf.mxu1 }
 0x90f   : > { %v5225_v51 = vpop.f32.mrf.mxu0  ;;  %v5293_v15 = vpop.f32.mrf.mxu1 }
 0x911   : > { %v2892_v53 = vpop.f32.mrf.mxu0  ;;  %v3292_v61 = vpop.f32.mrf.mxu1 }
 0x912   : > { %v2896_v63 = vpack.c.bf16 %v2892_v53, %v2889_v27  ;;  %v3296_v17 = vpack.c.bf16 %v3292_v61, %v3289_v14 }
 0x913   : > { %v5226_v3 = vpop.f32.mrf.mxu0  ;;  %v5294_v20 = vpop.f32.mrf.mxu1 }
 0x914   : > { %5232 = vmatmul.mubr.msk.bf16.vlgmr.msra.gmra.mxu0 %vm2913_vm7, %v2896_v63 }
 0x915   : > { %5236 = vmatpush3.bf16.msra.mxu0 %v5652_v0  ;;  %5239 = vmatprep.mubr.msk.bf16.mxu0 %vm5711_vm1, %v5710_v1 }
 0x916   : > { %5237 = vmatprep.subr.bf16.mxu0 %v5710_v1 }
 0x919   : > { %5238 = vmatpush3.bf16.msra.mxu0 %v5653_v2 }
 0x91a   : > { %5243 = vmatprep.subr.bf16.mxu0 %v5710_v1 }
 0x91c   : > { %5240 = vmatmul.mubr.msk.bf16.vlgmr.msra.gmra.mxu0 %vm2913_vm7, %v2839_v12  ;;  %v5665_v12 = vld [vmem:[%s7048_s2 + $0x30] sm:$0x1f]  }
 0x91d   : > { %5244 = vmatpush3.bf16.msra.mxu0 %v6668_v49  ;;  %5251 = vmatprep.mubr.msk.bf16.mxu0 %vm5711_vm1, %v5710_v1 }
 0x91e   : > { %5245 = vmatprep.subr.bf16.mxu0 %v5710_v1 }
 0x921   : > { %5246 = vmatpush3.bf16.msra.mxu0 %v6674_v16 }
 0x922   : > { %5247 = vmatprep.subr.bf16.mxu0 %v5710_v1 }
 0x925   : > { %5248 = vmatpush3.bf16.msra.mxu0 %v6661_v4 }
 0x926   : > { %5249 = vmatprep.subr.bf16.mxu0 %v5710_v1 }
 0x929   : > { %5250 = vmatpush3.bf16.msra.mxu0 %v6664_v33 }
 0x92a   : > { %5255 = vmatprep.subr.bf16.mxu0 %v5710_v1 }
 0x92c   : > { %5252 = vmatmul.mubr.msk.bf16.vlgmr.msra.gmra.mxu0 %vm2791_vm6, %v5654_v30  ;;  %v5666_v30 = vld [vmem:[%s7054_s8 + $0x68] sm:$0xff]  }
 0x92d   : > { %5259 = vmatprep.mubr.msk.bf16.mxu0 %vm5711_vm1, %v5710_v1  ;;  %5256 = vmatpush3.bf16.msra.mxu0 %v5656_v5 }
 0x92e   : > { %5257 = vmatprep.subr.bf16.mxu0 %v5710_v1 }
 0x931   : > { %5258 = vmatpush3.bf16.msra.mxu0 %v5657_v11 }
 0x932   : > { %5275 = vmatprep.subr.bf16.mxu0 %v5710_v1 }
 0x9d4   : > { %v2951_v58 = vpop.f32.mrf.mxu0 }
 0x9d6   : > { %v5233_v39 = vpop.f32.mrf.mxu0 }
 0x9d7   : > { %v5669_v39 = vld [vmem:[%s7054_s8 + $0x78] sm:$0xff]  }
 0x9d8   : > { %v2954_v47 = vpop.f32.mrf.mxu0 }
 0x9da   : > { %v5234_v28 = vpop.f32.mrf.mxu0 }
 0x9dc   : > { %v3007_v59 = vpop.f32.mrf.mxu0 }
 0x9dd   : > { %v3008_v60 = vadd.f32 %v3007_v59, %v2951_v58  ;;  %v5668_v58 = vld [vmem:[%s7048_s2 + $0x38] sm:$0x1f]  }
 0x9de   : > { %v5241_v37 = vpop.f32.mrf.mxu0 }
 0x9e0   : > { %v3010_v25 = vpop.f32.mrf.mxu0 }
 0x9e1   : > { %v3011_v29 = vadd.f32 %v3010_v25, %v2954_v47  ;;  %v5670_v47 = vld [vmem:[%s7054_s8 + $0x70] sm:$0xff]  }
 0x9e2   : > { %v5242_v13 = vpop.f32.mrf.mxu0 }
 0x9ec   : > { %v3059_v21 = vpop.f32.mrf.mxu0 }
 0x9ee   : > { %v5253_v34 = vpop.f32.mrf.mxu0 }
 0x9f0   : > { %v3062_v35 = vpop.f32.mrf.mxu0 }
 0x9f1   : > { %v3066_v42 = vpack.c.bf16 %v3062_v35, %v3059_v21 }
 0x9f2   : > { %v5254_v46 = vpop.f32.mrf.mxu0 }
 0x9f3   : > { %5260 = vmatmul.mubr.msk.bf16.vlgmr.msra.gmra.mxu0 %vm2913_vm7, %v3066_v42  ;;  %v5671_v42 = vld [vmem:[%s7048_s2 + $0x40] sm:$0x1f]  }
 0x9f4   : > { %5276 = vmatpush3.bf16.msra.mxu0 %v5658_v38  ;;  %5279 = vmatprep.mubr.msk.bf16.mxu0 %vm5711_vm1, %v5710_v1 }
 0x9f5   : > { %5277 = vmatprep.subr.bf16.mxu0 %v5710_v1 }
 0x9f8   : > { %5278 = vmatpush3.bf16.msra.mxu0 %v5659_v22 }
 0x9f9   : > { %5295 = vmatprep.subr.bf16.mxu0 %v5710_v1 }
 0x9fb   : > { %5280 = vmatmul.mubr.msk.bf16.vlgmr.msra.gmra.mxu0 %vm2913_vm7, %v3181_v56 }
 0x9fc   : > { %5296 = vmatpush3.bf16.msra.mxu0 %v5660_v36  ;;  %5299 = vmatprep.mubr.msk.bf16.mxu0 %vm5711_vm1, %v5710_v1 }
 0x9fd   : > { %5297 = vmatprep.subr.bf16.mxu0 %v5710_v1 }
 0xa00   : > { %5298 = vmatpush3.bf16.msra.mxu0 %v5661_v45 }
 0xa01   : > { %5303 = vmatprep.subr.bf16.mxu0 %v5710_v1 }
 0xa03   : > { %5300 = vmatmul.mubr.msk.bf16.vlgmr.msra.gmra.mxu0 %vm2913_vm7, %v3296_v17 }
 0xa04   : > { %5304 = vmatpush3.bf16.msra.mxu0 %v6668_v49  ;;  %5311 = vmatprep.mubr.msk.bf16.mxu0 %vm5711_vm1, %v5710_v1 }
 0xa05   : > { %5305 = vmatprep.subr.bf16.mxu0 %v5710_v1 }
 0xa08   : > { %5306 = vmatpush3.bf16.msra.mxu0 %v6674_v16 }
 0xa09   : > { %5307 = vmatprep.subr.bf16.mxu0 %v5710_v1 }
 0xa0c   : > { %5308 = vmatpush3.bf16.msra.mxu0 %v6661_v4 }
 0xa0d   : > { %5309 = vmatprep.subr.bf16.mxu0 %v5710_v1 }
 0xa10   : > { %5310 = vmatpush3.bf16.msra.mxu0 %v6664_v33 }
 0xa11   : > { %5335 = vmatprep.subr.bf16.mxu0 %v5710_v1 }
 0xa13   : > { %5312 = vmatmul.mubr.msk.bf16.vlgmr.msra.gmra.mxu0 %vm2791_vm6, %v5662_v54 }
 0xa14   : > { %5339 = vmatprep.mubr.msk.bf16.mxu0 %vm5711_vm1, %v5710_v1  ;;  %5336 = vmatpush3.bf16.msra.mxu0 %v5666_v30  ;;  %v5677_v30 = vld [vmem:[%s7056_s10 + $0x28] sm:$0xff]  }
 0xa15   : > { %5337 = vmatprep.subr.bf16.mxu0 %v5710_v1 }
 0xa18   : > { %5338 = vmatpush3.bf16.msra.mxu0 %v5667_v41  ;;  %v5679_v41 = vld [vmem:[%s7056_s10 + $0x20] sm:$0xff]  }
 0xa19   : > { %5343 = vmatprep.subr.bf16.mxu0 %v5710_v1 }
 0xab3   : > { %v3120_v32 = vpop.f32.mrf.mxu0 }
 0xab4   : > { %v3127_v7 = vadd.f32 %v3120_v32, %v3008_v60 }
 0xab5   : > { %v5261_v43 = vpop.f32.mrf.mxu0 }
 0xab7   : > { %v3123_v23 = vpop.f32.mrf.mxu0 }
 0xab8   : > { %v3128_v44 = vadd.f32 %v3123_v23, %v3011_v29 }
 0xab9   : > { %v5262_v9 = vpop.f32.mrf.mxu0 }
 0xabb   : > { %v3235_v10 = vpop.f32.mrf.mxu0 }
 0xabc   : > { %v3242_v48 = vadd.f32 %v3235_v10, %v3127_v7 }
 0xabd   : > { %v5281_v50 = vpop.f32.mrf.mxu0 }
 0xabf   : > { %v3238_v24 = vpop.f32.mrf.mxu0 }
 0xac0   : > { %v3243_v31 = vadd.f32 %v3238_v24, %v3128_v44  ;;  %v4829_v44 = vld [vmem:[%s7055_s9] ss:$0 sm:$0xff] }
 0xac1   : > { %v5282_v52 = vpop.f32.mrf.mxu0 }
 0xac3   : > { %v3350_v62 = vpop.f32.mrf.mxu0 }
 0xac4   : > { %v3357_v55 = vadd.f32 %v3350_v62, %v3242_v48 }
 0xac5   : > { %v5301_v57 = vpop.f32.mrf.mxu0 }
 0xac7   : > { %v3353_v19 = vpop.f32.mrf.mxu0 }
 0xac8   : > { %v3358_v27 = vadd.f32 %v3353_v19, %v3243_v31  ;;  %v5713_v31 = vmov 65535  }
 0xac9   : > { %v5302_v51 = vpop.f32.mrf.mxu0  ;;  %v3837_v52 = vsel %vm658_vm0, 4294967295, %v5713_v31  ;;  %v5696_v31 = vld [vmem:[%s7058_s12 + $0x8] sm:$0xff]  }
 0xaca   : > { %v3838_v19 = vsel %vm3836_vm8, %v3837_v52, 0  ;;  %v5697_v52 = vld [vmem:[%s7058_s12] sm:$0xff]  }
 0xad3   : > { %v3404_v53 = vpop.f32.mrf.mxu0 }
 0xad5   : > { %v5313_v0 = vpop.f32.mrf.mxu0 }
 0xad6   : > { %v3831_v0 = vld [vmem:[%s7049_s3] sm:$0x3] }
 0xad7   : > { %v3407_v63 = vpop.f32.mrf.mxu0 }
 0xad8   : > { %v3411_v3 = vpack.c.bf16 %v3407_v63, %v3404_v53  ;;  %v4831_v53 = vld [vmem:[%s7049_s3 + $0x2] sm:$0x3]  ;;  %v5674_v63 = vld [vmem:[%s7056_s10 + $0x38] sm:$0xff]  }
 0xad9   : > { %v5314_v2 = vpop.f32.mrf.mxu0 }
 0xada   : > { %5320 = vmatmul.mubr.msk.bf16.vlgmr.msra.gmra.mxu1 %vm2913_vm7, %v3411_v3  ;;  %v5676_v3 = vld [vmem:[%s7056_s10 + $0x18] sm:$0xff]   ;;  %v5675_v2 = vld [vmem:[%s7056_s10 + $0x30] sm:$0xff]  }
 0xadb   : > { %5324 = vmatpush3.bf16.msra.mxu1 %v6668_v49  ;;  %5331 = vmatprep.mubr.msk.bf16.mxu1 %vm5711_vm1, %v5710_v1 }
 0xadc   : > { %5325 = vmatprep.subr.bf16.mxu1 %v5710_v1 }
 0xadf   : > { %5326 = vmatpush3.bf16.msra.mxu1 %v6674_v16 }
 0xae0   : > { %5327 = vmatprep.subr.bf16.mxu1 %v5710_v1 }
 0xae3   : > { %5328 = vmatpush3.bf16.msra.mxu1 %v6661_v4 }
 0xae4   : > { %5329 = vmatprep.subr.bf16.mxu1 %v5710_v1 }
 0xae7   : > { %5330 = vmatpush3.bf16.msra.mxu1 %v6664_v33 }
 0xae8   : > { %5355 = vmatprep.subr.bf16.mxu1 %v5710_v1 }
 0xaea   : > { %5332 = vmatmul.mubr.msk.bf16.vlgmr.msra.gmra.mxu1 %vm2791_vm6, %v5665_v12  ;;  %v5678_v12 = vld [vmem:[%s7056_s10 + $0x10] sm:$0xff]  }
 0xaeb   : > { %5359 = vmatprep.mubr.msk.bf16.mxu1 %vm5711_vm1, %v5710_v1  ;;  %5356 = vmatpush3.bf16.msra.mxu1 %v5669_v39 }
 0xaec   : > { %5357 = vmatprep.subr.bf16.mxu1 %v5710_v1 }
 0xaef   : > { %5358 = vmatpush3.bf16.msra.mxu1 %v5670_v47  ;;  %v4843_v47 = vld [vmem:[%s7049_s3 + $0x4] sm:$0x3] }
 0xaf0   : > { %5363 = vmatprep.subr.bf16.mxu1 %v5710_v1 }
 0xb9a   : > { %v3465_v5 = vpop.f32.mrf.mxu1 }
 0xb9b   : > { %v3472_v40 = vadd.f32 %v3465_v5, %v3357_v55  ;;  %v5680_v5 = vld [vmem:[%s7056_s10 + $0x8] sm:$0xff]  }
 0xb9c   : > { %v5321_v6 = vpop.f32.mrf.mxu1 }
 0xb9e   : > { %v3468_v56 = vpop.f32.mrf.mxu1 }
 0xb9f   : > { %v3473_v8 = vadd.f32 %v3468_v56, %v3358_v27 }
 0xba0   : > { %v5322_v11 = vpop.f32.mrf.mxu1 }
 0xbaa   : > { %v3519_v14 = vpop.f32.mrf.mxu1 }
 0xbac   : > { %v5333_v15 = vpop.f32.mrf.mxu1 }
 0xbae   : > { %v3522_v61 = vpop.f32.mrf.mxu1 }
 0xbaf   : > { %v3526_v17 = vpack.c.bf16 %v3522_v61, %v3519_v14  ;;  %v5682_v14 = vld [vmem:[%s7056_s10 + $0x58] sm:$0xff]  }
 0xbb0   : > { %v5334_v20 = vpop.f32.mrf.mxu1 }
 0xbb1   : > { %5340 = vmatmul.mubr.msk.bf16.vlgmr.msra.gmra.mxu0 %vm2913_vm7, %v3526_v17 }
 0xbb2   : > { %5344 = vmatpush3.bf16.msra.mxu0 %v6668_v49  ;;  %5351 = vmatprep.mubr.msk.bf16.mxu0 %vm5711_vm1, %v5710_v1 }
 0xbb3   : > { %5345 = vmatprep.subr.bf16.mxu0 %v5710_v1 }
 0xbb6   : > { %5346 = vmatpush3.bf16.msra.mxu0 %v6674_v16 }
 0xbb7   : > { %5347 = vmatprep.subr.bf16.mxu0 %v5710_v1 }
 0xbba   : > { %5348 = vmatpush3.bf16.msra.mxu0 %v6661_v4 }
 0xbbb   : > { %5349 = vmatprep.subr.bf16.mxu0 %v5710_v1 }
 0xbbe   : > { %5350 = vmatpush3.bf16.msra.mxu0 %v6664_v33 }
 0xbbf   : > { %5375 = vmatprep.subr.bf16.mxu0 %v5710_v1 }
 0xbc1   : > { %5352 = vmatmul.mubr.msk.bf16.vlgmr.msra.gmra.mxu0 %vm2791_vm6, %v5668_v58 }
 0xbc2   : > { %5379 = vmatprep.mubr.msk.bf16.mxu0 %vm5711_vm1, %v5710_v1 }
 0xc71   : > { %v3580_v28 = vpop.f32.mrf.mxu0 }
 0xc72   : > { %v3587_v59 = vadd.f32 %v3580_v28, %v3472_v40  ;;  %v5681_v40 = vld [vmem:[%s7056_s10] sm:$0xff]  }
 0xc73   : > { %v5341_v60 = vpop.f32.mrf.mxu0  ;;  %v4850_v28 = vld [vmem:[%s7049_s3 + $0x6] sm:$0x3] }
 0xc74   : > { %v5684_v60 = vld [vmem:[%s7056_s10 + $0x48] sm:$0xff]  }
 0xc75   : > { %v3583_v37 = vpop.f32.mrf.mxu0 }
 0xc76   : > { %v3588_v25 = vadd.f32 %v3583_v37, %v3473_v8  ;;  %v5685_v37 = vld [vmem:[%s7056_s10 + $0x78] sm:$0xff]  }
 0xc77   : > { %v5342_v29 = vpop.f32.mrf.mxu0 }
 0xc78   : > { %v5687_v29 = vld [vmem:[%s7056_s10 + $0x70] sm:$0xff]  }
 0xc81   : > { %v3634_v13 = vpop.f32.mrf.mxu0 }
 0xc83   : > { %v5353_v21 = vpop.f32.mrf.mxu0 }
 0xc84   : > { %v5689_v21 = vld [vmem:[%s7056_s10 + $0x60] sm:$0xff]  }
 0xc85   : > { %v3637_v34 = vpop.f32.mrf.mxu0 }
 0xc86   : > { %v3641_v35 = vpack.c.bf16 %v3637_v34, %v3634_v13  ;;  %v5688_v13 = vld [vmem:[%s7056_s10 + $0x68] sm:$0xff]  }
 0xc87   : > { %v5354_v38 = vpop.f32.mrf.mxu0 }
 0xc88   : > { %5360 = vmatmul.mubr.msk.bf16.vlgmr.msra.gmra.mxu1 %vm2913_vm7, %v3641_v35 }
 0xc89   : > { %5364 = vmatpush3.bf16.msra.mxu1 %v6668_v49  ;;  %5371 = vmatprep.mubr.msk.bf16.mxu1 %vm5711_vm1, %v5710_v1  ;;  %v5672_v49 = vld [vmem:[%s7054_s8 + $0x88] sm:$0xff]  }
 0xc8a   : > { %5365 = vmatprep.subr.bf16.mxu1 %v5710_v1  ;;  %5376 = vmatpush3.bf16.msra.mxu0 %v5672_v49 }
 0xc8b   : > { %5377 = vmatprep.subr.bf16.mxu0 %v5710_v1 }
 0xc8d   : > { %5366 = vmatpush3.bf16.msra.mxu1 %v6674_v16 }
 0xc8e   : > { %5367 = vmatprep.subr.bf16.mxu1 %v5710_v1 }
 0xc91   : > { %5368 = vmatpush3.bf16.msra.mxu1 %v6661_v4  ;;  %v5673_v4 = vld [vmem:[%s7054_s8 + $0x80] sm:$0xff]  }
 0xc92   : > { %5369 = vmatprep.subr.bf16.mxu1 %v5710_v1  ;;  %5378 = vmatpush3.bf16.msra.mxu0 %v5673_v4 }
 0xc93   : > { %5383 = vmatprep.subr.bf16.mxu0 %v5710_v1 }
 0xc95   : > { %5370 = vmatpush3.bf16.msra.mxu1 %v6664_v33 }
 0xc96   : > { %5389 = vmatprep.subr.bf16.mxu1 %v5710_v1 }
 0xc98   : > { %5372 = vmatmul.mubr.msk.bf16.vlgmr.msra.gmra.mxu1 %vm2791_vm6, %v5671_v42 }
 0xc99   : > { %5391 = vmatprep.mubr.msk.bf16.mxu1 %vm5711_vm1, %v5710_v1 }
 0xd48   : > { %v3695_v33 = vpop.f32.mrf.mxu1 }
 0xd49   : > { %v3702_v16 = vadd.f32 %v3695_v33, %v3587_v59  ;;  %v5683_v59 = vld [vmem:[%s7056_s10 + $0x50] sm:$0xff]  }
 0xd4a   : > { %v5361_v46 = vpop.f32.mrf.mxu1 }
 0xd4c   : > { %v3698_v22 = vpop.f32.mrf.mxu1 }
 0xd4d   : > { %v3703_v36 = vadd.f32 %v3698_v22, %v3588_v25  ;;  %v5686_v25 = vld [vmem:[%s7056_s10 + $0x40] sm:$0xff]  }
 0xd4e   : > { %v5362_v45 = vpop.f32.mrf.mxu1 }
 0xd58   : > { %v3749_v54 = vpop.f32.mrf.mxu1 }
 0xd5a   : > { %v5373_v18 = vpop.f32.mrf.mxu1 }
 0xd5c   : > { %v3752_v26 = vpop.f32.mrf.mxu1 }
 0xd5d   : > { %v3756_v32 = vpack.c.bf16 %v3752_v26, %v3749_v54  ;;  %v5691_v26 = vld [vmem:[%s7058_s12 + $0x30] sm:$0xff]  }
 0xd5e   : > { %v5374_v7 = vpop.f32.mrf.mxu1 }
 0xd5f   : > { %5380 = vmatmul.mubr.msk.bf16.vlgmr.msra.gmra.mxu0 %vm2913_vm7, %v3756_v32 }
 0xd60   : > { %5385 = vmatprep.mubr.msk.bf16.mxu0 %vm5711_vm1, %v5710_v1 }
 0xe1f   : > { %v3810_v43 = vpop.f32.mrf.mxu0 }
 0xe20   : > { %v3817_v23 = vadd.f32 %v3810_v43, %v3702_v16  ;;  %v5692_v43 = vld [vmem:[%s7058_s12 + $0x28] sm:$0xff]  }
 0xe21   : > { %v5381_v9 = vpop.f32.mrf.mxu0 }
 0xe22   : > { %v3826_v48 = vadd.f32 %v4829_v44, %v3817_v23 }
 0xe23   : > { %v3813_v10 = vpop.f32.mrf.mxu0 }
 0xe24   : > { %v3818_v50 = vadd.f32 %v3813_v10, %v3703_v36  ;;  %v3828_v55 = vmax.f32 %v3826_v48, 0.0  ;;  %v5690_v36 = vld [vmem:[%s7058_s12 + $0x38] sm:$0xff]   ;;  %v5693_v10 = vld [vmem:[%s7058_s12 + $0x20] sm:$0xff]  }
 0xe25   : > { %v5382_v24 = vpop.f32.mrf.mxu0 }
 0xe26   : > { %v3827_v62 = vadd.f32 %v4829_v44, %v3818_v50  ;;  %v5694_v50 = vld [vmem:[%s7058_s12 + $0x18] sm:$0xff]   ;;  %v5695_v24 = vld [vmem:[%s7058_s12 + $0x10] sm:$0xff]  }
 0xe28   : > { %v3829_v57 = vmax.f32 %v3827_v62, 0.0 }
 0xe2a   : > { %v3830_v27 = vpack.c.bf16 %v3829_v57, %v3828_v55 }
 0xe2c   : > { %v3840_v51 = vand.u32 %v3838_v19, %v3830_v27 }
 0xe2e   : > { %5384 = vmatpush3.bf16.msra.mxu0 %v3840_v51  ;;  %5390 = vmatpush3.bf16.msra.mxu1 %v3840_v51 }
 0xe2f   : > { %5395 = vmatprep.subr.bf16.mxu0 %v5710_v1  ;;  %5407 = vmatprep.subr.bf16.mxu1 %v5710_v1 }
 0xe31   : > { %5392 = vmatmul.mubr.msk.bf16.vlgmr.msra.gmra.mxu1 %vm3832_vm9, %v4831_v53  ;;  %5386 = vmatmul.mubr.msk.bf16.vlgmr.msra.gmra.mxu0 %vm3832_vm9, %v3831_v0  ;;  %v4857_v53 = vld [vmem:[%s7057_s11] ss:$0 sm:$0xff] }
 0xe32   : > { %5396 = vmatpush3.bf16.msra.mxu0 %v5674_v63  ;;  %5408 = vmatpush3.bf16.msra.mxu1 %v5676_v3 }
 0xe33   : > { %5397 = vmatprep.subr.bf16.mxu0 %v5710_v1  ;;  %5409 = vmatprep.subr.bf16.mxu1 %v5710_v1 }
 0xe34   : > { %5403 = vmatprep.mubr.msk.bf16.mxu0 %vm5711_vm1, %v5710_v1  ;;  %5415 = vmatprep.mubr.msk.bf16.mxu1 %vm5711_vm1, %v5710_v1 }
 0xe36   : > { %5398 = vmatpush3.bf16.msra.mxu0 %v5675_v2  ;;  %5410 = vmatpush3.bf16.msra.mxu1 %v5678_v12 }
 0xe37   : > { %5399 = vmatprep.subr.bf16.mxu0 %v5710_v1  ;;  %5411 = vmatprep.subr.bf16.mxu1 %v5710_v1 }
 0xe3a   : > { %5400 = vmatpush3.bf16.msra.mxu0 %v5677_v30  ;;  %5412 = vmatpush3.bf16.msra.mxu1 %v5680_v5 }
 0xe3b   : > { %5401 = vmatprep.subr.bf16.mxu0 %v5710_v1  ;;  %5413 = vmatprep.subr.bf16.mxu1 %v5710_v1 }
 0xe3e   : > { %5402 = vmatpush3.bf16.msra.mxu0 %v5679_v41  ;;  %5414 = vmatpush3.bf16.msra.mxu1 %v5681_v40  ;;  %v4858_v41 = vld [vmem:[%s7059_s13] ss:$0 sm:$0xff] }
 0xe3f   : > { %5419 = vmatprep.subr.bf16.mxu0 %v5710_v1  ;;  %5425 = vmatprep.subr.bf16.mxu1 %v5710_v1 }
 0xef1   : > { %v3930_v6 = vpop.f32.mrf.mxu1  ;;  %v3876_v56 = vpop.f32.mrf.mxu0 }
 0xef2   : > { %v3936_v8 = vpack.c.bf16 %v3930_v6, %v3930_v6  ;;  %v3882_v11 = vpack.c.bf16 %v3876_v56, %v3876_v56 }
 0xef3   : > { %v5393_v15 = vpop.f32.mrf.mxu1  ;;  %v5387_v61 = vpop.f32.mrf.mxu0 }
 0xef4   : > { %5404 = vmatmul.mubr.msk.bf16.vlgmr.msra.gmra.mxu0 %vm3969_vm10, %v3936_v8  ;;  %5416 = vmatmul.mubr.msk.bf16.vlgmr.msra.gmra.mxu1 %vm3969_vm10, %v3882_v11 }
 0xef5   : > { %5420 = vmatpush3.bf16.msra.mxu0 %v3840_v51  ;;  %v3933_v17 = vpop.f32.mrf.mxu1  ;;  %5421 = vmatprep.mubr.msk.bf16.mxu0 %vm5711_vm1, %v5710_v1  ;;  %v3879_v20 = vpop.f32.mrf.mxu0 }
 0xef6   : > { %5437 = vmatprep.subr.bf16.mxu0 %v5710_v1  ;;  %5426 = vmatpush3.bf16.msra.mxu1 %v5682_v14 }
 0xef7   : > { %v5394_v58 = vpop.f32.mrf.mxu1  ;;  %v5388_v39 = vpop.f32.mrf.mxu0  ;;  %5427 = vmatprep.subr.bf16.mxu1 %v5710_v1  ;;  %5433 = vmatprep.mubr.msk.bf16.mxu1 %vm5711_vm1, %v5710_v1 }
 0xef8   : > { %v4456_v58 = vlaneseq }
 0xefa   : > { %5428 = vmatpush3.bf16.msra.mxu1 %v5683_v59  ;;  %v4457_v39 = vand.u32 127, %v4456_v58 }
 0xefb   : > { %5429 = vmatprep.subr.bf16.mxu1 %v5710_v1 }
 0xefc   : > { %5422 = vmatmul.mubr.msk.bf16.vlgmr.msra.gmra.mxu0 %vm3832_vm9, %v4843_v47  ;;  %vm4458_vm11 = vcmp.lt.s32.totalorder %v4457_v39, 4 }
 0xefd   : > { %5438 = vmatpush3.bf16.msra.mxu0 %v3840_v51  ;;  %5439 = vmatprep.mubr.msk.bf16.mxu0 %vm5711_vm1, %v5710_v1 }
 0xefe   : > { %5443 = vmatprep.subr.bf16.mxu0 %v5710_v1  ;;  %5430 = vmatpush3.bf16.msra.mxu1 %v5684_v60 }
 0xeff   : > { %5431 = vmatprep.subr.bf16.mxu1 %v5710_v1 }
 0xf02   : > { %5432 = vmatpush3.bf16.msra.mxu1 %v5686_v25 }
 0xf03   : > { %5455 = vmatprep.subr.bf16.mxu1 %v5710_v1 }
 0xf04   : > { %5440 = vmatmul.mubr.msk.bf16.vlgmr.msra.gmra.mxu0 %vm3832_vm9, %v4850_v28 }
 0xf05   : > { %5451 = vmatprep.mubr.msk.bf16.mxu0 %vm5711_vm1, %v5710_v1  ;;  %5444 = vmatpush3.bf16.msra.mxu0 %v5685_v37 }
 0xf06   : > { %5445 = vmatprep.subr.bf16.mxu0 %v5710_v1 }
 0xf09   : > { %5446 = vmatpush3.bf16.msra.mxu0 %v5687_v29 }
 0xf0a   : > { %5447 = vmatprep.subr.bf16.mxu0 %v5710_v1 }
 0xf0d   : > { %5448 = vmatpush3.bf16.msra.mxu0 %v5688_v13 }
 0xf0e   : > { %5449 = vmatprep.subr.bf16.mxu0 %v5710_v1 }
 0xf11   : > { %5450 = vmatpush3.bf16.msra.mxu0 %v5689_v21 }
 0xfb4   : > { %v4007_v34 = vpop.f32.mrf.mxu0  ;;  %v4074_v35 = vpop.f32.mrf.mxu1 }
 0xfb5   : > { %v4075_v38 = vadd.f32 %v4074_v35, %v4007_v34 }
 0xfb6   : > { %v5405_v42 = vpop.f32.mrf.mxu0  ;;  %v5417_v49 = vpop.f32.mrf.mxu1 }
 0xfb8   : > { %v4010_v4 = vpop.f32.mrf.mxu0  ;;  %v4077_v33 = vpop.f32.mrf.mxu1 }
 0xfba   : > { %v5406_v16 = vpop.f32.mrf.mxu0  ;;  %v5418_v46 = vpop.f32.mrf.mxu1 }
 0xfbc   : > { %v4119_v22 = vpop.f32.mrf.mxu0 }
 0xfbd   : > { %v4125_v45 = vpack.c.bf16 %v4119_v22, %v4119_v22 }
 0xfbe   : > { %v5423_v54 = vpop.f32.mrf.mxu0 }
 0xfbf   : > { %5434 = vmatmul.mubr.msk.bf16.vlgmr.msra.gmra.mxu1 %vm3969_vm10, %v4125_v45 }
 0xfc0   : > { %v4122_v18 = vpop.f32.mrf.mxu0  ;;  %5456 = vmatpush3.bf16.msra.mxu1 %v5690_v36  ;;  %5471 = vmatprep.mubr.msk.bf16.mxu1 %vm5711_vm1, %v5710_v1 }
 0xfc1   : > { %5457 = vmatprep.subr.bf16.mxu1 %v5710_v1 }
 0xfc2   : > { %v5424_v32 = vpop.f32.mrf.mxu0 }
 0xfc4   : > { %v4241_v7 = vpop.f32.mrf.mxu0  ;;  %5458 = vmatpush3.bf16.msra.mxu1 %v5691_v26 }
 0xfc5   : > { %v4247_v23 = vpack.c.bf16 %v4241_v7, %v4241_v7  ;;  %5459 = vmatprep.subr.bf16.mxu1 %v5710_v1 }
 0xfc6   : > { %v5441_v44 = vpop.f32.mrf.mxu0 }
 0xfc7   : > { %5452 = vmatmul.mubr.msk.bf16.vlgmr.msra.gmra.mxu0 %vm3969_vm10, %v4247_v23 }
 0xfc8   : > { %v4244_v9 = vpop.f32.mrf.mxu0  ;;  %5460 = vmatpush3.bf16.msra.mxu1 %v5692_v43 }
 0xfc9   : > { %5461 = vmatprep.subr.bf16.mxu1 %v5710_v1 }
 0xfca   : > { %v5442_v48 = vpop.f32.mrf.mxu0 }
 0xfcc   : > { %5462 = vmatpush3.bf16.msra.mxu1 %v5693_v10 }
 0xfcd   : > { %5463 = vmatprep.subr.bf16.mxu1 %v5710_v1 }
 0xfd0   : > { %5464 = vmatpush3.bf16.msra.mxu1 %v5694_v50 }
 0xfd1   : > { %5465 = vmatprep.subr.bf16.mxu1 %v5710_v1 }
 0xfd4   : > { %5466 = vmatpush3.bf16.msra.mxu1 %v5695_v24 }
 0xfd5   : > { %5467 = vmatprep.subr.bf16.mxu1 %v5710_v1 }
 0xfd8   : > { %5468 = vmatpush3.bf16.msra.mxu1 %v5696_v31 }
 0xfd9   : > { %5469 = vmatprep.subr.bf16.mxu1 %v5710_v1 }
 0xfdc   : > { %5470 = vmatpush3.bf16.msra.mxu1 %v5697_v52 }
0x107f   : > { %v4195_v62 = vpop.f32.mrf.mxu1 }
0x1080   : > { %v4201_v27 = vadd.f32 %v4195_v62, %v4075_v38 }
0x1081   : > { %v5435_v55 = vpop.f32.mrf.mxu1 }
0x1083   : > { %v4198_v57 = vpop.f32.mrf.mxu1 }
0x1085   : > { %v5436_v19 = vpop.f32.mrf.mxu1 }
0x1087   : > { %v4317_v51 = vpop.f32.mrf.mxu0 }
0x1088   : > { %v4323_v0 = vadd.f32 %v4317_v51, %v4201_v27 }
0x1089   : > { %v5453_v63 = vpop.f32.mrf.mxu0 }
0x108a   : > { %v4331_v3 = vadd.f32 %v4857_v53, %v4323_v0 }
0x108b   : > { %v4320_v2 = vpop.f32.mrf.mxu0 }
0x108c   : > { %v4332_v1 = vmax.f32 %v4331_v3, 0.0 }
0x108d   : > { %v5454_v12 = vpop.f32.mrf.mxu0 }
0x108e   : > { %v4333_v30 = vpack.c.bf16 %v4332_v1, %v4332_v1 }
0x1090   : > { %5472 = vmatmul.mubr.bf16.vlgmr.msra.gmra.mxu1 %v4333_v30 }
0x1150   : > { %v4439_v5 = vpop.f32.mrf.mxu1 }
0x1151   : > { %v4440_v40 = vadd.f32 %v4858_v41, %v4439_v5 }
0x1152   : > { %v5473_v6 = vpop.f32.mrf.mxu1 }
0x1153   : > { %4446 = vrot.lane.b32.xlu0 %v4440_v40, %s5714_s27 }
0x1154   : > { %v4442_v56 = vpop.f32.mrf.mxu1 }
0x1156   : > { %v5474_v8 = vpop.f32.mrf.mxu1 }
0x11c5   : > { %v4447_v11 = vpop.permute.xlu0 %4446 }
0x11c6   : > { %v4449_v14 = vsub.f32 %v4440_v40, %v4447_v11 }
0x11c8   : > { %v4450_v15 = vsub.f32 0.0, %v4449_v14 }
0x11ca   : > { %v4451_v61 = vmul.f32 1.442695, %v4450_v15 }
0x11cc   : > { %5698 = vpow2.f32 %v4451_v61 }
0x11d9   : > { %v5699_v17 = vpop.eup %5698 }
0x11da   : > { %v4453_v20 = vadd.f32 1.0, %v5699_v17 }
0x11dc   : > { %5700 = vrcp.f32 %v4453_v20 }
0x11e9   : > { %v5701_v47 = vpop.eup %5700 }
0x11ea   : > { %v4459_v28 = vsel %vm4458_vm11, %v5701_v47, %v4440_v40 }
0x11eb   : > { %4461 = vst.msk [vmem:[%s465_s17] sm:$0xf] %vm4460_vm12, %v4459_v28 }
0x11ec PF: > { %s24_s29 = sadd.s32 1, %s5708_s29  }
0x11ed   : > { %p21_p4 = scmp.ge.s32.totalorder %s24_s29, 4  }
0x11ef   :  { %23 = sbr.rel (!%p21_p4) target bundleno = 1 (0x1), region = 125 }

</bundles_post_ra>
